<compile_context>
chip_gen: v5e
topology: v5e:2x2
jax: 0.10.0
libtpu: 0.0.40
codegen_flags: <defaults>
</compile_context>

<pallas_src>
import functools
import math

import jax
import jax.numpy as jnp
from jax.experimental import pallas as pl
from jax.experimental.pallas import tpu as pltpu


# ----------------------------------------------------------------------------- kernel

def _sdpa_kernel(q_ref, k_ref, v_ref, o_ref, *, scale):
    """Scaled dot-product attention on a (Gb, L, D) block of independent groups."""
    # Fold 1/sqrt(d_k) into Q (Gb*L*D elements) instead of the scores (Gb*L*L).
    q = q_ref[...].astype(jnp.float32) * scale
    k = k_ref[...].astype(jnp.float32)
    v = v_ref[...].astype(jnp.float32)

    # One batched contraction over all Gb groups (heads/time are just batch dims).
    s = jnp.einsum("gqd,gkd->gqk", q, k, preferred_element_type=jnp.float32)

    # Numerically stable softmax over the key axis, in f32 on the VPU/EUP.
    s = s - jnp.max(s, axis=-1, keepdims=True)
    p = jnp.exp(s)
    p = p / jnp.sum(p, axis=-1, keepdims=True)

    ctx = jnp.einsum("gqk,gkd->gqd", p, v, preferred_element_type=jnp.float32)
    o_ref[...] = ctx.astype(o_ref.dtype)


# ----------------------------------------------------------------------------- wrapper

def _pick_group_block(G, L, D, itemsize, vmem_budget_bytes=8 << 20, min_grid=2):
    """Largest divisor of G whose per-step VMEM footprint (with (8,128) tile
    padding and double-buffering) fits the budget, while leaving a grid of at
    least `min_grid` steps so v7x megacore can shard across both cores."""
    r8 = lambda x: -(-x // 8) * 8
    r128 = lambda x: -(-x // 128) * 128
    # q, k, v, out blocks (double-buffered) + score/prob temporaries, padded.
    per_group = (4 * 2 * r8(L) * r128(D) + 2 * r8(L) * r128(L)) * itemsize
    gb = max(1, min(G, vmem_budget_bytes // max(per_group, 1)))
    if G >= min_grid:
        gb = min(gb, max(1, G // min_grid))
    while G % gb:  # exact tiling — never drop trailing groups
        gb -= 1
    return gb


def scaled_dot_product_attention(q, k, v):
    """q, k, v: [..., L, D] with identical shapes (e.g. [B, H, len1, len2, d_k])."""
    assert q.shape == k.shape == v.shape
    *lead, L, D = q.shape
    G = 1
    for s in lead:
        G *= s

    qf = q.reshape(G, L, D)
    kf = k.reshape(G, L, D)
    vf = v.reshape(G, L, D)

    scale = 1.0 / math.sqrt(D)
    gb = _pick_group_block(G, L, D, q.dtype.itemsize)
    grid = G // gb

    # Note: with d_k < 128 the HBM writeback is lane-masked; a fully lane-dense
    # out_spec would require an in-kernel (Gb, L*D) <-> (Gb, L, D) relayout,
    # which is skipped here in favor of a layout that lowers robustly.
    out = pl.pallas_call(
        functools.partial(_sdpa_kernel, scale=scale),
        out_shape=jax.ShapeDtypeStruct((G, L, D), q.dtype),
        grid=(grid,),
        in_specs=[
            pl.BlockSpec((gb, L, D), lambda i: (i, 0, 0)),
            pl.BlockSpec((gb, L, D), lambda i: (i, 0, 0)),
            pl.BlockSpec((gb, L, D), lambda i: (i, 0, 0)),
        ],
        out_specs=pl.BlockSpec((gb, L, D), lambda i: (i, 0, 0)),
        compiler_params=pltpu.CompilerParams(dimension_semantics=("parallel",)),
    )(qf, kf, vf)
    return out.reshape(q.shape)


# ----------------------------------------------------------------------------- main

if __name__ == "__main__":
    # Q/K/V: [batch, n_heads, len1, len2, d_k]; embed_size = n_heads * d_k = 32.
    B, H, L1, L2, Dk = 2, 4, 8, 16, 8

    key = jax.random.PRNGKey(0)
    kq, kk, kv = jax.random.split(key, 3)
    Q = jax.random.normal(kq, (B, H, L1, L2, Dk), jnp.float32)
    K = jax.random.normal(kk, (B, H, L1, L2, Dk), jnp.float32)
    V = jax.random.normal(kv, (B, H, L1, L2, Dk), jnp.float32)

    fwd = jax.jit(scaled_dot_product_attention)
    out = fwd(Q, K, V)
    jax.block_until_ready(out)
    assert out.shape == Q.shape

    # Pure-JAX reference check (same math as the PyTorch module).
    ref_s = jnp.einsum("bhtqd,bhtkd->bhtqk", Q, K) / math.sqrt(Dk)
    ref_p = jax.nn.softmax(ref_s, axis=-1)
    ref = jnp.einsum("bhtqk,bhtkd->bhtqd", ref_p, V)
    assert float(jnp.max(jnp.abs(out - ref))) < 1e-3

    print("KERNEL_OK")
</pallas_src>

<mosaic_0001>
module attributes {stable_mosaic.version = 11 : i64} {
  func.func @_sdpa_kernel(%arg0: i32, %arg1: memref<32x16x8xf32, #tpu.memory_space<vmem>>, %arg2: memref<32x16x8xf32, #tpu.memory_space<vmem>>, %arg3: memref<32x16x8xf32, #tpu.memory_space<vmem>>, %arg4: memref<32x16x8xf32, #tpu.memory_space<vmem>>) attributes {dimension_semantics = [#tpu.dimension_semantics<parallel>], iteration_bounds = array<i64: 2>, scalar_prefetch = 0 : i64, scratch_operands = 0 : i64, tpu.core_type = #tpu.core_type<tc>, window_params = [{transform_indices = @transform_0, window_bounds = array<i64: 32, 16, 8>}, {transform_indices = @transform_1, window_bounds = array<i64: 32, 16, 8>}, {transform_indices = @transform_2, window_bounds = array<i64: 32, 16, 8>}, {transform_indices = @transform_3, window_bounds = array<i64: 32, 16, 8>}]} {
    %c0 = arith.constant 0 : index
    %c0_0 = arith.constant 0 : index
    %c0_1 = arith.constant 0 : index
    %0 = vector.load %arg1[%c0, %c0_0, %c0_1] : memref<32x16x8xf32, #tpu.memory_space<vmem>>, vector<32x16x8xf32>
    %cst = arith.constant 0.353553385 : f32
    %1 = vector.broadcast %cst : f32 to vector<32x16x8xf32>
    %2 = arith.mulf %0, %1 : vector<32x16x8xf32>
    %c0_2 = arith.constant 0 : index
    %c0_3 = arith.constant 0 : index
    %c0_4 = arith.constant 0 : index
    %3 = vector.load %arg2[%c0_2, %c0_3, %c0_4] : memref<32x16x8xf32, #tpu.memory_space<vmem>>, vector<32x16x8xf32>
    %c0_5 = arith.constant 0 : index
    %c0_6 = arith.constant 0 : index
    %c0_7 = arith.constant 0 : index
    %4 = vector.load %arg3[%c0_5, %c0_6, %c0_7] : memref<32x16x8xf32, #tpu.memory_space<vmem>>, vector<32x16x8xf32>
    "tpu.trace_start"() <{level = 10 : i32, message = "gqd,gkd->gqk"}> : () -> ()
    %cst_8 = arith.constant dense<0.000000e+00> : vector<32x16x16xf32>
    %5 = tpu.matmul %2, %3, %cst_8 {dimension_numbers = #tpu.dot_dimension_numbers<[2], [2], [1], [1], [0, 0, 0, 1, 1, 1], [0], [0]>} : vector<32x16x8xf32>, vector<32x16x8xf32>, vector<32x16x16xf32> -> vector<32x16x16xf32>
    "tpu.trace_stop"() : () -> ()
    %cst_9 = arith.constant dense<0xFF800000> : vector<32x16xf32>
    %6 = vector.multi_reduction <maximumf>, %5, %cst_9 [2] : vector<32x16x16xf32> to vector<32x16xf32>
    %7 = vector.shape_cast %6 : vector<32x16xf32> to vector<32x16x1xf32>
    %8 = vector.broadcast %7 : vector<32x16x1xf32> to vector<32x16x16xf32>
    %9 = arith.subf %5, %8 : vector<32x16x16xf32>
    %10 = math.exp %9 : vector<32x16x16xf32>
    %cst_10 = arith.constant dense<0.000000e+00> : vector<32x16xf32>
    %11 = vector.multi_reduction <add>, %10, %cst_10 [2] : vector<32x16x16xf32> to vector<32x16xf32>
    %12 = vector.shape_cast %11 : vector<32x16xf32> to vector<32x16x1xf32>
    %13 = vector.broadcast %12 : vector<32x16x1xf32> to vector<32x16x16xf32>
    %14 = arith.divf %10, %13 : vector<32x16x16xf32>
    "tpu.trace_start"() <{level = 10 : i32, message = "gqk,gkd->gqd"}> : () -> ()
    %cst_11 = arith.constant dense<0.000000e+00> : vector<32x16x8xf32>
    %15 = tpu.matmul %14, %4, %cst_11 {dimension_numbers = #tpu.dot_dimension_numbers<[2], [1], [1], [2], [0, 0, 0, 1, 1, 2], [0], [0]>} : vector<32x16x16xf32>, vector<32x16x8xf32>, vector<32x16x8xf32> -> vector<32x16x8xf32>
    "tpu.trace_stop"() : () -> ()
    %c0_12 = arith.constant 0 : index
    %c0_13 = arith.constant 0 : index
    %c0_14 = arith.constant 0 : index
    %16 = vector.load %arg4[%c0_12, %c0_13, %c0_14] : memref<32x16x8xf32, #tpu.memory_space<vmem>>, vector<32x16x8xf32>
    tpu.vector_store %arg4[%c0_12, %c0_13, %c0_14], %15 {strides = array<i32>} : memref<32x16x8xf32, #tpu.memory_space<vmem>>, vector<32x16x8xf32>,
    return
  }
  func.func @transform_0(%arg0: i32) -> (i32, i32, i32) {
    %c0_i32 = arith.constant 0 : i32
    %c0_i32_0 = arith.constant 0 : i32
    %c0_i32_1 = arith.constant 0 : i32
    return %arg0, %c0_i32, %c0_i32_0 : i32, i32, i32
  }
  func.func @transform_1(%arg0: i32) -> (i32, i32, i32) {
    %c0_i32 = arith.constant 0 : i32
    %c0_i32_0 = arith.constant 0 : i32
    %c0_i32_1 = arith.constant 0 : i32
    return %arg0, %c0_i32, %c0_i32_0 : i32, i32, i32
  }
  func.func @transform_2(%arg0: i32) -> (i32, i32, i32) {
    %c0_i32 = arith.constant 0 : i32
    %c0_i32_0 = arith.constant 0 : i32
    %c0_i32_1 = arith.constant 0 : i32
    return %arg0, %c0_i32, %c0_i32_0 : i32, i32, i32
  }
  func.func @transform_3(%arg0: i32) -> (i32, i32, i32) {
    %c0_i32 = arith.constant 0 : i32
    %c0_i32_0 = arith.constant 0 : i32
    %c0_i32_1 = arith.constant 0 : i32
    return %arg0, %c0_i32, %c0_i32_0 : i32, i32, i32
  }
}

</mosaic_0001>

<bundles_post_ra>
// kernel: scaled_dot_product_attention.1
= control target key start
LH: loop header
LB: loop body
LE: loop exit
PB: predicated region body
PF: predicated region fallthrough
CT: control target
= control target key end

     0   :  { %s4724_s12 = smov 0   ;;  %s7670_s0 = inlined_call_operand.vmem [shape: f32[64,16,8], index: 0, kind: input, shape index: {}]   ;;  %s7671_s1 = inlined_call_operand.vmem [shape: f32[64,16,8], index: 1, kind: input, shape index: {}]   ;;  %s7672_s2 = inlined_call_operand.vmem [shape: f32[64,16,8], index: 2, kind: input, shape index: {}]   ;;  %s7673_s3 = inlined_call_operand.vmem [shape: f32[64,16,8], index: 3, kind: output, shape index: {}]  }
   0x1 LB: > { %s4217_s13 = sadd.s32 4294967295, %s4702_s12   ;;  %p4221_p0 = scmp.ge.s32.totalorder %s4702_s12, 1  ;;  %s4702_s12 = sphi %s4724_s12, %s13_s12  }
   0x2   : > { %p163_p1 = scmp.lt.s32.totalorder %s4702_s12, 3 }
   0x4   : > { %p164_p2 = pnand %p4221_p0, %p163_p1 }
   0x6   : > { %167 = sbr.rel (%p164_p2) target bundleno = 816 (0x330), region = 32 }
   0xb   : > { %s4222_s14 = sshll.u32 %s4217_s13, 5  ;;  %vm485_vm0 = vcmask 64512   ;;  %vm7733_vm1 = vcmask 130048  }
   0xc   : > { %p202_p3 = scmp.lt.s32.totalorder %s4222_s14, 63 }
   0xe   : > { %s8023_s14 = smov (!%p202_p3, %s4222_s14), 63 }
   0xf   : > { %s4732_s15 = sshll.u32 %s8023_s14, 4 }
  0x10   : > { %s4738_s18 = scalar_lea.vmem %s7671_s1, %s4732_s15  ;;  %s4744_s21 = scalar_lea.vmem %s7670_s0, %s4732_s15 }
  0x11   : > { %v358_v0 = vld [vmem:[%s4738_s18 + $0x8] sm:$0xff]  ;;  %v360_v1 = vld [vmem:[%s4738_s18 + $0x18] sm:$0xff]  ;;  %v357_v4 = vld [vmem:[%s4738_s18] sm:$0xff]  ;;  %s5615_s24 = scalar_lea.vmem %s7672_s2, %s4732_s15  ;;  %s6956_s27 = scalar_lea.vmem %s7673_s3, %s4732_s15 }
  0x12   : > { %v362_v2 = vld [vmem:[%s4738_s18 + $0x28] sm:$0xff]  ;;  %4234 = vmatpush.xpose.msk.msra.mxu0 %vm485_vm0, %v358_v0  ;;  %4238 = vmatpush.xpose.msk.msra.mxu1 %vm485_vm0, %v360_v1  ;;  %v364_v3 = vld [vmem:[%s4738_s18 + $0x38] sm:$0xff]  ;;  %v359_v5 = vld [vmem:[%s4738_s18 + $0x10] sm:$0xff] }
  0x13   : > { %4242 = vmatpush.xpose.msk.msra.mxu2 %vm485_vm0, %v362_v2  ;;  %4246 = vmatpush.xpose.msk.msra.mxu3 %vm485_vm0, %v364_v3  ;;  %v361_v6 = vld [vmem:[%s4738_s18 + $0x20] sm:$0xff]  ;;  %v363_v7 = vld [vmem:[%s4738_s18 + $0x30] sm:$0xff]  ;;  %v366_v16 = vld [vmem:[%s4738_s18 + $0x48] sm:$0xff] }
  0x14   : > { %v229_v8 = vld [vmem:[%s4744_s21] sm:$0xff]  ;;  %v231_v9 = vld [vmem:[%s4744_s21 + $0x10] sm:$0xff]  ;;  %v368_v17 = vld [vmem:[%s4738_s18 + $0x58] sm:$0xff] }
  0x15   : > { %v233_v10 = vld [vmem:[%s4744_s21 + $0x20] sm:$0xff]  ;;  %v235_v11 = vld [vmem:[%s4744_s21 + $0x30] sm:$0xff]  ;;  %v293_v12 = vmul.f32 0.35355338, %v229_v8  ;;  %v295_v13 = vmul.f32 0.35355338, %v231_v9 }
  0x16   : > { %4235 = vmatpush.xpose.msk.msra.mxu0 %vm485_vm0, %v357_v4  ;;  %4239 = vmatpush.xpose.msk.msra.mxu1 %vm485_vm0, %v359_v5  ;;  %v297_v14 = vmul.f32 0.35355338, %v233_v10  ;;  %v299_v15 = vmul.f32 0.35355338, %v235_v11  ;;  %v370_v18 = vld [vmem:[%s4738_s18 + $0x68] sm:$0xff]  ;;  %v365_v19 = vld [vmem:[%s4738_s18 + $0x40] sm:$0xff] }
  0x17   : > { %4243 = vmatpush.xpose.msk.msra.mxu2 %vm485_vm0, %v361_v6  ;;  %4247 = vmatpush.xpose.msk.msra.mxu3 %vm485_vm0, %v363_v7  ;;  %v367_v20 = vld [vmem:[%s4738_s18 + $0x50] sm:$0xff]  ;;  %v232_v21 = vld [vmem:[%s4744_s21 + $0x18] sm:$0xff]  ;;  %v230_v22 = vld [vmem:[%s4744_s21 + $0x8] sm:$0xff] }
  0x18   : > { %v372_v23 = vld [vmem:[%s4738_s18 + $0x78] sm:$0xff]  ;;  %v234_v24 = vld [vmem:[%s4744_s21 + $0x28] sm:$0xff]  ;;  %v369_v26 = vld [vmem:[%s4738_s18 + $0x60] sm:$0xff]  ;;  %v296_v29 = vmul.f32 0.35355338, %v232_v21 }
  0x19   : > { %4236 = vmatmul.msk.f32.vlgmr.msra.gmra.mxu0 %vm485_vm0, %v293_v12  ;;  %4240 = vmatmul.msk.f32.vlgmr.msra.gmra.mxu1 %vm485_vm0, %v295_v13  ;;  %v236_v25 = vld [vmem:[%s4744_s21 + $0x38] sm:$0xff]  ;;  %v371_v27 = vld [vmem:[%s4738_s18 + $0x70] sm:$0xff]  ;;  %v374_v28 = vld [vmem:[%s4738_s18 + $0x88] sm:$0xff]  ;;  %v294_v30 = vmul.f32 0.35355338, %v230_v22 }
  0x1a   : > { %4250 = vmatpush.xpose.msk.msrb.mxu0 %vm485_vm0, %v366_v16  ;;  %4254 = vmatpush.xpose.msk.msrb.mxu1 %vm485_vm0, %v368_v17  ;;  %v376_v31 = vld [vmem:[%s4738_s18 + $0x98] sm:$0xff]  ;;  %v378_v32 = vld [vmem:[%s4738_s18 + $0xa8] sm:$0xff]  ;;  %v298_v33 = vmul.f32 0.35355338, %v234_v24  ;;  %v300_v34 = vmul.f32 0.35355338, %v236_v25 }
  0x1b   : > { %4244 = vmatmul.msk.f32.vlgmr.msra.gmra.mxu2 %vm485_vm0, %v297_v14  ;;  %4248 = vmatmul.msk.f32.vlgmr.msra.gmra.mxu3 %vm485_vm0, %v299_v15  ;;  %v380_v35 = vld [vmem:[%s4738_s18 + $0xb8] sm:$0xff]  ;;  %v373_v36 = vld [vmem:[%s4738_s18 + $0x80] sm:$0xff]  ;;  %v375_v37 = vld [vmem:[%s4738_s18 + $0x90] sm:$0xff] }
  0x1c   : > { %4258 = vmatpush.xpose.msk.msrb.mxu2 %vm485_vm0, %v370_v18  ;;  %4262 = vmatpush.xpose.msk.msrb.mxu3 %vm485_vm0, %v372_v23  ;;  %v377_v38 = vld [vmem:[%s4738_s18 + $0xa0] sm:$0xff]  ;;  %v379_v39 = vld [vmem:[%s4738_s18 + $0xb0] sm:$0xff]  ;;  %v382_v48 = vld [vmem:[%s4738_s18 + $0xc8] sm:$0xff] }
  0x1d   : > { %v237_v40 = vld [vmem:[%s4744_s21 + $0x40] sm:$0xff]  ;;  %v239_v41 = vld [vmem:[%s4744_s21 + $0x50] sm:$0xff]  ;;  %v386_v49 = vld [vmem:[%s4738_s18 + $0xe8] sm:$0xff] }
  0x1e   : > { %4251 = vmatpush.xpose.msk.msrb.mxu0 %vm485_vm0, %v365_v19  ;;  %4255 = vmatpush.xpose.msk.msrb.mxu1 %vm485_vm0, %v367_v20  ;;  %v241_v42 = vld [vmem:[%s4744_s21 + $0x60] sm:$0xff]  ;;  %v243_v43 = vld [vmem:[%s4744_s21 + $0x70] sm:$0xff]  ;;  %v301_v44 = vmul.f32 0.35355338, %v237_v40  ;;  %v303_v45 = vmul.f32 0.35355338, %v239_v41 }
  0x1f   : > { %v305_v46 = vmul.f32 0.35355338, %v241_v42  ;;  %v307_v47 = vmul.f32 0.35355338, %v243_v43  ;;  %v384_v50 = vld [vmem:[%s4738_s18 + $0xd8] sm:$0xff]  ;;  %v238_v53 = vld [vmem:[%s4744_s21 + $0x48] sm:$0xff] }
  0x20   : > { %4259 = vmatpush.xpose.msk.msrb.mxu2 %vm485_vm0, %v369_v26  ;;  %4263 = vmatpush.xpose.msk.msrb.mxu3 %vm485_vm0, %v371_v27  ;;  %v388_v51 = vld [vmem:[%s4738_s18 + $0xf8] sm:$0xff]  ;;  %v242_v54 = vld [vmem:[%s4744_s21 + $0x68] sm:$0xff]  ;;  %v381_v56 = vld [vmem:[%s4738_s18 + $0xc0] sm:$0xff]  ;;  %v302_v59 = vmul.f32 0.35355338, %v238_v53 }
  0x21   : > { %4241 = vmatmul.msk.f32.gmra.mxu1 %vm485_vm0, %v296_v29  ;;  %4237 = vmatmul.msk.f32.gmra.mxu0 %vm485_vm0, %v294_v30  ;;  %v240_v52 = vld [vmem:[%s4744_s21 + $0x58] sm:$0xff]  ;;  %v385_v57 = vld [vmem:[%s4738_s18 + $0xe0] sm:$0xff]  ;;  %v383_v60 = vld [vmem:[%s4738_s18 + $0xd0] sm:$0xff]  ;;  %v306_v62 = vmul.f32 0.35355338, %v242_v54 }
  0x22   : > { %4266 = vmatpush.xpose.msk.msra.mxu0 %vm485_vm0, %v374_v28  ;;  %4270 = vmatpush.xpose.msk.msra.mxu1 %vm485_vm0, %v376_v31  ;;  %v244_v55 = vld [vmem:[%s4744_s21 + $0x78] sm:$0xff]  ;;  %v304_v58 = vmul.f32 0.35355338, %v240_v52  ;;  %v387_v61 = vld [vmem:[%s4738_s18 + $0xf0] sm:$0xff]  ;;  %v245_v0 = vld [vmem:[%s4744_s21 + $0x80] sm:$0xff] }
  0x23   : > { %4245 = vmatmul.msk.f32.gmra.mxu2 %vm485_vm0, %v298_v33  ;;  %4249 = vmatmul.msk.f32.gmra.mxu3 %vm485_vm0, %v300_v34  ;;  %v308_v63 = vmul.f32 0.35355338, %v244_v55  ;;  %v247_v1 = vld [vmem:[%s4744_s21 + $0x90] sm:$0xff]  ;;  %v249_v2 = vld [vmem:[%s4744_s21 + $0xa0] sm:$0xff]  ;;  %v309_v4 = vmul.f32 0.35355338, %v245_v0 }
  0x24   : > { %4274 = vmatpush.xpose.msk.msra.mxu2 %vm485_vm0, %v378_v32  ;;  %4278 = vmatpush.xpose.msk.msra.mxu3 %vm485_vm0, %v380_v35  ;;  %v251_v3 = vld [vmem:[%s4744_s21 + $0xb0] sm:$0xff]  ;;  %v311_v5 = vmul.f32 0.35355338, %v247_v1  ;;  %v313_v6 = vmul.f32 0.35355338, %v249_v2  ;;  %v390_v8 = vld [vmem:[%s4738_s18 + $0x108] sm:$0xff] }
  0x25   : > { %v315_v7 = vmul.f32 0.35355338, %v251_v3  ;;  %v394_v9 = vld [vmem:[%s4738_s18 + $0x128] sm:$0xff]  ;;  %v392_v10 = vld [vmem:[%s4738_s18 + $0x118] sm:$0xff]  ;;  %v389_v16 = vld [vmem:[%s4738_s18 + $0x100] sm:$0xff] }
  0x26   : > { %4267 = vmatpush.xpose.msk.msra.mxu0 %vm485_vm0, %v373_v36  ;;  %4271 = vmatpush.xpose.msk.msra.mxu1 %vm485_vm0, %v375_v37  ;;  %v396_v11 = vld [vmem:[%s4738_s18 + $0x138] sm:$0xff]  ;;  %v246_v12 = vld [vmem:[%s4744_s21 + $0x88] sm:$0xff]  ;;  %v393_v17 = vld [vmem:[%s4738_s18 + $0x120] sm:$0xff] }
  0x27   : > { %v248_v13 = vld [vmem:[%s4744_s21 + $0x98] sm:$0xff]  ;;  %v250_v14 = vld [vmem:[%s4744_s21 + $0xa8] sm:$0xff]  ;;  %v310_v18 = vmul.f32 0.35355338, %v246_v12  ;;  %v391_v20 = vld [vmem:[%s4738_s18 + $0x110] sm:$0xff] }
  0x28   : > { %4275 = vmatpush.xpose.msk.msra.mxu2 %vm485_vm0, %v377_v38  ;;  %4279 = vmatpush.xpose.msk.msra.mxu3 %vm485_vm0, %v379_v39  ;;  %v252_v15 = vld [vmem:[%s4744_s21 + $0xb8] sm:$0xff]  ;;  %v312_v19 = vmul.f32 0.35355338, %v248_v13  ;;  %v395_v21 = vld [vmem:[%s4738_s18 + $0x130] sm:$0xff]  ;;  %v314_v22 = vmul.f32 0.35355338, %v250_v14 }
  0x29   : > { %4252 = vmatmul.msk.f32.vlgmr.msrb.gmra.mxu0 %vm485_vm0, %v301_v44  ;;  %4256 = vmatmul.msk.f32.vlgmr.msrb.gmra.mxu1 %vm485_vm0, %v303_v45  ;;  %v316_v23 = vmul.f32 0.35355338, %v252_v15  ;;  %v253_v24 = vld [vmem:[%s4744_s21 + $0xc0] sm:$0xff]  ;;  %v255_v25 = vld [vmem:[%s4744_s21 + $0xd0] sm:$0xff]  ;;  %v398_v32 = vld [vmem:[%s4738_s18 + $0x148] sm:$0xff] }
  0x2a   : > { %4282 = vmatpush.xpose.msk.msrb.mxu0 %vm485_vm0, %v382_v48  ;;  %4286 = vmatpush.xpose.msk.msrb.mxu1 %vm485_vm0, %v384_v50  ;;  %v257_v26 = vld [vmem:[%s4744_s21 + $0xe0] sm:$0xff]  ;;  %v259_v27 = vld [vmem:[%s4744_s21 + $0xf0] sm:$0xff]  ;;  %v317_v28 = vmul.f32 0.35355338, %v253_v24  ;;  %v319_v29 = vmul.f32 0.35355338, %v255_v25 }
  0x2b   : > { %4260 = vmatmul.msk.f32.vlgmr.msrb.gmra.mxu2 %vm485_vm0, %v305_v46  ;;  %4264 = vmatmul.msk.f32.vlgmr.msrb.gmra.mxu3 %vm485_vm0, %v307_v47  ;;  %v321_v30 = vmul.f32 0.35355338, %v257_v26  ;;  %v323_v31 = vmul.f32 0.35355338, %v259_v27  ;;  %v402_v33 = vld [vmem:[%s4738_s18 + $0x168] sm:$0xff]  ;;  %v400_v34 = vld [vmem:[%s4738_s18 + $0x158] sm:$0xff] }
  0x2c   : > { %4290 = vmatpush.xpose.msk.msrb.mxu2 %vm485_vm0, %v386_v49  ;;  %4294 = vmatpush.xpose.msk.msrb.mxu3 %vm485_vm0, %v388_v51  ;;  %v404_v35 = vld [vmem:[%s4738_s18 + $0x178] sm:$0xff]  ;;  %v254_v36 = vld [vmem:[%s4744_s21 + $0xc8] sm:$0xff]  ;;  %v397_v40 = vld [vmem:[%s4738_s18 + $0x140] sm:$0xff] }
  0x2d   : > { %v256_v37 = vld [vmem:[%s4744_s21 + $0xd8] sm:$0xff]  ;;  %v258_v38 = vld [vmem:[%s4744_s21 + $0xe8] sm:$0xff]  ;;  %v401_v41 = vld [vmem:[%s4738_s18 + $0x160] sm:$0xff]  ;;  %v318_v42 = vmul.f32 0.35355338, %v254_v36 }
  0x2e   : > { %4283 = vmatpush.xpose.msk.msrb.mxu0 %vm485_vm0, %v381_v56  ;;  %4287 = vmatpush.xpose.msk.msrb.mxu1 %vm485_vm0, %v383_v60  ;;  %v260_v39 = vld [vmem:[%s4744_s21 + $0xf8] sm:$0xff]  ;;  %v320_v43 = vmul.f32 0.35355338, %v256_v37  ;;  %v399_v44 = vld [vmem:[%s4738_s18 + $0x150] sm:$0xff]  ;;  %v322_v46 = vmul.f32 0.35355338, %v258_v38 }
  0x2f   : > { %v403_v45 = vld [vmem:[%s4738_s18 + $0x170] sm:$0xff]  ;;  %v324_v47 = vmul.f32 0.35355338, %v260_v39  ;;  %v261_v48 = vld [vmem:[%s4744_s21 + $0x100] sm:$0xff]  ;;  %v406_v56 = vld [vmem:[%s4738_s18 + $0x188] sm:$0xff] }
  0x30   : > { %4291 = vmatpush.xpose.msk.msrb.mxu2 %vm485_vm0, %v385_v57  ;;  %4295 = vmatpush.xpose.msk.msrb.mxu3 %vm485_vm0, %v387_v61  ;;  %v263_v49 = vld [vmem:[%s4744_s21 + $0x110] sm:$0xff]  ;;  %v265_v50 = vld [vmem:[%s4744_s21 + $0x120] sm:$0xff]  ;;  %v325_v52 = vmul.f32 0.35355338, %v261_v48  ;;  %v408_v57 = vld [vmem:[%s4738_s18 + $0x198] sm:$0xff] }
  0x31   : > { %4257 = vmatmul.msk.f32.gmra.mxu1 %vm485_vm0, %v304_v58  ;;  %4253 = vmatmul.msk.f32.gmra.mxu0 %vm485_vm0, %v302_v59  ;;  %v267_v51 = vld [vmem:[%s4744_s21 + $0x130] sm:$0xff]  ;;  %v327_v53 = vmul.f32 0.35355338, %v263_v49  ;;  %v329_v54 = vmul.f32 0.35355338, %v265_v50  ;;  %v410_v58 = vld [vmem:[%s4738_s18 + $0x1a8] sm:$0xff] }
  0x32   : > { %v331_v55 = vmul.f32 0.35355338, %v267_v51  ;;  %v412_v59 = vld [vmem:[%s4738_s18 + $0x1b8] sm:$0xff]  ;;  %v262_v60 = vld [vmem:[%s4744_s21 + $0x108] sm:$0xff]  ;;  %v405_v0 = vld [vmem:[%s4738_s18 + $0x180] sm:$0xff] }
  0x33   : > { %4261 = vmatmul.msk.f32.gmra.mxu2 %vm485_vm0, %v306_v62  ;;  %4265 = vmatmul.msk.f32.gmra.mxu3 %vm485_vm0, %v308_v63  ;;  %v264_v61 = vld [vmem:[%s4744_s21 + $0x118] sm:$0xff]  ;;  %v266_v62 = vld [vmem:[%s4744_s21 + $0x128] sm:$0xff]  ;;  %v407_v1 = vld [vmem:[%s4738_s18 + $0x190] sm:$0xff]  ;;  %v326_v2 = vmul.f32 0.35355338, %v262_v60 }
  0x34   : > { %v268_v63 = vld [vmem:[%s4744_s21 + $0x138] sm:$0xff]  ;;  %v328_v3 = vmul.f32 0.35355338, %v264_v61  ;;  %v277_v24 = vld [vmem:[%s4744_s21 + $0x180] sm:$0xff]  ;;  %v279_v25 = vld [vmem:[%s4744_s21 + $0x190] sm:$0xff] }
  0x35   : > { %v341_v26 = vmul.f32 0.35355338, %v277_v24  ;;  %v343_v27 = vmul.f32 0.35355338, %v279_v25  ;;  %v413_v36 = vld [vmem:[%s4738_s18 + $0x1c0] sm:$0xff]  ;;  %v416_v37 = vld [vmem:[%s4738_s18 + $0x1d8] sm:$0xff] }
  0x36   : > { %v282_v38 = vld [vmem:[%s4744_s21 + $0x1a8] sm:$0xff]  ;;  %v289_v48 = vld [vmem:[%s4744_s21 + $0x1e0] sm:$0xff]  ;;  %v419_v51 = vld [vmem:[%s4738_s18 + $0x1f0] sm:$0xff] }
  0x37   : > { %v346_v39 = vmul.f32 0.35355338, %v282_v38  ;;  %v353_v50 = vmul.f32 0.35355338, %v289_v48 }
  0x39   : > { %4268 = vmatmul.msk.f32.vlgmr.msra.gmra.mxu0 %vm485_vm0, %v309_v4  ;;  %4272 = vmatmul.msk.f32.vlgmr.msra.gmra.mxu1 %vm485_vm0, %v311_v5  ;;  %v409_v4 = vld [vmem:[%s4738_s18 + $0x1a0] sm:$0xff]  ;;  %v411_v5 = vld [vmem:[%s4738_s18 + $0x1b0] sm:$0xff] }
  0x3a   : > { %4298 = vmatpush.xpose.msk.msra.mxu0 %vm485_vm0, %v390_v8  ;;  %4302 = vmatpush.xpose.msk.msra.mxu1 %vm485_vm0, %v392_v10  ;;  %v269_v8 = vld [vmem:[%s4744_s21 + $0x140] sm:$0xff] }
  0x3b   : > { %4276 = vmatmul.msk.f32.vlgmr.msra.gmra.mxu2 %vm485_vm0, %v313_v6  ;;  %4280 = vmatmul.msk.f32.vlgmr.msra.gmra.mxu3 %vm485_vm0, %v315_v7  ;;  %v330_v6 = vmul.f32 0.35355338, %v266_v62  ;;  %v332_v7 = vmul.f32 0.35355338, %v268_v63  ;;  %v273_v10 = vld [vmem:[%s4744_s21 + $0x160] sm:$0xff]  ;;  %v286_v62 = vld [vmem:[%s4744_s21 + $0x1c8] sm:$0xff] }
  0x3c   : > { %4306 = vmatpush.xpose.msk.msra.mxu2 %vm485_vm0, %v394_v9  ;;  %4310 = vmatpush.xpose.msk.msra.mxu3 %vm485_vm0, %v396_v11  ;;  %v271_v9 = vld [vmem:[%s4744_s21 + $0x150] sm:$0xff]  ;;  %v333_v12 = vmul.f32 0.35355338, %v269_v8  ;;  %v337_v14 = vmul.f32 0.35355338, %v273_v10  ;;  %v292_v63 = vld [vmem:[%s4744_s21 + $0x1f8] sm:$0xff] }
  0x3d   : > { %v275_v11 = vld [vmem:[%s4744_s21 + $0x170] sm:$0xff]  ;;  %v335_v13 = vmul.f32 0.35355338, %v271_v9 }
  0x3e   : > { %4299 = vmatpush.xpose.msk.msra.mxu0 %vm485_vm0, %v389_v16  ;;  %4303 = vmatpush.xpose.msk.msra.mxu1 %vm485_vm0, %v391_v20  ;;  %v339_v15 = vmul.f32 0.35355338, %v275_v11  ;;  %v270_v16 = vld [vmem:[%s4744_s21 + $0x148] sm:$0xff] }
  0x3f   : > { %v334_v20 = vmul.f32 0.35355338, %v270_v16 }
  0x40   : > { %4307 = vmatpush.xpose.msk.msra.mxu2 %vm485_vm0, %v393_v17  ;;  %4311 = vmatpush.xpose.msk.msra.mxu3 %vm485_vm0, %v395_v21  ;;  %v272_v17 = vld [vmem:[%s4744_s21 + $0x158] sm:$0xff] }
  0x41   : > { %4269 = vmatmul.msk.f32.gmra.mxu0 %vm485_vm0, %v310_v18  ;;  %4273 = vmatmul.msk.f32.gmra.mxu1 %vm485_vm0, %v312_v19  ;;  %v274_v18 = vld [vmem:[%s4744_s21 + $0x168] sm:$0xff]  ;;  %v276_v19 = vld [vmem:[%s4744_s21 + $0x178] sm:$0xff]  ;;  %v336_v21 = vmul.f32 0.35355338, %v272_v17 }
  0x43   : > { %4277 = vmatmul.msk.f32.gmra.mxu2 %vm485_vm0, %v314_v22  ;;  %4281 = vmatmul.msk.f32.gmra.mxu3 %vm485_vm0, %v316_v23  ;;  %v338_v22 = vmul.f32 0.35355338, %v274_v18  ;;  %v340_v23 = vmul.f32 0.35355338, %v276_v19 }
  0x49   : > { %4284 = vmatmul.msk.f32.vlgmr.msrb.gmra.mxu0 %vm485_vm0, %v317_v28  ;;  %4288 = vmatmul.msk.f32.vlgmr.msrb.gmra.mxu1 %vm485_vm0, %v319_v29  ;;  %v414_v28 = vld [vmem:[%s4738_s18 + $0x1c8] sm:$0xff]  ;;  %v281_v29 = vld [vmem:[%s4744_s21 + $0x1a0] sm:$0xff] }
  0x4a   : > { %4314 = vmatpush.xpose.msk.msrb.mxu0 %vm485_vm0, %v398_v32  ;;  %4318 = vmatpush.xpose.msk.msrb.mxu1 %vm485_vm0, %v400_v34  ;;  %v278_v34 = vld [vmem:[%s4744_s21 + $0x188] sm:$0xff] }
  0x4b   : > { %4292 = vmatmul.msk.f32.vlgmr.msrb.gmra.mxu2 %vm485_vm0, %v321_v30  ;;  %4296 = vmatmul.msk.f32.vlgmr.msrb.gmra.mxu3 %vm485_vm0, %v323_v31  ;;  %v283_v30 = vld [vmem:[%s4744_s21 + $0x1b0] sm:$0xff]  ;;  %v345_v31 = vmul.f32 0.35355338, %v281_v29 }
  0x4c   : > { %4322 = vmatpush.xpose.msk.msrb.mxu2 %vm485_vm0, %v402_v33  ;;  %4326 = vmatpush.xpose.msk.msrb.mxu3 %vm485_vm0, %v404_v35  ;;  %v347_v32 = vmul.f32 0.35355338, %v283_v30  ;;  %v418_v33 = vld [vmem:[%s4738_s18 + $0x1e8] sm:$0xff]  ;;  %v342_v35 = vmul.f32 0.35355338, %v278_v34 }
  0x4e   : > { %4315 = vmatpush.xpose.msk.msrb.mxu0 %vm485_vm0, %v397_v40  ;;  %4319 = vmatpush.xpose.msk.msrb.mxu1 %vm485_vm0, %v399_v44  ;;  %v417_v40 = vld [vmem:[%s4738_s18 + $0x1e0] sm:$0xff] }
  0x50   : > { %4323 = vmatpush.xpose.msk.msrb.mxu2 %vm485_vm0, %v401_v41  ;;  %4327 = vmatpush.xpose.msk.msrb.mxu3 %vm485_vm0, %v403_v45  ;;  %v420_v41 = vld [vmem:[%s4738_s18 + $0x1f8] sm:$0xff] }
  0x51   : > { %4285 = vmatmul.msk.f32.gmra.mxu0 %vm485_vm0, %v318_v42  ;;  %4289 = vmatmul.msk.f32.gmra.mxu1 %vm485_vm0, %v320_v43  ;;  %v280_v42 = vld [vmem:[%s4744_s21 + $0x198] sm:$0xff]  ;;  %v285_v43 = vld [vmem:[%s4744_s21 + $0x1c0] sm:$0xff] }
  0x52   : > { %v344_v44 = vmul.f32 0.35355338, %v280_v42  ;;  %v349_v45 = vmul.f32 0.35355338, %v285_v43 }
  0x53   : > { %4293 = vmatmul.msk.f32.gmra.mxu2 %vm485_vm0, %v322_v46  ;;  %4297 = vmatmul.msk.f32.gmra.mxu3 %vm485_vm0, %v324_v47  ;;  %v415_v46 = vld [vmem:[%s4738_s18 + $0x1d0] sm:$0xff]  ;;  %v284_v47 = vld [vmem:[%s4744_s21 + $0x1b8] sm:$0xff] }
  0x54   : > { %v348_v49 = vmul.f32 0.35355338, %v284_v47 }
  0x59   : > { %4300 = vmatmul.msk.f32.vlgmr.msra.gmra.mxu0 %vm485_vm0, %v325_v52  ;;  %4304 = vmatmul.msk.f32.vlgmr.msra.gmra.mxu1 %vm485_vm0, %v327_v53  ;;  %v287_v52 = vld [vmem:[%s4744_s21 + $0x1d0] sm:$0xff] }
  0x5a   : > { %4330 = vmatpush.xpose.msk.msra.mxu0 %vm485_vm0, %v406_v56  ;;  %4334 = vmatpush.xpose.msk.msra.mxu1 %vm485_vm0, %v408_v57  ;;  %v351_v53 = vmul.f32 0.35355338, %v287_v52  ;;  %v288_v56 = vld [vmem:[%s4744_s21 + $0x1d8] sm:$0xff] }
  0x5b   : > { %4308 = vmatmul.msk.f32.vlgmr.msra.gmra.mxu2 %vm485_vm0, %v329_v54  ;;  %4312 = vmatmul.msk.f32.vlgmr.msra.gmra.mxu3 %vm485_vm0, %v331_v55  ;;  %v291_v54 = vld [vmem:[%s4744_s21 + $0x1f0] sm:$0xff] }
  0x5c   : > { %4338 = vmatpush.xpose.msk.msra.mxu2 %vm485_vm0, %v410_v58  ;;  %4342 = vmatpush.xpose.msk.msra.mxu3 %vm485_vm0, %v412_v59  ;;  %v355_v55 = vmul.f32 0.35355338, %v291_v54  ;;  %v352_v59 = vmul.f32 0.35355338, %v288_v56 }
  0x5e   : > { %4331 = vmatpush.xpose.msk.msra.mxu0 %vm485_vm0, %v405_v0  ;;  %4335 = vmatpush.xpose.msk.msra.mxu1 %vm485_vm0, %v407_v1  ;;  %v350_v0 = vmul.f32 0.35355338, %v286_v62  ;;  %v356_v1 = vmul.f32 0.35355338, %v292_v63 }
  0x60   : > { %4339 = vmatpush.xpose.msk.msra.mxu2 %vm485_vm0, %v409_v4  ;;  %4343 = vmatpush.xpose.msk.msra.mxu3 %vm485_vm0, %v411_v5 }
  0x61   : > { %4301 = vmatmul.msk.f32.gmra.mxu0 %vm485_vm0, %v326_v2  ;;  %4305 = vmatmul.msk.f32.gmra.mxu1 %vm485_vm0, %v328_v3  ;;  %v290_v2 = vld [vmem:[%s4744_s21 + $0x1e8] sm:$0xff] }
  0x62   : > { %v354_v3 = vmul.f32 0.35355338, %v290_v2 }
  0x63   : > { %4309 = vmatmul.msk.f32.gmra.mxu2 %vm485_vm0, %v330_v6  ;;  %4313 = vmatmul.msk.f32.gmra.mxu3 %vm485_vm0, %v332_v7 }
  0x69   : > { %4316 = vmatmul.msk.f32.vlgmr.msrb.gmra.mxu0 %vm485_vm0, %v333_v12  ;;  %4320 = vmatmul.msk.f32.vlgmr.msrb.gmra.mxu1 %vm485_vm0, %v335_v13 }
  0x6a   : > { %4346 = vmatpush.xpose.msk.msrb.mxu0 %vm485_vm0, %v414_v28  ;;  %4350 = vmatpush.xpose.msk.msrb.mxu1 %vm485_vm0, %v416_v37 }
  0x6b   : > { %4324 = vmatmul.msk.f32.vlgmr.msrb.gmra.mxu2 %vm485_vm0, %v337_v14  ;;  %4328 = vmatmul.msk.f32.vlgmr.msrb.gmra.mxu3 %vm485_vm0, %v339_v15 }
  0x6c   : > { %4354 = vmatpush.xpose.msk.msrb.mxu2 %vm485_vm0, %v418_v33  ;;  %4358 = vmatpush.xpose.msk.msrb.mxu3 %vm485_vm0, %v420_v41 }
  0x6e   : > { %4347 = vmatpush.xpose.msk.msrb.mxu0 %vm485_vm0, %v413_v36  ;;  %4351 = vmatpush.xpose.msk.msrb.mxu1 %vm485_vm0, %v415_v46 }
  0x70   : > { %4355 = vmatpush.xpose.msk.msrb.mxu2 %vm485_vm0, %v417_v40  ;;  %4359 = vmatpush.xpose.msk.msrb.mxu3 %vm485_vm0, %v419_v51 }
  0x71   : > { %4317 = vmatmul.msk.f32.gmra.mxu0 %vm485_vm0, %v334_v20  ;;  %4321 = vmatmul.msk.f32.gmra.mxu1 %vm485_vm0, %v336_v21 }
  0x73   : > { %4325 = vmatmul.msk.f32.gmra.mxu2 %vm485_vm0, %v338_v22  ;;  %4329 = vmatmul.msk.f32.gmra.mxu3 %vm485_vm0, %v340_v23 }
  0x79   : > { %4332 = vmatmul.msk.f32.vlgmr.msra.gmra.mxu0 %vm485_vm0, %v341_v26  ;;  %4336 = vmatmul.msk.f32.vlgmr.msra.gmra.mxu1 %vm485_vm0, %v343_v27 }
  0x7b   : > { %4340 = vmatmul.msk.f32.vlgmr.msra.gmra.mxu2 %vm485_vm0, %v345_v31  ;;  %4344 = vmatmul.msk.f32.vlgmr.msra.gmra.mxu3 %vm485_vm0, %v347_v32 }
  0x81   : > { %4333 = vmatmul.msk.f32.gmra.mxu0 %vm485_vm0, %v342_v35  ;;  %4337 = vmatmul.msk.f32.gmra.mxu1 %vm485_vm0, %v344_v44 }
  0x83   : > { %4341 = vmatmul.msk.f32.gmra.mxu2 %vm485_vm0, %v346_v39  ;;  %4345 = vmatmul.msk.f32.gmra.mxu3 %vm485_vm0, %v348_v49 }
  0x89   : > { %4348 = vmatmul.msk.f32.vlgmr.msrb.gmra.mxu0 %vm485_vm0, %v349_v45  ;;  %4352 = vmatmul.msk.f32.vlgmr.msrb.gmra.mxu1 %vm485_vm0, %v351_v53 }
  0x8b   : > { %4356 = vmatmul.msk.f32.vlgmr.msrb.gmra.mxu2 %vm485_vm0, %v353_v50  ;;  %4360 = vmatmul.msk.f32.vlgmr.msrb.gmra.mxu3 %vm485_vm0, %v355_v55 }
  0x91   : > { %4353 = vmatmul.msk.f32.gmra.mxu1 %vm485_vm0, %v352_v59  ;;  %4349 = vmatmul.msk.f32.gmra.mxu0 %vm485_vm0, %v350_v0 }
  0x93   : > { %4361 = vmatmul.msk.f32.gmra.mxu3 %vm485_vm0, %v356_v1  ;;  %4357 = vmatmul.msk.f32.gmra.mxu2 %vm485_vm0, %v354_v3 }
  0x96   : > { %v4995_v57 = vpop.f32.mrf.mxu0  ;;  %v4997_v58 = vpop.f32.mrf.mxu1 }
  0x97   : > { %v1613_v60 = vsel %vm7733_vm1, %v4997_v58, -inf  ;;  %v1607_v61 = vsel %vm7733_vm1, %v4995_v57, -inf }
  0x98   : > { %1614 = vmax.xlane.f32.xlu1 %v1613_v60  ;;  %1608 = vmax.xlane.f32.xlu0 %v1607_v61 }
  0x9e   : > { %v5010_v4 = vpop.f32.mrf.mxu2  ;;  %v5012_v5 = vpop.f32.mrf.mxu3 }
  0x9f   : > { %v1619_v6 = vsel %vm7733_vm1, %v5010_v4, -inf  ;;  %v5016_v7 = vpop.f32.mrf.mxu1  ;;  %v1625_v8 = vsel %vm7733_vm1, %v5012_v5, -inf  ;;  %v5020_v9 = vpop.f32.mrf.mxu0 }
  0xa0   : > { %1620 = vmax.xlane.f32.xlu2 %v1619_v6  ;;  %v1616_v10 = vsel %vm7733_vm1, %v5016_v7, -inf  ;;  %1626 = vmax.xlane.f32.xlu0 %v1625_v8  ;;  %v1610_v15 = vsel %vm7733_vm1, %v5020_v9, -inf }
  0xa1   : > { %1617 = vmax.xlane.f32.xlu1 %v1616_v10 }
  0xa6   : > { %v5024_v11 = vpop.f32.mrf.mxu2  ;;  %v5026_v12 = vpop.f32.mrf.mxu3 }
  0xa7   : > { %v1622_v13 = vsel %vm7733_vm1, %v5024_v11, -inf  ;;  %v1628_v14 = vsel %vm7733_vm1, %v5026_v12, -inf  ;;  %v5034_v16 = vpop.f32.mrf.mxu1  ;;  %v5036_v17 = vpop.f32.mrf.mxu0 }
  0xa8   : > { %1623 = vmax.xlane.f32.xlu2 %v1622_v13  ;;  %1611 = vmax.xlane.f32.xlu0 %v1610_v15  ;;  %v1631_v18 = vsel %vm7733_vm1, %v5036_v17, -inf  ;;  %v1637_v22 = vsel %vm7733_vm1, %v5034_v16, -inf }
  0xa9   : > { %1629 = vmax.xlane.f32.xlu1 %v1628_v14 }
  0xae   : > { %v5040_v19 = vpop.f32.mrf.mxu2  ;;  %v5042_v20 = vpop.f32.mrf.mxu3 }
  0xaf   : > { %v1643_v21 = vsel %vm7733_vm1, %v5040_v19, -inf  ;;  %v5048_v23 = vpop.f32.mrf.mxu0  ;;  %v5050_v24 = vpop.f32.mrf.mxu1  ;;  %v1649_v26 = vsel %vm7733_vm1, %v5042_v20, -inf }
  0xb0   : > { %1632 = vmax.xlane.f32.xlu2 %v1631_v18  ;;  %1644 = vmax.xlane.f32.xlu0 %v1643_v21  ;;  %v1640_v25 = vsel %vm7733_vm1, %v5050_v24, -inf  ;;  %v1634_v27 = vsel %vm7733_vm1, %v5048_v23, -inf }
  0xb1   : > { %1638 = vmax.xlane.f32.xlu1 %v1637_v22 }
  0xb6   : > { %v5058_v28 = vpop.f32.mrf.mxu2  ;;  %v5060_v29 = vpop.f32.mrf.mxu3 }
  0xb7   : > { %v5062_v30 = vpop.f32.mrf.mxu0  ;;  %v1646_v31 = vsel %vm7733_vm1, %v5058_v28, -inf  ;;  %v1652_v32 = vsel %vm7733_vm1, %v5060_v29, -inf  ;;  %v5074_v36 = vpop.f32.mrf.mxu1 }
  0xb8   : > { %1641 = vmax.xlane.f32.xlu2 %v1640_v25  ;;  %1635 = vmax.xlane.f32.xlu0 %v1634_v27  ;;  %v1655_v33 = vsel %vm7733_vm1, %v5062_v30, -inf  ;;  %v1661_v38 = vsel %vm7733_vm1, %v5074_v36, -inf }
  0xb9   : > { %1650 = vmax.xlane.f32.xlu1 %v1649_v26 }
  0xbe   : > { %v5070_v34 = vpop.f32.mrf.mxu2  ;;  %v5072_v35 = vpop.f32.mrf.mxu3 }
  0xbf   : > { %v5076_v37 = vpop.f32.mrf.mxu0  ;;  %v1667_v39 = vsel %vm7733_vm1, %v5070_v34, -inf  ;;  %v1673_v40 = vsel %vm7733_vm1, %v5072_v35, -inf  ;;  %v5086_v42 = vpop.f32.mrf.mxu1 }
  0xc0   : > { %1647 = vmax.xlane.f32.xlu2 %v1646_v31  ;;  %1653 = vmax.xlane.f32.xlu0 %v1652_v32  ;;  %v1658_v44 = vsel %vm7733_vm1, %v5076_v37, -inf  ;;  %v1664_v50 = vsel %vm7733_vm1, %v5086_v42, -inf }
  0xc1   : > { %1656 = vmax.xlane.f32.xlu1 %v1655_v33 }
  0xc6   : > { %v5084_v41 = vpop.f32.mrf.mxu2  ;;  %v5088_v43 = vpop.f32.mrf.mxu3 }
  0xc7   : > { %v1670_v45 = vsel %vm7733_vm1, %v5084_v41, -inf  ;;  %v1676_v46 = vsel %vm7733_vm1, %v5088_v43, -inf  ;;  %v5096_v47 = vpop.f32.mrf.mxu0  ;;  %v5100_v49 = vpop.f32.mrf.mxu1 }
  0xc8   : > { %1662 = vmax.xlane.f32.xlu2 %v1661_v38  ;;  %1668 = vmax.xlane.f32.xlu0 %v1667_v39  ;;  %v1679_v52 = vsel %vm7733_vm1, %v5096_v47, -inf  ;;  %v1685_v55 = vsel %vm7733_vm1, %v5100_v49, -inf }
  0xc9   : > { %1674 = vmax.xlane.f32.xlu1 %v1673_v40 }
  0xce   : > { %v5098_v48 = vpop.f32.mrf.mxu2  ;;  %v5110_v54 = vpop.f32.mrf.mxu3 }
  0xcf   : > { %v1691_v51 = vsel %vm7733_vm1, %v5098_v48, -inf  ;;  %v5108_v53 = vpop.f32.mrf.mxu0  ;;  %v1697_v56 = vsel %vm7733_vm1, %v5110_v54, -inf  ;;  %v5116_v59 = vpop.f32.mrf.mxu1 }
  0xd0   : > { %1659 = vmax.xlane.f32.xlu2 %v1658_v44  ;;  %1671 = vmax.xlane.f32.xlu0 %v1670_v45  ;;  %v1682_v60 = vsel %vm7733_vm1, %v5108_v53, -inf  ;;  %v1688_v1 = vsel %vm7733_vm1, %v5116_v59, -inf }
  0xd1   : > { %1677 = vmax.xlane.f32.xlu1 %v1676_v46 }
  0xd6   : > { %v5120_v61 = vpop.f32.mrf.mxu2  ;;  %v5126_v0 = vpop.f32.mrf.mxu3 }
  0xd7   : > { %v5122_v62 = vpop.f32.mrf.mxu0  ;;  %v1694_v2 = vsel %vm7733_vm1, %v5120_v61, -inf  ;;  %v5132_v3 = vpop.f32.mrf.mxu1  ;;  %v1700_v13 = vsel %vm7733_vm1, %v5126_v0, -inf }
  0xd8   : > { %1665 = vmax.xlane.f32.xlu2 %v1664_v50  ;;  %1692 = vmax.xlane.f32.xlu0 %v1691_v51  ;;  %v1703_v63 = vsel %vm7733_vm1, %v5122_v62, -inf  ;;  %v1709_v14 = vsel %vm7733_vm1, %v5132_v3, -inf }
  0xd9   : > { %1680 = vmax.xlane.f32.xlu1 %v1679_v52 }
  0xde   : > { %v5134_v6 = vpop.f32.mrf.mxu2  ;;  %v5144_v15 = vpop.f32.mrf.mxu3 }
  0xdf   : > { %v1715_v8 = vsel %vm7733_vm1, %v5134_v6, -inf  ;;  %v5138_v10 = vpop.f32.mrf.mxu0  ;;  %v5146_v18 = vpop.f32.mrf.mxu1  ;;  %v1721_v25 = vsel %vm7733_vm1, %v5144_v15, -inf }
  0xe0   : > { %1686 = vmax.xlane.f32.xlu2 %v1685_v55  ;;  %1683 = vmax.xlane.f32.xlu0 %v1682_v60  ;;  %7734 = vst [vmem:[#allocation2_spill] sm:$0xff] %v5146_v18  ;;  %v1712_v21 = vsel %vm7733_vm1, %v5146_v18, -inf  ;;  %v1706_v26 = vsel %vm7733_vm1, %v5138_v10, -inf }
  0xe1   : > { %1698 = vmax.xlane.f32.xlu1 %v1697_v56 }
  0xe6   : > { %v5150_v22 = vpop.f32.mrf.mxu2  ;;  %v5158_v31 = vpop.f32.mrf.mxu3 }
  0xe7   : > { %7735 = vst [vmem:[#allocation3_spill] sm:$0xff] %v5150_v22  ;;  %v5156_v27 = vpop.f32.mrf.mxu0  ;;  %v1724_v32 = vsel %vm7733_vm1, %v5158_v31, -inf  ;;  %v5162_v33 = vpop.f32.mrf.mxu1  ;;  %v1718_v38 = vsel %vm7733_vm1, %v5150_v22, -inf }
  0xe8   : > { %1704 = vmax.xlane.f32.xlu2 %v1703_v63  ;;  %1695 = vmax.xlane.f32.xlu0 %v1694_v2  ;;  %7736 = vst [vmem:[#allocation4_spill] sm:$0xff] %v5156_v27  ;;  %v1727_v39 = vsel %vm7733_vm1, %v5156_v27, -inf  ;;  %v1733_v50 = vsel %vm7733_vm1, %v5162_v33, -inf }
  0xe9   : > { %1689 = vmax.xlane.f32.xlu1 %v1688_v1  ;;  %7737 = vst [vmem:[#allocation5_spill] sm:$0xff] %v5158_v31 }
  0xea   : > { %7738 = vst [vmem:[#allocation6_spill] sm:$0xff] %v5162_v33 }
  0xee   : > { %v5168_v40 = vpop.f32.mrf.mxu2  ;;  %v5174_v46 = vpop.f32.mrf.mxu3 }
  0xef   : > { %7739 = vst [vmem:[#allocation7_spill] sm:$0xff] %v5168_v40  ;;  %v5170_v44 = vpop.f32.mrf.mxu0  ;;  %v1739_v51 = vsel %vm7733_vm1, %v5168_v40, -inf  ;;  %v5180_v52 = vpop.f32.mrf.mxu1  ;;  %v1745_v2 = vsel %vm7733_vm1, %v5174_v46, -inf }
  0xf0   : > { %1716 = vmax.xlane.f32.xlu2 %v1715_v8  ;;  %1710 = vmax.xlane.f32.xlu0 %v1709_v14  ;;  %7740 = vst [vmem:[#allocation8_spill] sm:$0xff] %v5170_v44  ;;  %v1730_v45 = vsel %vm7733_vm1, %v5170_v44, -inf  ;;  %v1736_v8 = vsel %vm7733_vm1, %v5180_v52, -inf }
  0xf1   : > { %1701 = vmax.xlane.f32.xlu1 %v1700_v13  ;;  %7741 = vst [vmem:[#allocation9_spill] sm:$0xff] %v5174_v46 }
  0xf2   : > { %7742 = vst [vmem:[#allocation10_spill] sm:$0xff] %v5180_v52 }
  0xf6   : > { %v5182_v55 = vpop.f32.mrf.mxu2  ;;  %v5194_v13 = vpop.f32.mrf.mxu3 }
  0xf7   : > { %7743 = vst [vmem:[#allocation11_spill] sm:$0xff] %v5182_v55  ;;  %v1742_v63 = vsel %vm7733_vm1, %v5182_v55, -inf  ;;  %v5188_v1 = vpop.f32.mrf.mxu0  ;;  %v5196_v14 = vpop.f32.mrf.mxu1 }
  0xf8   : > { %1713 = vmax.xlane.f32.xlu2 %v1712_v21  ;;  %1722 = vmax.xlane.f32.xlu0 %v1721_v25  ;;  %7744 = vst [vmem:[#allocation12_spill] sm:$0xff] %v5188_v1 }
  0xf9   : > { %1707 = vmax.xlane.f32.xlu1 %v1706_v26  ;;  %7745 = vst [vmem:[#allocation13_spill] sm:$0xff] %v5194_v13 }
  0xfa   : > { %7746 = vst [vmem:[#allocation14_spill] sm:$0xff] %v5196_v14 }
 0x100   : > { %1725 = vmax.xlane.f32.xlu2 %v1724_v32  ;;  %1728 = vmax.xlane.f32.xlu0 %v1727_v39  ;;  %v1757_v32 = vsel %vm7733_vm1, %v5196_v14, -inf  ;;  %v1748_v39 = vsel %vm7733_vm1, %v5194_v13, -inf  ;;  %v5220_v14 = vpop.f32.mrf.mxu1 }
 0x101   : > { %1719 = vmax.xlane.f32.xlu1 %v1718_v38  ;;  %v5204_v38 = vpop.f32.mrf.mxu2  ;;  %7750 = vst [vmem:[#allocation18_spill] sm:$0xff] %v5220_v14 }
 0x102   : > { %7747 = vst [vmem:[#allocation15_spill] sm:$0xff] %v5204_v38 }
 0x108   : > { %1731 = vmax.xlane.f32.xlu2 %v1730_v45  ;;  %1740 = vmax.xlane.f32.xlu0 %v1739_v51  ;;  %v1751_v45 = vsel %vm7733_vm1, %v5188_v1, -inf  ;;  %v5212_v51 = vpop.f32.mrf.mxu3  ;;  %v1763_v1 = vsel %vm7733_vm1, %v5204_v38, -inf }
 0x109   : > { %1734 = vmax.xlane.f32.xlu1 %v1733_v50  ;;  %v5210_v50 = vpop.f32.mrf.mxu0  ;;  %7749 = vst [vmem:[#allocation17_spill] sm:$0xff] %v5212_v51 }
 0x10a   : > { %7748 = vst [vmem:[#allocation16_spill] sm:$0xff] %v5210_v50 }
 0x10b   : > { %v1615_v56 = vpop.xlane.xlu1 %1614  ;;  %v5184_v60 = vpop.xlane.xlu0 %1608 }
 0x110   : > { %1743 = vmax.xlane.f32.xlu2 %v1742_v63  ;;  %1737 = vmax.xlane.f32.xlu0 %v1736_v8  ;;  %v5238_v52 = vpop.f32.mrf.mxu3 }
 0x111   : > { %1746 = vmax.xlane.f32.xlu1 %v1745_v2  ;;  %v5228_v55 = vpop.f32.mrf.mxu0  ;;  %7753 = vst [vmem:[#allocation21_spill] sm:$0xff] %v5238_v52 }
 0x112   : > { %7752 = vst [vmem:[#allocation20_spill] sm:$0xff] %v5228_v55 }
 0x113   : > { %v5198_v21 = vpop.xlane.xlu2 %1620  ;;  %v1627_v26 = vpop.xlane.xlu0 %1626 }
 0x114   : > { %v5200_v25 = vpop.xlane.xlu1 %1617 }
 0x118   : > { %1758 = vmax.xlane.f32.xlu2 %v1757_v32  ;;  %1749 = vmax.xlane.f32.xlu0 %v1748_v39  ;;  %v1769_v32 = vsel %vm7733_vm1, %v5212_v51, -inf  ;;  %v1754_v39 = vsel %vm7733_vm1, %v5210_v50, -inf  ;;  %v1760_v50 = vsel %vm7733_vm1, %v5220_v14, -inf  ;;  %v1801_v14 = vsub.f32 %v4997_v58, %v1615_v56 }
 0x119   : > { %1752 = vmax.xlane.f32.xlu1 %v1751_v45  ;;  %v5226_v45 = vpop.f32.mrf.mxu2  ;;  %v5267_v22 = vpop.f32.mrf.mxu0  ;;  %v1799_v56 = vsub.f32 %v4995_v57, %v5184_v60 }
 0x11a   : > { %7751 = vst [vmem:[#allocation19_spill] sm:$0xff] %v5226_v45  ;;  %v1867_v27 = vmul.f32 1.442695, %v1801_v14 }
 0x11b   : > { %v5214_v63 = vpop.xlane.xlu2 %1623  ;;  %v1612_v8 = vpop.xlane.xlu0 %1611 }
 0x11c   : > { %v5216_v2 = vpop.xlane.xlu1 %1629  ;;  %4440 = vpow2.f32 %v1867_v27  ;;  %v1800_v14 = vsub.f32 %v5020_v9, %v1612_v8  ;;  %v1803_v8 = vsub.f32 %v5010_v4, %v5198_v21 }
 0x11e   : > { %v1865_v60 = vmul.f32 1.442695, %v1800_v14 }
 0x120   : > { %1770 = vmax.xlane.f32.xlu2 %v1769_v32  ;;  %1755 = vmax.xlane.f32.xlu0 %v1754_v39  ;;  %v1775_v32 = vsel %vm7733_vm1, %v5228_v55, -inf  ;;  %v5244_v39 = vpop.f32.mrf.mxu1 }
 0x121   : > { %1764 = vmax.xlane.f32.xlu1 %v1763_v1  ;;  %v1766_v1 = vsel %vm7733_vm1, %v5226_v45, -inf  ;;  %7754 = vst [vmem:[#allocation22_spill] sm:$0xff] %v5244_v39  ;;  %v5246_v38 = vpop.f32.mrf.mxu2  ;;  %v1772_v45 = vsel %vm7733_vm1, %v5238_v52, -inf  ;;  %v1863_v52 = vmul.f32 1.442695, %v1799_v56  ;;  %v1804_v56 = vsub.f32 %v5024_v11, %v5214_v63 }
 0x122   : > { %7755 = vst [vmem:[#allocation23_spill] sm:$0xff] %v5246_v38  ;;  %v5293_v9 = vpop.eup %4440 }
 0x123   : > { %v5230_v44 = vpop.xlane.xlu2 %1632  ;;  %v5234_v51 = vpop.xlane.xlu0 %1644  ;;  %4442 = vpow2.f32 %v1863_v52  ;;  %v1997_v52 = vsel %vm7733_vm1, %v5293_v9, 0.0  ;;  %v1873_v4 = vmul.f32 1.442695, %v1804_v56 }
 0x124   : > { %v5232_v13 = vpop.xlane.xlu1 %1638 }
 0x128   : > { %1776 = vmax.xlane.f32.xlu2 %v1775_v32  ;;  %1767 = vmax.xlane.f32.xlu0 %v1766_v1  ;;  %v1787_v32 = vsel %vm7733_vm1, %v5246_v38, -inf  ;;  %v5261_v1 = vpop.f32.mrf.mxu3  ;;  %v5263_v33 = vpop.f32.mrf.mxu1 }
 0x129   : > { %1761 = vmax.xlane.f32.xlu1 %v1760_v50  ;;  %v1781_v50 = vsel %vm7733_vm1, %v5244_v39, -inf  ;;  %7756 = vst [vmem:[#allocation24_spill] sm:$0xff] %v5263_v33  ;;  %v1793_v39 = vsel %vm7733_vm1, %v5261_v1, -inf  ;;  %v5307_v21 = vpop.eup %4442 }
 0x12a   : > { %v1991_v56 = vsel %vm7733_vm1, %v5307_v21, 0.0 }
 0x12b   : > { %v5248_v40 = vpop.xlane.xlu2 %1641  ;;  %v5252_v55 = vpop.xlane.xlu0 %1635 }
 0x12c   : > { %v5250_v46 = vpop.xlane.xlu1 %1650 }
 0x130   : > { %1788 = vmax.xlane.f32.xlu2 %v1787_v32  ;;  %1782 = vmax.xlane.f32.xlu0 %v1781_v50  ;;  %v1784_v32 = vsel %vm7733_vm1, %v5263_v33, -inf  ;;  %v1778_v50 = vsel %vm7733_vm1, %v5267_v22, -inf  ;;  %v5283_v57 = vpop.f32.mrf.mxu3 }
 0x131   : > { %1773 = vmax.xlane.f32.xlu1 %v1772_v45  ;;  %v1805_v45 = vsub.f32 %v5012_v5, %v1627_v26  ;;  %v5287_v5 = vpop.f32.mrf.mxu2 }
 0x133   : > { %v5265_v31 = vpop.xlane.xlu2 %1647  ;;  %v5269_v38 = vpop.xlane.xlu0 %1653  ;;  %v1875_v18 = vmul.f32 1.442695, %v1805_v45  ;;  %v1807_v45 = vsub.f32 %v5036_v17, %v5230_v44  ;;  %v1802_v44 = vsub.f32 %v5016_v7, %v5200_v25 }
 0x134   : > { %v5271_v58 = vpop.xlane.xlu1 %1656 }
 0x135   : > { %4444 = vpow2.f32 %v1875_v18  ;;  %v1879_v18 = vmul.f32 1.442695, %v1807_v45 }
 0x136   : > { %4446 = vpow2.f32 %v1865_v60 }
 0x138   : > { %1785 = vmax.xlane.f32.xlu2 %v1784_v32  ;;  %1794 = vmax.xlane.f32.xlu0 %v1793_v39  ;;  %v1796_v39 = vsel %vm7733_vm1, %v5283_v57, -inf  ;;  %v1790_v32 = vsel %vm7733_vm1, %v5287_v5, -inf }
 0x139   : > { %1779 = vmax.xlane.f32.xlu1 %v1778_v50  ;;  %v1871_v50 = vmul.f32 1.442695, %v1803_v8  ;;  %v1809_v8 = vsub.f32 %v5034_v16, %v5232_v13 }
 0x13b   : > { %v5285_v33 = vpop.xlane.xlu2 %1662  ;;  %v5289_v26 = vpop.xlane.xlu0 %1668  ;;  %4448 = vpow2.f32 %v1871_v50  ;;  %v1883_v7 = vmul.f32 1.442695, %v1809_v8  ;;  %v1813_v8 = vsub.f32 %v5042_v20, %v5250_v46 }
 0x13c   : > { %v5291_v27 = vpop.xlane.xlu1 %1674  ;;  %v5311_v11 = vpop.eup %4444  ;;  %4450 = vpow2.f32 %v1873_v4 }
 0x13d   : > { %v5317_v17 = vpop.eup %4446  ;;  %4452 = vpow2.f32 %v1879_v18  ;;  %v1806_v18 = vsub.f32 %v5026_v12, %v5216_v2 }
 0x13e   : > { %v1994_v45 = vsel %vm7733_vm1, %v5317_v17, 0.0 }
 0x140   : > { %1797 = vmax.xlane.f32.xlu2 %v1796_v39  ;;  %1998 = vadd.xlane.f32.xlu0 %v1997_v52  ;;  %v1811_v39 = vsub.f32 %v5040_v19, %v5234_v51  ;;  %v1869_v52 = vmul.f32 1.442695, %v1802_v44  ;;  %v1810_v44 = vsub.f32 %v5050_v24, %v5248_v40  ;;  %v1891_v24 = vmul.f32 1.442695, %v1813_v8 }
 0x141   : > { %1791 = vmax.xlane.f32.xlu1 %v1790_v32  ;;  %v2009_v32 = vsel %vm7733_vm1, %v5311_v11, 0.0  ;;  %v5331_v25 = vpop.eup %4448 }
 0x142   : > { %v1887_v16 = vmul.f32 1.442695, %v1811_v39  ;;  %v5335_v19 = vpop.eup %4450  ;;  %4454 = vpow2.f32 %v1869_v52  ;;  %v2003_v39 = vsel %vm7733_vm1, %v5331_v25, 0.0  ;;  %v1885_v12 = vmul.f32 1.442695, %v1810_v44 }
 0x143   : > { %v5309_v14 = vpop.xlane.xlu2 %1659  ;;  %v5313_v63 = vpop.xlane.xlu0 %1671  ;;  %4456 = vpow2.f32 %v1883_v7  ;;  %v1815_v44 = vsub.f32 %v5062_v30, %v5271_v58 }
 0x144   : > { %v5315_v60 = vpop.xlane.xlu1 %1677  ;;  %v5341_v4 = vpop.eup %4452  ;;  %4458 = vpow2.f32 %v1887_v16  ;;  %v1808_v16 = vsub.f32 %v5048_v23, %v5252_v55 }
 0x148   : > { %1992 = vadd.xlane.f32.xlu2 %v1991_v56  ;;  %2010 = vadd.xlane.f32.xlu0 %v2009_v32  ;;  %v2015_v56 = vsel %vm7733_vm1, %v5341_v4, 0.0  ;;  %v2006_v32 = vsel %vm7733_vm1, %v5335_v19, 0.0  ;;  %v5355_v2 = vpop.eup %4454 }
 0x149   : > { %1995 = vadd.xlane.f32.xlu1 %v1994_v45  ;;  %v1877_v45 = vmul.f32 1.442695, %v1806_v18  ;;  %v5359_v20 = vpop.eup %4456  ;;  %v1814_v18 = vsub.f32 %v5060_v29, %v5269_v38  ;;  %v2000_v8 = vsel %vm7733_vm1, %v5355_v2, 0.0  ;;  %v1895_v29 = vmul.f32 1.442695, %v1815_v44 }
 0x14a   : > { %v5365_v7 = vpop.eup %4458 }
 0x14b   : > { %v5333_v13 = vpop.xlane.xlu2 %1665  ;;  %v5337_v51 = vpop.xlane.xlu0 %1692  ;;  %4460 = vpow2.f32 %v1877_v45  ;;  %v1893_v23 = vmul.f32 1.442695, %v1814_v18  ;;  %v1816_v18 = vsub.f32 %v5076_v37, %v5309_v14 }
 0x14c   : > { %v5339_v50 = vpop.xlane.xlu1 %1680  ;;  %4462 = vpow2.f32 %v1885_v12 }
 0x14d   : > { %4464 = vpow2.f32 %v1891_v24  ;;  %v1812_v24 = vsub.f32 %v5058_v28, %v5265_v31 }
 0x150   : > { %2004 = vadd.xlane.f32.xlu2 %v2003_v39  ;;  %2016 = vadd.xlane.f32.xlu0 %v2015_v56  ;;  %v2027_v39 = vsel %vm7733_vm1, %v5365_v7, 0.0  ;;  %v2021_v56 = vsel %vm7733_vm1, %v5359_v20, 0.0 }
 0x151   : > { %2007 = vadd.xlane.f32.xlu1 %v2006_v32  ;;  %v1881_v32 = vmul.f32 1.442695, %v1808_v16  ;;  %v5379_v55 = vpop.eup %4460  ;;  %v1819_v16 = vsub.f32 %v5070_v34, %v5289_v26  ;;  %v1897_v34 = vmul.f32 1.442695, %v1816_v18 }
 0x152   : > { %v5383_v30 = vpop.eup %4462  ;;  %v2012_v44 = vsel %vm7733_vm1, %v5379_v55, 0.0 }
 0x153   : > { %v5357_v40 = vpop.xlane.xlu2 %1686  ;;  %v5363_v52 = vpop.xlane.xlu0 %1683  ;;  %4466 = vpow2.f32 %v1881_v32  ;;  %v1903_v28 = vmul.f32 1.442695, %v1819_v16  ;;  %v1818_v16 = vsub.f32 %v5086_v42, %v5333_v13 }
 0x154   : > { %v5361_v46 = vpop.xlane.xlu1 %1698  ;;  %v5389_v12 = vpop.eup %4464  ;;  %4468 = vpow2.f32 %v1893_v23 }
 0x155   : > { %4470 = vpow2.f32 %v1895_v29  ;;  %v1817_v29 = vsub.f32 %v5074_v36, %v5285_v33 }
 0x158   : > { %2001 = vadd.xlane.f32.xlu2 %v2000_v8  ;;  %2028 = vadd.xlane.f32.xlu0 %v2027_v39  ;;  %v2024_v8 = vsel %vm7733_vm1, %v5383_v30, 0.0  ;;  %v2033_v39 = vsel %vm7733_vm1, %v5389_v12, 0.0 }
 0x159   : > { %2022 = vadd.xlane.f32.xlu1 %v2021_v56  ;;  %v1889_v56 = vmul.f32 1.442695, %v1812_v24  ;;  %v5403_v31 = vpop.eup %4466  ;;  %v1820_v24 = vsub.f32 %v5084_v41, %v5313_v63  ;;  %v1901_v41 = vmul.f32 1.442695, %v1818_v16 }
 0x15a   : > { %v5407_v37 = vpop.eup %4468  ;;  %v2018_v18 = vsel %vm7733_vm1, %v5403_v31, 0.0 }
 0x15b   : > { %v5381_v38 = vpop.xlane.xlu2 %1704  ;;  %v5387_v45 = vpop.xlane.xlu0 %1695  ;;  %4472 = vpow2.f32 %v1889_v56  ;;  %v1905_v36 = vmul.f32 1.442695, %v1820_v24  ;;  %v1825_v24 = vsub.f32 %v5100_v49, %v5357_v40 }
 0x15c   : > { %v5385_v58 = vpop.xlane.xlu1 %1689  ;;  %v5413_v23 = vpop.eup %4470  ;;  %4474 = vpow2.f32 %v1903_v28 }
 0x15d   : > { %4476 = vpow2.f32 %v1897_v34  ;;  %v1821_v34 = vsub.f32 %v5072_v35, %v5291_v27 }
 0x160   : > { %2013 = vadd.xlane.f32.xlu2 %v2012_v44  ;;  %2025 = vadd.xlane.f32.xlu0 %v2024_v8  ;;  %v2036_v44 = vsel %vm7733_vm1, %v5407_v37, 0.0  ;;  %v2039_v8 = vsel %vm7733_vm1, %v5413_v23, 0.0 }
 0x161   : > { %2034 = vadd.xlane.f32.xlu1 %v2033_v39  ;;  %v1899_v39 = vmul.f32 1.442695, %v1817_v29  ;;  %v5427_v33 = vpop.eup %4472  ;;  %v1822_v29 = vsub.f32 %v5088_v43, %v5315_v60  ;;  %v1915_v43 = vmul.f32 1.442695, %v1825_v24 }
 0x162   : > { %v5431_v42 = vpop.eup %4474  ;;  %v2030_v16 = vsel %vm7733_vm1, %v5427_v33, 0.0 }
 0x163   : > { %v5405_v26 = vpop.xlane.xlu2 %1716  ;;  %v5411_v32 = vpop.xlane.xlu0 %1710  ;;  %4478 = vpow2.f32 %v1899_v39  ;;  %v1909_v35 = vmul.f32 1.442695, %v1822_v29  ;;  %v1824_v29 = vsub.f32 %v5108_v53, %v5363_v52 }
 0x164   : > { %v5409_v14 = vpop.xlane.xlu1 %1701  ;;  %v5437_v28 = vpop.eup %4476  ;;  %4480 = vpow2.f32 %v1905_v36 }
 0x165   : > { %4482 = vpow2.f32 %v1901_v41  ;;  %v1823_v41 = vsub.f32 %v5096_v47, %v5339_v50 }
 0x168   : > { %2019 = vadd.xlane.f32.xlu2 %v2018_v18  ;;  %2037 = vadd.xlane.f32.xlu0 %v2036_v44  ;;  %v2042_v18 = vsel %vm7733_vm1, %v5437_v28, 0.0  ;;  %v2051_v44 = vsel %vm7733_vm1, %v5431_v42, 0.0 }
 0x169   : > { %2040 = vadd.xlane.f32.xlu1 %v2039_v8  ;;  %v1907_v8 = vmul.f32 1.442695, %v1821_v34  ;;  %v5451_v27 = vpop.eup %4478  ;;  %v1829_v34 = vsub.f32 %v5110_v54, %v5361_v46  ;;  %v1913_v54 = vmul.f32 1.442695, %v1824_v29 }
 0x16a   : > { %v5455_v49 = vpop.eup %4480  ;;  %v2045_v24 = vsel %vm7733_vm1, %v5451_v27, 0.0 }
 0x16b   : > { %v5429_v63 = vpop.xlane.xlu2 %1713  ;;  %v5433_v13 = vpop.xlane.xlu0 %1722  ;;  %4484 = vpow2.f32 %v1907_v8  ;;  %v1923_v47 = vmul.f32 1.442695, %v1829_v34  ;;  %v1828_v34 = vsub.f32 %v5120_v61, %v5387_v45 }
 0x16c   : > { %v5435_v56 = vpop.xlane.xlu1 %1707  ;;  %v5461_v36 = vpop.eup %4482  ;;  %4486 = vpow2.f32 %v1909_v35 }
 0x16d   : > { %4488 = vpow2.f32 %v1915_v43  ;;  %v1827_v43 = vsub.f32 %v5098_v48, %v5337_v51 }
 0x16f   : > { %v1919_v48 = vmul.f32 1.442695, %v1827_v43  ;;  %v1835_v43 = vsub.f32 %v5134_v6, %v5405_v26 }
 0x170   : > { %2031 = vadd.xlane.f32.xlu2 %v2030_v16  ;;  %2043 = vadd.xlane.f32.xlu0 %v2042_v18  ;;  %v2054_v16 = vsel %vm7733_vm1, %v5455_v49, 0.0  ;;  %v2048_v18 = vsel %vm7733_vm1, %v5461_v36, 0.0 }
 0x171   : > { %2052 = vadd.xlane.f32.xlu1 %v2051_v44  ;;  %v1911_v44 = vmul.f32 1.442695, %v1823_v41  ;;  %v5475_v50 = vpop.eup %4484  ;;  %v1831_v41 = vsub.f32 %v5122_v62, %v5381_v38  ;;  %v1921_v62 = vmul.f32 1.442695, %v1828_v34 }
 0x172   : > { %v5479_v53 = vpop.eup %4486  ;;  %v2057_v29 = vsel %vm7733_vm1, %v5475_v50, 0.0 }
 0x173   : > { %v5453_v60 = vpop.xlane.xlu2 %1725  ;;  %v5459_v39 = vpop.xlane.xlu0 %1728  ;;  %4490 = vpow2.f32 %v1911_v44  ;;  %v1927_v51 = vmul.f32 1.442695, %v1831_v41  ;;  %v1833_v41 = vsub.f32 %v5132_v3, %v5411_v32 }
 0x174   : > { %v5457_v40 = vpop.xlane.xlu1 %1719  ;;  %v5485_v35 = vpop.eup %4488  ;;  %4492 = vpow2.f32 %v1923_v47 }
 0x175   : > { %4494 = vpow2.f32 %v1913_v54  ;;  %v1826_v54 = vsub.f32 %v5116_v59, %v5385_v58  ;;  %v1935_v59 = vmul.f32 1.442695, %v1835_v43  ;;  %v1931_v6 = vmul.f32 1.442695, %v1833_v41 }
 0x176   : > { %4496 = vpow2.f32 %v1919_v48  ;;  %v1832_v43 = vsub.f32 %v5138_v10, %v5435_v56 }
 0x177   : > { %4498 = vpow2.f32 %v1927_v51 }
 0x178   : > { %2046 = vadd.xlane.f32.xlu2 %v2045_v24  ;;  %2055 = vadd.xlane.f32.xlu0 %v2054_v16  ;;  %v2069_v24 = vsel %vm7733_vm1, %v5485_v35, 0.0  ;;  %v2060_v16 = vsel %vm7733_vm1, %v5479_v53, 0.0  ;;  %4500 = vpow2.f32 %v1921_v62  ;;  %v1830_v62 = vsub.f32 %v5126_v0, %v5409_v14 }
 0x179   : > { %2049 = vadd.xlane.f32.xlu1 %v2048_v18  ;;  %v5499_v18 = vpop.eup %4490 }
 0x17a   : > { %v5503_v61 = vpop.eup %4492  ;;  %v2063_v34 = vsel %vm7733_vm1, %v5499_v18, 0.0 }
 0x17b   : > { %v5477_v46 = vpop.xlane.xlu2 %1731  ;;  %v5483_v8 = vpop.xlane.xlu0 %1740  ;;  %7757 = vst [vmem:[#allocation25_spill] sm:$0xff] %v5503_v61 }
 0x17c   : > { %v5481_v52 = vpop.xlane.xlu1 %1734  ;;  %v5509_v47 = vpop.eup %4494 }
 0x17d   : > { %7758 = vst [vmem:[#allocation26_spill] sm:$0xff] %v5509_v47  ;;  %v5523_v58 = vpop.eup %4496 }
 0x17e   : > { %7759 = vst [vmem:[#allocation27_spill] sm:$0xff] %v5523_v58  ;;  %v5527_v3 = vpop.eup %4498  ;;  %v2075_v41 = vsel %vm7733_vm1, %v5523_v58, 0.0 }
 0x17f   : > { %7760 = vst [vmem:[#allocation28_spill] sm:$0xff] %v5527_v3  ;;  %v5533_v51 = vpop.eup %4500 }
 0x180   : > { %2058 = vadd.xlane.f32.xlu2 %v2057_v29  ;;  %2070 = vadd.xlane.f32.xlu0 %v2069_v24  ;;  %v2081_v29 = vsel %vm7733_vm1, %v5503_v61, 0.0  ;;  %v2066_v24 = vsel %vm7733_vm1, %v5509_v47, 0.0  ;;  %7761 = vst [vmem:[#allocation29_spill] sm:$0xff] %v5533_v51 }
 0x181   : > { %2061 = vadd.xlane.f32.xlu1 %v2060_v16  ;;  %v1917_v16 = vmul.f32 1.442695, %v1826_v54  ;;  %v1837_v54 = vsub.f32 %v5144_v15, %v5433_v13  ;;  %v1929_v15 = vmul.f32 1.442695, %v1832_v43  ;;  %v7767_v43 = vld [vmem:[#allocation5_spill] sm:$0xff] }
 0x183   : > { %v5501_v38 = vpop.xlane.xlu2 %1743  ;;  %v5507_v44 = vpop.xlane.xlu0 %1737  ;;  %4502 = vpow2.f32 %v1917_v16  ;;  %v1939_v0 = vmul.f32 1.442695, %v1837_v54  ;;  %v7766_v54 = vld [vmem:[#allocation3_spill] sm:$0xff] }
 0x184   : > { %v5505_v45 = vpop.xlane.xlu1 %1746  ;;  %4504 = vpow2.f32 %v1935_v59 }
 0x185   : > { %4506 = vpow2.f32 %v1931_v6  ;;  %v7765_v6 = vld [vmem:[#allocation2_spill] sm:$0xff] }
 0x188   : > { %2064 = vadd.xlane.f32.xlu2 %v2063_v34  ;;  %2082 = vadd.xlane.f32.xlu0 %v2081_v29  ;;  %v2087_v34 = vsel %vm7733_vm1, %v5527_v3, 0.0  ;;  %v2078_v29 = vsel %vm7733_vm1, %v5533_v51, 0.0 }
 0x189   : > { %2067 = vadd.xlane.f32.xlu1 %v2066_v24  ;;  %v1925_v24 = vmul.f32 1.442695, %v1830_v62  ;;  %v5547_v14 = vpop.eup %4502  ;;  %v1834_v62 = vsub.f32 %v7765_v6, %v5429_v63 }
 0x18a   : > { %7762 = vst [vmem:[#allocation30_spill] sm:$0xff] %v5547_v14  ;;  %v5551_v10 = vpop.eup %4504 }
 0x18b   : > { %v5525_v26 = vpop.xlane.xlu2 %1758  ;;  %v5529_v32 = vpop.xlane.xlu0 %1749  ;;  %7763 = vst [vmem:[#allocation31_spill] sm:$0xff] %v5551_v10  ;;  %4508 = vpow2.f32 %v1925_v24  ;;  %v2099_v51 = vsel %vm7733_vm1, %v5551_v10, 0.0  ;;  %v1933_v3 = vmul.f32 1.442695, %v1834_v62 }
 0x18c   : > { %v5531_v48 = vpop.xlane.xlu1 %1752  ;;  %v5557_v59 = vpop.eup %4506  ;;  %4510 = vpow2.f32 %v1939_v0 }
 0x18d   : > { %7764 = vst [vmem:[#allocation32_spill] sm:$0xff] %v5557_v59  ;;  %4512 = vpow2.f32 %v1929_v15  ;;  %v2093_v24 = vsel %vm7733_vm1, %v5557_v59, 0.0 }
 0x18e   : > { %4514 = vpow2.f32 %v1933_v3 }
 0x190   : > { %2076 = vadd.xlane.f32.xlu2 %v2075_v41  ;;  %2088 = vadd.xlane.f32.xlu0 %v2087_v34  ;;  %v1836_v41 = vsub.f32 %v7766_v54, %v5457_v40  ;;  %v1838_v34 = vsub.f32 %v7767_v43, %v5453_v60 }
 0x191   : > { %2079 = vadd.xlane.f32.xlu1 %v2078_v29  ;;  %v2072_v29 = vsel %vm7733_vm1, %v5547_v14, 0.0  ;;  %v5571_v0 = vpop.eup %4508  ;;  %v422_v14 = vld [vmem:[%s5615_s24 + $0x8] sm:$0xff] }
 0x192   : > { %v1937_v63 = vmul.f32 1.442695, %v1836_v41  ;;  %7768 = vst [vmem:[#allocation2_spill] sm:$0xff] %v5571_v0  ;;  %v1941_v40 = vmul.f32 1.442695, %v1838_v34  ;;  %v5575_v60 = vpop.eup %4510  ;;  %v7773_v34 = vld [vmem:[#allocation9_spill] sm:$0xff]  ;;  %3163 = vmatpush.msra.mxu0 %v422_v14 }
 0x193   : > { %v5549_v13 = vpop.xlane.xlu2 %1770  ;;  %v5555_v16 = vpop.xlane.xlu0 %1755  ;;  %7769 = vst [vmem:[#allocation3_spill] sm:$0xff] %v5575_v60  ;;  %v2084_v59 = vsel %vm7733_vm1, %v5571_v0, 0.0  ;;  %v2105_v3 = vsel %vm7733_vm1, %v5575_v60, 0.0  ;;  %v7777_v60 = vld [vmem:[#allocation7_spill] sm:$0xff] }
 0x194   : > { %v5553_v56 = vpop.xlane.xlu1 %1764  ;;  %v5581_v43 = vpop.eup %4512  ;;  %4516 = vpow2.f32 %v1937_v63 }
 0x195   : > { %7770 = vst [vmem:[#allocation5_spill] sm:$0xff] %v5581_v43  ;;  %4518 = vpow2.f32 %v1941_v40  ;;  %v2090_v10 = vsel %vm7733_vm1, %v5581_v43, 0.0 }
 0x198   : > { %2073 = vadd.xlane.f32.xlu2 %v2072_v29  ;;  %2100 = vadd.xlane.f32.xlu0 %v2099_v51  ;;  %v7771_v29 = vld [vmem:[#allocation4_spill] sm:$0xff]  ;;  %v7772_v51 = vld [vmem:[#allocation6_spill] sm:$0xff] }
 0x199   : > { %2094 = vadd.xlane.f32.xlu1 %v2093_v24  ;;  %v1839_v62 = vsub.f32 %v7771_v29, %v5459_v39  ;;  %v1841_v41 = vsub.f32 %v7772_v51, %v5481_v52  ;;  %v1845_v24 = vsub.f32 %v7773_v34, %v5505_v45  ;;  %v5595_v52 = vpop.eup %4514 }
 0x19a   : > { %7774 = vst [vmem:[#allocation4_spill] sm:$0xff] %v5595_v52  ;;  %v5599_v45 = vpop.eup %4516 }
 0x19b   : > { %v5573_v15 = vpop.xlane.xlu2 %1776  ;;  %v5579_v54 = vpop.xlane.xlu0 %1767  ;;  %v1943_v39 = vmul.f32 1.442695, %v1839_v62  ;;  %v1947_v63 = vmul.f32 1.442695, %v1841_v41  ;;  %v1955_v40 = vmul.f32 1.442695, %v1845_v24  ;;  %v1843_v62 = vsub.f32 %v7777_v60, %v5483_v8 }
 0x19c   : > { %v5577_v6 = vpop.xlane.xlu1 %1761  ;;  %7775 = vst [vmem:[#allocation6_spill] sm:$0xff] %v5599_v45  ;;  %v5605_v34 = vpop.eup %4518  ;;  %v7779_v24 = vld [vmem:[#allocation13_spill] sm:$0xff] }
 0x19d   : > { %7776 = vst [vmem:[#allocation9_spill] sm:$0xff] %v5605_v34  ;;  %4520 = vpow2.f32 %v1943_v39  ;;  %v2102_v39 = vsel %vm7733_vm1, %v5599_v45, 0.0  ;;  %v2108_v8 = vsel %vm7733_vm1, %v5605_v34, 0.0  ;;  %v1951_v60 = vmul.f32 1.442695, %v1843_v62  ;;  %v423_v34 = vld [vmem:[%s5615_s24 + $0x10] sm:$0xff] }
 0x19e   : > { %4522 = vpow2.f32 %v1947_v63  ;;  %v424_v63 = vld [vmem:[%s5615_s24 + $0x18] sm:$0xff]  ;;  %v7784_v62 = vld [vmem:[#allocation14_spill] sm:$0xff] }
 0x19f   : > { %4524 = vpow2.f32 %v1955_v40  ;;  %v7780_v40 = vld [vmem:[#allocation8_spill] sm:$0xff]  ;;  %3192 = vmatpush.msra.mxu1 %v424_v63 }
 0x1a0   : > { %2085 = vadd.xlane.f32.xlu2 %v2084_v59  ;;  %2091 = vadd.xlane.f32.xlu0 %v2090_v10  ;;  %v7778_v10 = vld [vmem:[#allocation10_spill] sm:$0xff]  ;;  %4526 = vpow2.f32 %v1951_v60 }
 0x1a1   : > { %2106 = vadd.xlane.f32.xlu1 %v2105_v3  ;;  %v1842_v41 = vsub.f32 %v7778_v10, %v5507_v44  ;;  %v1846_v3 = vsub.f32 %v7779_v24, %v5529_v32  ;;  %v2096_v44 = vsel %vm7733_vm1, %v5595_v52, 0.0  ;;  %v1840_v10 = vsub.f32 %v7780_v40, %v5477_v46  ;;  %v7782_v24 = vld [vmem:[#allocation11_spill] sm:$0xff]  ;;  %3193 = vmatpush.msra.mxu1 %v423_v34 }
 0x1a3   : > { %v5597_v29 = vpop.xlane.xlu2 %1788  ;;  %v5603_v59 = vpop.xlane.xlu0 %1782  ;;  %v1949_v0 = vmul.f32 1.442695, %v1842_v41  ;;  %v1957_v45 = vmul.f32 1.442695, %v1846_v3  ;;  %v7786_v3 = vld [vmem:[#allocation12_spill] sm:$0xff] }
 0x1a4   : > { %v5601_v51 = vpop.xlane.xlu1 %1773  ;;  %v5628_v32 = vpop.eup %4520  ;;  %v1847_v63 = vsub.f32 %v7786_v3, %v5531_v48  ;;  %v421_v48 = vld [vmem:[%s5615_s24] sm:$0xff] }
 0x1a5   : > { %7781 = vst [vmem:[#allocation7_spill] sm:$0xff] %v5628_v32  ;;  %v5635_v52 = vpop.eup %4522  ;;  %4528 = vpow2.f32 %v1949_v0  ;;  %v2111_v0 = vsel %vm7733_vm1, %v5628_v32, 0.0  ;;  %3164 = vmatpush.msra.mxu0 %v421_v48 }
 0x1a6   : > { %7783 = vst [vmem:[#allocation10_spill] sm:$0xff] %v5635_v52  ;;  %v5643_v41 = vpop.eup %4524  ;;  %4530 = vpow2.f32 %v1957_v45  ;;  %v428_v45 = vld [vmem:[%s5615_s24 + $0x38] sm:$0xff] }
 0x1a7   : > { %7785 = vst [vmem:[#allocation13_spill] sm:$0xff] %v5643_v41  ;;  %v2129_v60 = vsel %vm7733_vm1, %v5643_v41, 0.0  ;;  %3250 = vmatpush.msra.mxu3 %v428_v45  ;;  %v7796_v41 = vld [vmem:[#allocation19_spill] sm:$0xff] }
 0x1a8   : > { %2103 = vadd.xlane.f32.xlu2 %v2102_v39  ;;  %2109 = vadd.xlane.f32.xlu0 %v2108_v8  ;;  %v1844_v39 = vsub.f32 %v7782_v24, %v5501_v38  ;;  %v1849_v8 = vsub.f32 %v7784_v62, %v5525_v26  ;;  %v1945_v38 = vmul.f32 1.442695, %v1840_v10  ;;  %v7787_v24 = vld [vmem:[#allocation17_spill] sm:$0xff]  ;;  %v2117_v62 = vsel %vm7733_vm1, %v5635_v52, 0.0  ;;  %v7788_v10 = vld [vmem:[#allocation15_spill] sm:$0xff] }
 0x1a9   : > { %2097 = vadd.xlane.f32.xlu1 %v2096_v44  ;;  %v1853_v26 = vsub.f32 %v7787_v24, %v5549_v13  ;;  %v1959_v13 = vmul.f32 1.442695, %v1847_v63  ;;  %v7790_v24 = vld [vmem:[#allocation16_spill] sm:$0xff]  ;;  %v1852_v52 = vsub.f32 %v7796_v41, %v5579_v54  ;;  %v7800_v54 = vld [vmem:[#allocation21_spill] sm:$0xff] }
 0x1aa   : > { %v1953_v40 = vmul.f32 1.442695, %v1844_v39  ;;  %v1963_v34 = vmul.f32 1.442695, %v1849_v8  ;;  %4532 = vpow2.f32 %v1945_v38  ;;  %v1851_v39 = vsub.f32 %v7788_v10, %v5553_v56  ;;  %v5660_v8 = vpop.eup %4526  ;;  %v427_v63 = vld [vmem:[%s5615_s24 + $0x30] sm:$0xff] }
 0x1ab   : > { %v5632_v43 = vpop.xlane.xlu2 %1785  ;;  %v5639_v44 = vpop.xlane.xlu0 %1794  ;;  %7789 = vst [vmem:[#allocation8_spill] sm:$0xff] %v5660_v8  ;;  %v1971_v3 = vmul.f32 1.442695, %v1853_v26  ;;  %3251 = vmatpush.msra.mxu3 %v427_v63  ;;  %v2123_v10 = vsel %vm7733_vm1, %v5660_v8, 0.0  ;;  %v1854_v41 = vsub.f32 %v7800_v54, %v5601_v51 }
 0x1ac   : > { %v5641_v46 = vpop.xlane.xlu1 %1779  ;;  %4534 = vpow2.f32 %v1953_v40  ;;  %v1967_v40 = vmul.f32 1.442695, %v1851_v39  ;;  %v426_v39 = vld [vmem:[%s5615_s24 + $0x28] sm:$0xff] }
 0x1ad   : > { %4536 = vpow2.f32 %v1963_v34  ;;  %v7794_v34 = vld [vmem:[#allocation18_spill] sm:$0xff]  ;;  %3221 = vmatpush.msra.mxu2 %v426_v39 }
 0x1ae   : > { %v1850_v45 = vsub.f32 %v7794_v34, %v5577_v6  ;;  %v7798_v6 = vld [vmem:[#allocation23_spill] sm:$0xff]  ;;  %v425_v34 = vld [vmem:[%s5615_s24 + $0x20] sm:$0xff] }
 0x1af   : > { %3222 = vmatpush.msra.mxu2 %v425_v34 }
 0x1b0   : > { %2118 = vadd.xlane.f32.xlu2 %v2117_v62  ;;  %2130 = vadd.xlane.f32.xlu0 %v2129_v60  ;;  %v1848_v62 = vsub.f32 %v7790_v24, %v5555_v16  ;;  %v5666_v60 = vpop.eup %4528  ;;  %v7793_v16 = vld [vmem:[#allocation20_spill] sm:$0xff] }
 0x1b1   : > { %2112 = vadd.xlane.f32.xlu1 %v2111_v0  ;;  %7791 = vst [vmem:[#allocation11_spill] sm:$0xff] %v5666_v60  ;;  %v5673_v56 = vpop.eup %4530  ;;  %v1855_v26 = vsub.f32 %v7793_v16, %v5573_v15 }
 0x1b2   : > { %7792 = vst [vmem:[#allocation14_spill] sm:$0xff] %v5673_v56  ;;  %v1961_v48 = vmul.f32 1.442695, %v1848_v62  ;;  %v5682_v24 = vpop.eup %4532  ;;  %v2132_v15 = vsel %vm7733_vm1, %v5673_v56, 0.0  ;;  %v1859_v62 = vsub.f32 %v7798_v6, %v5597_v29  ;;  %v1965_v56 = vmul.f32 1.442695, %v1850_v45 }
 0x1b3   : > { %v5664_v14 = vpop.xlane.xlu2 %1797  ;;  %v5668_v0 = vpop.xlane.xlu0 %1998  ;;  %7795 = vst [vmem:[#allocation12_spill] sm:$0xff] %v5682_v24  ;;  %v1975_v16 = vmul.f32 1.442695, %v1855_v26  ;;  %v1969_v29 = vmul.f32 1.442695, %v1852_v52  ;;  %v2114_v6 = vsel %vm7733_vm1, %v5682_v24, 0.0 }
 0x1b4   : > { %v5670_v38 = vpop.xlane.xlu1 %1791  ;;  %4538 = vrcp.f32 %v5668_v0  ;;  %v1973_v52 = vmul.f32 1.442695, %v1854_v41  ;;  %vm2218_vm3 = vweird.f32 %v5668_v0 }
 0x1b5   : > { %4540 = vpow2.f32 %v1959_v13  ;;  %v2120_v13 = vsel %vm7733_vm1, %v5666_v60, 0.0 }
 0x1b6   : > { %4542 = vpow2.f32 %v1971_v3  ;;  %v5691_v3 = vpop.eup %4534 }
 0x1b7   : > { %7797 = vst [vmem:[#allocation17_spill] sm:$0xff] %v5691_v3  ;;  %v5695_v63 = vpop.eup %4536  ;;  %4544 = vpow2.f32 %v1967_v40  ;;  %v2126_v54 = vsel %vm7733_vm1, %v5691_v3, 0.0 }
 0x1b8   : > { %2124 = vadd.xlane.f32.xlu2 %v2123_v10  ;;  %2121 = vadd.xlane.f32.xlu0 %v2120_v13  ;;  %7799 = vst [vmem:[#allocation15_spill] sm:$0xff] %v5695_v63  ;;  %4546 = vpow2.f32 %v1961_v48  ;;  %v7803_v48 = vld [vmem:[#allocation22_spill] sm:$0xff]  ;;  %v2141_v34 = vsel %vm7733_vm1, %v5695_v63, 0.0 }
 0x1b9   : > { %2133 = vadd.xlane.f32.xlu1 %v2132_v15  ;;  %v1983_v15 = vmul.f32 1.442695, %v1859_v62  ;;  %v1857_v45 = vsub.f32 %v7803_v48, %v5603_v59 }
 0x1ba   : > { %v5700_v10 = vpop.eup %4538 }
 0x1bb   : > { %v5702_v60 = vpop.xlane.xlu2 %1992  ;;  %v5704_v8 = vpop.eup %4540  ;;  %v2214_v13 = vmul.f32 %v5700_v10, %v5668_v0  ;;  %v1979_v41 = vmul.f32 1.442695, %v1857_v45  ;;  %vm2219_vm2 = vweird.f32 %v5700_v10 }
 0x1bc   : > { %7801 = vst [vmem:[#allocation16_spill] sm:$0xff] %v5704_v8  ;;  %4548 = vrcp.f32 %v5702_v60  ;;  %v5709_v40 = vpop.xlane.xlu0 %2010  ;;  %v5711_v26 = vpop.xlane.xlu1 %1995  ;;  %vm5756_vm4 = vmor %vm2218_vm3, %vm2219_vm2  ;;  %vm2188_vm8 = vweird.f32 %v5702_v60 }
 0x1bd   : > { %v5713_v51 = vpop.eup %4542  ;;  %4550 = vrcp.f32 %v5709_v40  ;;  %v2215_v39 = vsub.f32 1.0, %v2214_v13  ;;  %v7806_v13 = vld [vmem:[#allocation24_spill] sm:$0xff]  ;;  %vm2278_vm10 = vweird.f32 %v5709_v40 }
 0x1be   : > { %7802 = vst [vmem:[#allocation20_spill] sm:$0xff] %v5713_v51  ;;  %4552 = vpow2.f32 %v1975_v16  ;;  %v5724_v32 = vpop.eup %4544  ;;  %v2153_v62 = vsel %vm7733_vm1, %v5713_v51, 0.0  ;;  %v1858_v48 = vsub.f32 %v7806_v13, %v5632_v43  ;;  %v2224_v51 = vand.u32 2147483648, %v5668_v0 }
 0x1bf   : > { %4554 = vpow2.f32 %v1965_v56  ;;  %7804 = vst [vmem:[#allocation18_spill] sm:$0xff] %v5724_v32  ;;  %v2216_v59 = vmul.f32 %v5700_v10, %v2215_v39  ;;  %v2135_v56 = vsel %vm7733_vm1, %v5704_v8, 0.0  ;;  %v5731_v16 = vpop.eup %4546  ;;  %v1861_v39 = vsub.f32 %v5261_v1, %v5639_v44 }
 0x1c0   : > { %4556 = vpow2.f32 %v1969_v29  ;;  %2115 = vadd.xlane.f32.xlu2 %v2114_v6  ;;  %7805 = vst [vmem:[#allocation19_spill] sm:$0xff] %v5731_v16  ;;  %2127 = vadd.xlane.f32.xlu0 %v2126_v54  ;;  %v2222_v43 = vand.u32 2147483647, %v5668_v0  ;;  %v5769_v0 = vsel %vm7733_vm1, %v5731_v16, 0.0  ;;  %v2225_v47 = vor.u32 1.1754944e-38, %v2224_v51 }
 0x1c1   : > { %4558 = vpow2.f32 %v1983_v15  ;;  %2142 = vadd.xlane.f32.xlu1 %v2141_v34  ;;  %v2217_v6 = vadd.f32 %v5700_v10, %v2216_v59  ;;  %v1856_v15 = vsub.f32 %v5267_v22, %v5641_v46  ;;  %v2147_v46 = vsel %vm7733_vm1, %v5724_v32, 0.0 }
 0x1c2   : > { %v5736_v29 = vpop.eup %4548  ;;  %4560 = vpow2.f32 %v1973_v52  ;;  %v1981_v59 = vmul.f32 1.442695, %v1858_v48  ;;  %v1987_v32 = vmul.f32 1.442695, %v1861_v39  ;;  %vm2223_vm5 = vcmp.eq.f32.partialorder %v2222_v43, 8.507059e+37 }
 0x1c3   : > { %v5742_v8 = vpop.eup %4550  ;;  %v2184_v45 = vmul.f32 %v5736_v29, %v5702_v60  ;;  %v5750_v52 = vpop.xlane.xlu2 %2004  ;;  %v2221_v13 = vsel %vm5756_vm4, %v5700_v10, %v2217_v6  ;;  %v1977_v58 = vmul.f32 1.442695, %v1856_v15  ;;  %v1862_v6 = vsub.f32 %v5283_v57, %v5664_v14 }
 0x1c4   : > { %v5752_v54 = vpop.eup %4552  ;;  %v2274_v22 = vmul.f32 %v5742_v8, %v5709_v40  ;;  %4562 = vrcp.f32 %v5750_v52  ;;  %v5763_v44 = vpop.xlane.xlu0 %2016  ;;  %vm2189_vm6 = vweird.f32 %v5736_v29  ;;  %v2194_v39 = vand.u32 2147483648, %v5702_v60 }
 0x1c5   : > { %7807 = vst [vmem:[#allocation23_spill] sm:$0xff] %v5752_v54  ;;  %v5771_v34 = vpop.eup %4554  ;;  %v2185_v3 = vsub.f32 1.0, %v2184_v45  ;;  %4564 = vrcp.f32 %v5711_v26  ;;  %v5777_v24 = vpop.xlane.xlu1 %2007  ;;  %v2226_v45 = vsel %vm2223_vm5, %v2225_v47, %v2221_v13  ;;  %vm2279_vm7 = vweird.f32 %v5742_v8  ;;  %vm5805_vm9 = vmor %vm2188_vm8, %vm2189_vm6 }
 0x1c6   : > { %v5779_v63 = vpop.eup %4556  ;;  %4566 = vpow2.f32 %v1979_v41  ;;  %v2275_v61 = vsub.f32 1.0, %v2274_v22  ;;  %v2192_v57 = vand.u32 2147483647, %v5702_v60  ;;  %v2227_v43 = vmul.f32 %v5293_v9, %v2226_v45  ;;  %vm5823_vm11 = vmor %vm2278_vm10, %vm2279_vm7 }
 0x1c7   : > { %7810 = vst [vmem:[#allocation21_spill] sm:$0xff] %v5779_v63  ;;  %v5781_v16 = vpop.eup %4558  ;;  %v2186_v48 = vmul.f32 %v5736_v29, %v2185_v3  ;;  %4568 = vrcp.f32 %v5763_v44  ;;  %v430_v3 = vld [vmem:[%s5615_s24 + $0x48] sm:$0xff]  ;;  %vm2248_vm15 = vweird.f32 %v5750_v52  ;;  %v2252_v13 = vand.u32 2147483647, %v5750_v52 }
 0x1c8   : > { %7811 = vst [vmem:[#allocation22_spill] sm:$0xff] %v5781_v16  ;;  %v5785_v10 = vpop.eup %4560  ;;  %v2276_v51 = vmul.f32 %v5742_v8, %v2275_v61  ;;  %2154 = vadd.xlane.f32.xlu2 %v2153_v62  ;;  %4570 = vpow2.f32 %v1981_v59  ;;  %2136 = vadd.xlane.f32.xlu0 %v2135_v56  ;;  %v2284_v61 = vand.u32 2147483648, %v5709_v40  ;;  %v2282_v56 = vand.u32 2147483647, %v5709_v40 }
 0x1c9   : > { %7812 = vst [vmem:[#allocation24_spill] sm:$0xff] %v5785_v10  ;;  %v2187_v41 = vadd.f32 %v5736_v29, %v2186_v48  ;;  %2148 = vadd.xlane.f32.xlu1 %v2147_v46  ;;  %3279 = vmatpush.msrb.mxu0 %v430_v3  ;;  %4572 = vpow2.f32 %v1987_v32  ;;  %v1989_v46 = vmul.f32 1.442695, %v1862_v6  ;;  %v2144_v40 = vsel %vm7733_vm1, %v5771_v34, 0.0 }
 0x1ca   : > { %v5795_v15 = vpop.eup %4562  ;;  %v2277_v47 = vadd.f32 %v5742_v8, %v2276_v51  ;;  %4574 = vpow2.f32 %v1977_v58  ;;  %v2195_v48 = vor.u32 1.1754944e-38, %v2194_v39  ;;  %4364 = vmatmul.msk.f32.vlgmr.msra.gmra.mxu1 %vm7733_vm1, %v2227_v43  ;;  %vm2193_vm12 = vcmp.eq.f32.partialorder %v2192_v57, 8.507059e+37 }
 0x1cb   : > { %v5801_v14 = vpop.eup %4564  ;;  %v2244_v60 = vmul.f32 %v5795_v15, %v5750_v52  ;;  %v5814_v1 = vpop.xlane.xlu2 %2001  ;;  %v2191_v59 = vsel %vm5805_vm9, %v5736_v29, %v2187_v41  ;;  %v1860_v29 = vsub.f32 %v5287_v5, %v5670_v38  ;;  %v2285_v45 = vor.u32 1.1754944e-38, %v2284_v61 }
 0x1cc   : > { %v5816_v22 = vpop.eup %4566  ;;  %v2281_v32 = vsel %vm5823_vm11, %v5742_v8, %v2277_v47  ;;  %v2199_v51 = vmul.f32 %v5801_v14, %v5711_v26  ;;  %v2196_v3 = vsel %vm2193_vm12, %v2195_v48, %v2191_v59  ;;  %vm2283_vm13 = vcmp.eq.f32.partialorder %v2282_v56, 8.507059e+37  ;;  %v5847_v38 = vpop.xlane.xlu0 %2028 }
 0x1cd   : > { %7815 = vst [vmem:[#allocation33_spill] sm:$0xff] %v5816_v22  ;;  %v5829_v9 = vpop.eup %4568  ;;  %v2245_v6 = vsub.f32 1.0, %v2244_v60  ;;  %4576 = vrcp.f32 %v5814_v1  ;;  %v5843_v8 = vpop.xlane.xlu1 %2022  ;;  %v2286_v39 = vsel %vm2283_vm13, %v2285_v45, %v2281_v32  ;;  %v2156_v57 = vsel %vm7733_vm1, %v5785_v10, 0.0  ;;  %v432_v45 = vld [vmem:[%s5615_s24 + $0x58] sm:$0xff]  ;;  %v435_v10 = vld [vmem:[%s5615_s24 + $0x70] sm:$0xff] }
 0x1ce   : > { %v5839_v41 = vpop.eup %4570  ;;  %4578 = vpow2.f32 %v1989_v46  ;;  %v2304_v5 = vmul.f32 %v5829_v9, %v5763_v44  ;;  %vm2249_vm14 = vweird.f32 %v5795_v15  ;;  %v1985_v62 = vmul.f32 1.442695, %v1860_v29  ;;  %v429_v46 = vld [vmem:[%s5615_s24 + $0x40] sm:$0xff]  ;;  %3308 = vmatpush.msrb.mxu1 %v432_v45 }
 0x1cf   : > { %7818 = vst [vmem:[#allocation34_spill] sm:$0xff] %v5839_v41  ;;  %v2246_v58 = vmul.f32 %v5795_v15, %v2245_v6  ;;  %4580 = vrcp.f32 %v5777_v24  ;;  %v5855_v61 = vpop.eup %4572  ;;  %v2200_v56 = vsub.f32 1.0, %v2199_v51  ;;  %v2254_v60 = vand.u32 2147483648, %v5750_v52  ;;  %3280 = vmatpush.msrb.mxu0 %v429_v46  ;;  %vm5870_vm2 = vmor %vm2248_vm15, %vm2249_vm14  ;;  %v434_v51 = vld [vmem:[%s5615_s24 + $0x68] sm:$0xff] }
 0x1d0   : > { %2145 = vadd.xlane.f32.xlu2 %v2144_v40  ;;  %2157 = vadd.xlane.f32.xlu0 %v2156_v57  ;;  %7819 = vst [vmem:[#allocation35_spill] sm:$0xff] %v5855_v61  ;;  %v2197_v43 = vmul.f32 %v5307_v21, %v2196_v3  ;;  %v5860_v59 = vpop.eup %4574  ;;  %4582 = vrcp.f32 %v5843_v8  ;;  %v2305_v48 = vsub.f32 1.0, %v2304_v5  ;;  %v2209_v32 = vand.u32 2147483648, %v5711_v26 }
 0x1d1   : > { %v2247_v47 = vadd.f32 %v5795_v15, %v2246_v58  ;;  %2139 = vadd.xlane.f32.xlu1 %v5769_v0  ;;  %7820 = vst [vmem:[#allocation36_spill] sm:$0xff] %v5860_v59  ;;  %v2287_v0 = vmul.f32 %v5311_v11, %v2286_v39  ;;  %4584 = vrcp.f32 %v5847_v38  ;;  %v2150_v6 = vsel %vm7733_vm1, %v5779_v63, 0.0  ;;  %3337 = vmatpush.msrb.mxu2 %v434_v51  ;;  %v431_v63 = vld [vmem:[%s5615_s24 + $0x50] sm:$0xff] }
 0x1d2   : > { %4362 = vmatmul.msk.f32.vlgmr.msra.gmra.mxu0 %vm7733_vm1, %v2197_v43  ;;  %v5887_v29 = vsel %vm7733_vm1, %v5752_v54, 0.0  ;;  %4586 = vpow2.f32 %v1985_v62  ;;  %v2201_v58 = vmul.f32 %v5801_v14, %v2200_v56  ;;  %v2255_v39 = vor.u32 1.1754944e-38, %v2254_v60  ;;  %3309 = vmatpush.msrb.mxu1 %v431_v63 }
 0x1d3   : > { %v5866_v40 = vpop.xlane.xlu2 %2013  ;;  %v5876_v52 = vpop.eup %4576  ;;  %v2251_v11 = vsel %vm5870_vm2, %v5795_v15, %v2247_v47  ;;  %4368 = vmatmul.msk.f32.vlgmr.msra.gmra.mxu3 %vm7733_vm1, %v2287_v0  ;;  %v2171_v15 = vsel %vm7733_vm1, %v5781_v16, 0.0  ;;  %vm2253_vm3 = vcmp.eq.f32.partialorder %v2252_v13, 8.507059e+37  ;;  %v2177_v57 = vsel %vm7733_vm1, %v5855_v61, 0.0  ;;  %v433_v61 = vld [vmem:[%s5615_s24 + $0x60] sm:$0xff] }
 0x1d4   : > { %v5891_v3 = vpop.eup %4578  ;;  %v2165_v47 = vsel %vm7733_vm1, %v5816_v22, 0.0  ;;  %v5904_v62 = vsel %vm7733_vm1, %v5839_v41, 0.0  ;;  %v2256_v56 = vsel %vm2253_vm3, %v2255_v39, %v2251_v11  ;;  %v2306_v60 = vmul.f32 %v5829_v9, %v2305_v48  ;;  %3338 = vmatpush.msrb.mxu2 %v433_v61 }
 0x1d5   : > { %7823 = vst [vmem:[#allocation37_spill] sm:$0xff] %v5891_v3  ;;  %v5896_v5 = vpop.eup %4580  ;;  %v2229_v43 = vmul.f32 %v5876_v52, %v5814_v1  ;;  %4588 = vrcp.f32 %v5866_v40  ;;  %vm2203_vm4 = vweird.f32 %v5711_v26  ;;  %v2210_v13 = vor.u32 1.1754944e-38, %v2209_v32  ;;  %v5913_v0 = vpop.xlane.xlu1 %2034 }
 0x1d6   : > { %v5910_v46 = vpop.eup %4582  ;;  %v2207_v21 = vand.u32 2147483647, %v5711_v26  ;;  %v5918_v48 = vsel %vm7733_vm1, %v5860_v59, 0.0  ;;  %v2312_v45 = vand.u32 2147483647, %v5763_v44  ;;  %v5925_v32 = vpop.xlane.xlu0 %2025  ;;  %v2202_v51 = vadd.f32 %v5801_v14, %v2201_v58 }
 0x1d7   : > { %v5920_v11 = vpop.eup %4584  ;;  %v5930_v39 = vsel %vm7733_vm1, %v5891_v3, 0.0  ;;  %vm2309_vm5 = vweird.f32 %v5829_v9  ;;  %vm2204_vm6 = vweird.f32 %v5801_v14  ;;  %v2307_v59 = vadd.f32 %v5829_v9, %v2306_v60 }
 0x1d8   : > { %2151 = vadd.xlane.f32.xlu2 %v2150_v6  ;;  %2172 = vadd.xlane.f32.xlu0 %v2171_v15  ;;  %v2259_v6 = vmul.f32 %v5896_v5, %v5777_v24  ;;  %v2314_v15 = vand.u32 2147483648, %v5763_v44  ;;  %v5936_v41 = vpop.eup %4586  ;;  %v2230_v16 = vsub.f32 1.0, %v2229_v43  ;;  %v2334_v58 = vmul.f32 %v5910_v46, %v5843_v8  ;;  %vm2205_vm7 = vmor %vm2203_vm4, %vm2204_vm6 }
 0x1d9   : > { %2178 = vadd.xlane.f32.xlu1 %v2177_v57  ;;  %v2257_v57 = vmul.f32 %v5331_v25, %v2256_v56  ;;  %4590 = vrcp.f32 %v5913_v0  ;;  %v2269_v54 = vand.u32 2147483648, %v5777_v24  ;;  %v2364_v25 = vmul.f32 %v5920_v11, %v5847_v38 }
 0x1da   : > { %v2206_v56 = vsel %vm2205_vm7, %v5801_v14, %v2202_v51  ;;  %vm2208_vm8 = vcmp.eq.f32.partialorder %v2207_v21, 8.507059e+37  ;;  %vm2308_vm9 = vweird.f32 %v5763_v44  ;;  %v2260_v26 = vsub.f32 1.0, %v2259_v6 }
 0x1db   : > { %v5944_v3 = vpop.xlane.xlu2 %2019  ;;  %4366 = vmatmul.msk.f32.vlgmr.msra.gmra.mxu2 %vm7733_vm1, %v2257_v57  ;;  %v5953_v60 = vpop.eup %4588  ;;  %v2239_v43 = vand.u32 2147483648, %v5814_v1  ;;  %v2211_v22 = vsel %vm2208_vm8, %v2210_v13, %v2206_v56  ;;  %vm5959_vm10 = vmor %vm2308_vm9, %vm2309_vm5  ;;  %vm5963_vm11 = vcmp.eq.f32.partialorder %v2312_v45, 8.507059e+37  ;;  %v2315_v21 = vor.u32 1.1754944e-38, %v2314_v15  ;;  %v436_v45 = vld [vmem:[%s5615_s24 + $0x78] sm:$0xff] }
 0x1dc   : > { %v2212_v44 = vmul.f32 %v5317_v17, %v2211_v22  ;;  %v2174_v6 = vsel %vm7733_vm1, %v5936_v41, 0.0  ;;  %v2311_v63 = vsel %vm5959_vm10, %v5829_v9, %v2307_v59  ;;  %vm2263_vm12 = vweird.f32 %v5777_v24  ;;  %3366 = vmatpush.msrb.mxu3 %v436_v45 }
 0x1dd   : > { %v2231_v61 = vmul.f32 %v5876_v52, %v2230_v16  ;;  %v2335_v13 = vsub.f32 1.0, %v2334_v58  ;;  %v5977_v51 = vor.u32 1.1754944e-38, %v2269_v54  ;;  %vm2233_vm13 = vweird.f32 %v5814_v1  ;;  %v5995_v57 = vpop.xlane.xlu1 %2040 }
 0x1de   : > { %v2365_v17 = vsub.f32 1.0, %v2364_v25  ;;  %v2289_v22 = vmul.f32 %v5953_v60, %v5866_v40  ;;  %4363 = vmatmul.msk.f32.gmra.mxu0 %vm7733_vm1, %v2212_v44  ;;  %v2261_v16 = vmul.f32 %v5896_v5, %v2260_v26  ;;  %v2240_v59 = vor.u32 1.1754944e-38, %v2239_v43  ;;  %v5999_v25 = vpop.xlane.xlu0 %2037  ;;  %3367 = vmatpush.msrb.mxu3 %v435_v10 }
 0x1df   : > { %v5984_v9 = vpop.eup %4590  ;;  %v2374_v54 = vand.u32 2147483648, %v5847_v38  ;;  %v2316_v15 = vsel %vm5963_vm11, %v2315_v21, %v2311_v63  ;;  %vm2368_vm14 = vweird.f32 %v5847_v38  ;;  %vm2338_vm15 = vweird.f32 %v5843_v8 }
 0x1e0   : > { %2160 = vadd.xlane.f32.xlu2 %v5887_v29  ;;  %2166 = vadd.xlane.f32.xlu0 %v2165_v47  ;;  %v2372_v29 = vand.u32 2147483647, %v5847_v38  ;;  %v2342_v47 = vand.u32 2147483647, %v5843_v8  ;;  %4592 = vrcp.f32 %v5944_v3  ;;  %v2336_v58 = vmul.f32 %v5910_v46, %v2335_v13 }
 0x1e1   : > { %2175 = vadd.xlane.f32.xlu1 %v2174_v6  ;;  %4594 = vrcp.f32 %v5925_v32  ;;  %v2232_v56 = vadd.f32 %v5876_v52, %v2231_v61  ;;  %vm2234_vm2 = vweird.f32 %v5876_v52  ;;  %v2366_v26 = vmul.f32 %v5920_v11, %v2365_v17 }
 0x1e2   : > { %v2290_v43 = vsub.f32 1.0, %v2289_v22  ;;  %v2394_v14 = vmul.f32 %v5984_v9, %v5913_v0  ;;  %vm2235_vm3 = vmor %vm2233_vm13, %vm2234_vm2  ;;  %v2237_v21 = vand.u32 2147483647, %v5814_v1  ;;  %4596 = vrcp.f32 %v5995_v57 }
 0x1e3   : > { %v2236_v44 = vsel %vm2235_vm3, %v5876_v52, %v2232_v56  ;;  %v2262_v6 = vadd.f32 %v5896_v5, %v2261_v16  ;;  %vm2264_vm4 = vweird.f32 %v5896_v5  ;;  %v6013_v63 = vpop.xlane.xlu2 %2031  ;;  %vm6015_vm5 = vcmp.eq.f32.partialorder %v2372_v29, 8.507059e+37 }
 0x1e4   : > { %vm2339_vm6 = vweird.f32 %v5910_v46  ;;  %v2344_v13 = vand.u32 2147483648, %v5843_v8  ;;  %vm2238_vm7 = vcmp.eq.f32.partialorder %v2237_v21, 8.507059e+37  ;;  %vm6023_vm8 = vmor %vm2263_vm12, %vm2264_vm4  ;;  %v2267_v52 = vand.u32 2147483647, %v5777_v24 }
 0x1e5   : > { %v2337_v45 = vadd.f32 %v5910_v46, %v2336_v58  ;;  %v2241_v17 = vsel %vm2238_vm7, %v2240_v59, %v2236_v44  ;;  %v2266_v22 = vsel %vm6023_vm8, %v5896_v5, %v2262_v6  ;;  %v2317_v10 = vmul.f32 %v5341_v4, %v2316_v15  ;;  %vm6050_vm11 = vmor %vm2338_vm15, %vm2339_vm6  ;;  %v6097_v1 = vpop.xlane.xlu1 %2052 }
 0x1e6   : > { %v6034_v16 = vpop.eup %4592  ;;  %v2367_v29 = vadd.f32 %v5920_v11, %v2366_v26  ;;  %vm2369_vm9 = vweird.f32 %v5920_v11  ;;  %v2375_v56 = vor.u32 1.1754944e-38, %v2374_v54  ;;  %v2299_v24 = vand.u32 2147483648, %v5866_v40  ;;  %v6087_v21 = vpop.xlane.xlu0 %2043 }
 0x1e7   : > { %v6040_v59 = vpop.eup %4594  ;;  %v2291_v58 = vmul.f32 %v5953_v60, %v2290_v43  ;;  %v2395_v5 = vsub.f32 1.0, %v2394_v14  ;;  %v2242_v4 = vmul.f32 %v5355_v2, %v2241_v17  ;;  %vm2268_vm10 = vcmp.eq.f32.partialorder %v2267_v52, 8.507059e+37  ;;  %4370 = vmatmul.msk.f32.vlgmr.msrb.gmra.mxu0 %vm7733_vm1, %v2317_v10  ;;  %vm6066_vm13 = vmor %vm2368_vm14, %vm2369_vm9 }
 0x1e8   : > { %2181 = vadd.xlane.f32.xlu2 %v5930_v39  ;;  %2163 = vadd.xlane.f32.xlu0 %v5918_v48  ;;  %vm6054_vm12 = vcmp.eq.f32.partialorder %v2342_v47, 8.507059e+37  ;;  %v2345_v54 = vor.u32 1.1754944e-38, %v2344_v13  ;;  %4598 = vrcp.f32 %v5999_v25  ;;  %v2271_v2 = vsel %vm2268_vm10, %v5977_v51, %v2266_v22  ;;  %v6060_v15 = vpop.eup %4596 }
 0x1e9   : > { %2169 = vadd.xlane.f32.xlu1 %v5904_v62  ;;  %v2341_v62 = vsel %vm6050_vm11, %v5910_v46, %v2337_v45  ;;  %vm2293_vm15 = vweird.f32 %v5866_v40  ;;  %v2319_v51 = vmul.f32 %v6034_v16, %v5944_v3  ;;  %4365 = vmatmul.msk.f32.gmra.mxu1 %vm7733_vm1, %v2242_v4  ;;  %v2272_v47 = vmul.f32 %v5335_v19, %v2271_v2 }
 0x1ea   : > { %v2371_v38 = vsel %vm6066_vm13, %v5920_v11, %v2367_v29  ;;  %v2300_v26 = vor.u32 1.1754944e-38, %v2299_v24  ;;  %v2349_v43 = vmul.f32 %v6040_v59, %v5925_v32  ;;  %v2359_v14 = vand.u32 2147483648, %v5925_v32  ;;  %v438_v11 = vld [vmem:[%s5615_s24 + $0x88] sm:$0xff] }
 0x1eb   : > { %v2396_v46 = vmul.f32 %v5984_v9, %v2395_v5  ;;  %4367 = vmatmul.msk.f32.gmra.mxu2 %vm7733_vm1, %v2272_v47  ;;  %4600 = vrcp.f32 %v6013_v63  ;;  %v2292_v19 = vadd.f32 %v5953_v60, %v2291_v58  ;;  %vm2294_vm14 = vweird.f32 %v5953_v60  ;;  %3395 = vmatpush.msra.mxu0 %v438_v11  ;;  %v6112_v24 = vpop.xlane.xlu2 %2046  ;;  %v437_v58 = vld [vmem:[%s5615_s24 + $0x80] sm:$0xff] }
 0x1ec   : > { %v2346_v44 = vsel %vm6054_vm12, %v2345_v54, %v2341_v62  ;;  %v2402_v6 = vand.u32 2147483647, %v5913_v0  ;;  %v2424_v13 = vmul.f32 %v6060_v15, %v5995_v57  ;;  %vm6101_vm2 = vmor %vm2293_vm15, %vm2294_vm14  ;;  %v2297_v45 = vand.u32 2147483647, %v5866_v40 }
 0x1ed   : > { %v2376_v17 = vsel %vm6015_vm5, %v2375_v56, %v2371_v38  ;;  %v2404_v22 = vand.u32 2147483648, %v5913_v0  ;;  %v2320_v10 = vsub.f32 1.0, %v2319_v51  ;;  %v2296_v29 = vsel %vm6101_vm2, %v5953_v60, %v2292_v19  ;;  %3396 = vmatpush.msra.mxu0 %v437_v58  ;;  %v439_v58 = vld [vmem:[%s5615_s24 + $0x90] sm:$0xff] }
 0x1ee   : > { %v6115_v5 = vpop.eup %4598  ;;  %v2350_v4 = vsub.f32 1.0, %v2349_v43  ;;  %vm2399_vm3 = vweird.f32 %v5984_v9  ;;  %v2329_v40 = vand.u32 2147483648, %v5944_v3  ;;  %vm2298_vm4 = vcmp.eq.f32.partialorder %v2297_v45, 8.507059e+37  ;;  %v442_v43 = vld [vmem:[%s5615_s24 + $0xa8] sm:$0xff] }
 0x1ef   : > { %v2397_v61 = vadd.f32 %v5984_v9, %v2396_v46  ;;  %4602 = vrcp.f32 %v6097_v1  ;;  %v2301_v56 = vsel %vm2298_vm4, %v2300_v26, %v2296_v29  ;;  %v2347_v39 = vmul.f32 %v5359_v20, %v2346_v44  ;;  %v440_v26 = vld [vmem:[%s5615_s24 + $0x98] sm:$0xff]  ;;  %3453 = vmatpush.msra.mxu2 %v442_v43 }
 0x1f0   : > { %v2425_v60 = vsub.f32 1.0, %v2424_v13  ;;  %v2302_v48 = vmul.f32 %v5379_v55, %v2301_v56  ;;  %4604 = vrcp.f32 %v6112_v24  ;;  %vm2398_vm5 = vweird.f32 %v5913_v0  ;;  %3424 = vmatpush.msra.mxu1 %v440_v26 }
 0x1f1   : > { %v6124_v54 = vpop.eup %4600  ;;  %v2321_v2 = vmul.f32 %v6034_v16, %v2320_v10  ;;  %v6130_v8 = vmul.f32 %v6115_v5, %v5999_v25  ;;  %4372 = vmatmul.msk.f32.vlgmr.msrb.gmra.mxu1 %vm7733_vm1, %v2347_v39  ;;  %v2377_v20 = vmul.f32 %v5365_v7, %v2376_v17  ;;  %v2351_v55 = vmul.f32 %v6040_v59, %v2350_v4  ;;  %vm6138_vm7 = vmor %vm2398_vm5, %vm2399_vm3  ;;  %v441_v4 = vld [vmem:[%s5615_s24 + $0xa0] sm:$0xff] }
 0x1f2   : > { %vm2353_vm6 = vweird.f32 %v5925_v32  ;;  %v2360_v62 = vor.u32 1.1754944e-38, %v2359_v14  ;;  %vm6142_vm8 = vcmp.eq.f32.partialorder %v2402_v6, 8.507059e+37  ;;  %4369 = vmatmul.msk.f32.gmra.mxu3 %vm7733_vm1, %v2302_v48  ;;  %v2401_v7 = vsel %vm6138_vm7, %v5984_v9, %v2397_v61  ;;  %v6162_v6 = vpop.xlane.xlu0 %2055  ;;  %3425 = vmatpush.msra.mxu1 %v439_v58 }
 0x1f3   : > { %v2405_v47 = vor.u32 1.1754944e-38, %v2404_v22  ;;  %vm2323_vm9 = vweird.f32 %v5944_v3  ;;  %v2330_v38 = vor.u32 1.1754944e-38, %v2329_v40  ;;  %4374 = vmatmul.msk.f32.vlgmr.msrb.gmra.mxu2 %vm7733_vm1, %v2377_v20  ;;  %v2419_v14 = vand.u32 2147483648, %v5999_v25  ;;  %v6186_v39 = vpop.xlane.xlu2 %2058 }
 0x1f4   : > { %v2426_v46 = vmul.f32 %v6060_v15, %v2425_v60  ;;  %v2434_v19 = vand.u32 2147483648, %v5995_v57  ;;  %v2379_v11 = vmul.f32 %v6124_v54, %v6013_v63  ;;  %v2410_v44 = vsub.f32 1.0, %v6130_v8  ;;  %v6190_v60 = vpop.xlane.xlu1 %2049  ;;  %3454 = vmatpush.msra.mxu2 %v441_v4 }
 0x1f5   : > { %v6159_v9 = vpop.eup %4602  ;;  %v2322_v13 = vadd.f32 %v6034_v16, %v2321_v2  ;;  %vm2324_vm10 = vweird.f32 %v6034_v16  ;;  %v2327_v52 = vand.u32 2147483647, %v5944_v3  ;;  %v2406_v17 = vsel %vm6142_vm8, %v2405_v47, %v2401_v7 }
 0x1f6   : > { %v6167_v45 = vpop.eup %4604  ;;  %4606 = vrcp.f32 %v6087_v21  ;;  %vm2325_vm11 = vmor %vm2323_vm9, %vm2324_vm10  ;;  %v2352_v22 = vadd.f32 %v6040_v59, %v2351_v55  ;;  %vm2354_vm12 = vweird.f32 %v6040_v59  ;;  %vm2429_vm13 = vweird.f32 %v6060_v15 }
 0x1f7   : > { %v2326_v10 = vsel %vm2325_vm11, %v6034_v16, %v2322_v13  ;;  %vm2328_vm15 = vcmp.eq.f32.partialorder %v2327_v52, 8.507059e+37  ;;  %v2357_v29 = vand.u32 2147483647, %v5925_v32  ;;  %v2427_v40 = vadd.f32 %v6060_v15, %v2426_v46  ;;  %vm2355_vm14 = vmor %vm2353_vm6, %vm2354_vm12 }
 0x1f8   : > { %v2380_v61 = vsub.f32 1.0, %v2379_v11  ;;  %v2484_v3 = vmul.f32 %v6159_v9, %v6097_v1  ;;  %v2331_v56 = vsel %vm2328_vm15, %v2330_v38, %v2326_v10  ;;  %v2454_v16 = vmul.f32 %v6167_v45, %v6112_v24 }
 0x1f9   : > { %v2332_v48 = vmul.f32 %v5403_v31, %v2331_v56  ;;  %v2356_v2 = vsel %vm2355_vm14, %v6040_v59, %v2352_v22  ;;  %vm2358_vm2 = vcmp.eq.f32.partialorder %v2357_v29, 8.507059e+37  ;;  %vm2428_vm3 = vweird.f32 %v5995_v57  ;;  %v444_v22 = vld [vmem:[%s5615_s24 + $0xb8] sm:$0xff] }
 0x1fa   : > { %v2432_v8 = vand.u32 2147483647, %v5995_v57  ;;  %v2389_v32 = vand.u32 2147483648, %v6013_v63  ;;  %v2361_v20 = vsel %vm2358_vm2, %v2360_v62, %v2356_v2  ;;  %vm6199_vm4 = vmor %vm2428_vm3, %vm2429_vm13  ;;  %v2407_v59 = vmul.f32 %v5389_v12, %v2406_v17  ;;  %3482 = vmatpush.msra.mxu3 %v444_v22 }
 0x1fb   : > { %4371 = vmatmul.msk.f32.gmra.mxu0 %vm7733_vm1, %v2332_v48  ;;  %v2362_v31 = vmul.f32 %v5383_v30, %v2361_v20  ;;  %4608 = vrcp.f32 %v6186_v39  ;;  %vm2413_vm5 = vweird.f32 %v5999_v25  ;;  %v2431_v57 = vsel %vm6199_vm4, %v6060_v15, %v2427_v40  ;;  %v6253_v40 = vpop.xlane.xlu2 %2064  ;;  %v443_v48 = vld [vmem:[%s5615_s24 + $0xb0] sm:$0xff] }
 0x1fc   : > { %v6207_v0 = vpop.eup %4606  ;;  %v2381_v62 = vmul.f32 %v6124_v54, %v2380_v61  ;;  %v2485_v51 = vsub.f32 1.0, %v2484_v3  ;;  %v2411_v7 = vmul.f32 %v6115_v5, %v2410_v44  ;;  %v2420_v47 = vor.u32 1.1754944e-38, %v2419_v14  ;;  %4376 = vmatmul.msk.f32.vlgmr.msrb.gmra.mxu3 %vm7733_vm1, %v2407_v59  ;;  %v6223_v14 = vpop.xlane.xlu0 %2070  ;;  %v446_v59 = vld [vmem:[%s5615_s24 + $0xc8] sm:$0xff] }
 0x1fd   : > { %v2435_v38 = vor.u32 1.1754944e-38, %v2434_v19  ;;  %v2455_v30 = vsub.f32 1.0, %v2454_v16  ;;  %4373 = vmatmul.msk.f32.gmra.mxu1 %vm7733_vm1, %v2362_v31  ;;  %vm2433_vm6 = vcmp.eq.f32.partialorder %v2432_v8, 8.507059e+37  ;;  %vm2383_vm7 = vweird.f32 %v6013_v63  ;;  %v6256_v61 = vpop.xlane.xlu1 %2061  ;;  %3483 = vmatpush.msra.mxu3 %v443_v48 }
 0x1fe   : > { %v2390_v12 = vor.u32 1.1754944e-38, %v2389_v32  ;;  %v2449_v26 = vand.u32 2147483648, %v6087_v21  ;;  %v2439_v43 = vmul.f32 %v6207_v0, %v6087_v21  ;;  %vm2488_vm8 = vweird.f32 %v6097_v1  ;;  %3511 = vmatpush.msrb.mxu0 %v446_v59 }
 0x1ff   : > { %v2436_v15 = vsel %vm2433_vm6, %v2435_v38, %v2431_v57  ;;  %4610 = vrcp.f32 %v6162_v6  ;;  %v2486_v46 = vmul.f32 %v6159_v9, %v2485_v51  ;;  %v2382_v19 = vadd.f32 %v6124_v54, %v2381_v62  ;;  %v448_v57 = vld [vmem:[%s5615_s24 + $0xd8] sm:$0xff] }
 0x200   : > { %4612 = vrcp.f32 %v6190_v60  ;;  %vm2384_vm9 = vweird.f32 %v6124_v54  ;;  %v2456_v44 = vmul.f32 %v6167_v45, %v2455_v30  ;;  %v2387_v52 = vand.u32 2147483647, %v6013_v63  ;;  %3540 = vmatpush.msrb.mxu1 %v448_v57 }
 0x201   : > { %v6229_v11 = vpop.eup %4608  ;;  %vm6232_vm10 = vmor %vm2383_vm7, %vm2384_vm9  ;;  %v2412_v17 = vadd.f32 %v6115_v5, %v2411_v7  ;;  %vm2414_vm11 = vweird.f32 %v6115_v5  ;;  %v2492_v10 = vand.u32 2147483647, %v6097_v1  ;;  %v2417_v63 = vand.u32 2147483647, %v5999_v25 }
 0x202   : > { %v2514_v29 = vmul.f32 %v6229_v11, %v6186_v39  ;;  %v2386_v58 = vsel %vm6232_vm10, %v6124_v54, %v2382_v19  ;;  %vm6248_vm12 = vmor %vm2413_vm5, %vm2414_vm11  ;;  %vm2489_vm13 = vweird.f32 %v6159_v9  ;;  %vm2388_vm15 = vcmp.eq.f32.partialorder %v2387_v52, 8.507059e+37 }
 0x203   : > { %v2416_v54 = vsel %vm6248_vm12, %v6115_v5, %v2412_v17  ;;  %v2437_v3 = vmul.f32 %v5413_v23, %v2436_v15  ;;  %v2440_v56 = vsub.f32 1.0, %v2439_v43  ;;  %v2487_v16 = vadd.f32 %v6159_v9, %v2486_v46  ;;  %vm6281_vm3 = vmor %vm2488_vm8, %vm2489_vm13 }
 0x204   : > { %vm2459_vm14 = vweird.f32 %v6167_v45  ;;  %v2391_v25 = vsel %vm2388_vm15, %v2390_v12, %v2386_v58  ;;  %v2457_v8 = vadd.f32 %v6167_v45, %v2456_v44  ;;  %vm2418_vm2 = vcmp.eq.f32.partialorder %v2417_v63, 8.507059e+37  ;;  %v6311_v30 = vpop.xlane.xlu0 %2082 }
 0x205   : > { %v6265_v2 = vpop.eup %4610  ;;  %v2392_v32 = vmul.f32 %v5427_v33, %v2391_v25  ;;  %4378 = vmatmul.msk.f32.vlgmr.msra.gmra.mxu0 %vm7733_vm1, %v2437_v3  ;;  %4614 = vrcp.f32 %v6253_v40  ;;  %v2494_v5 = vand.u32 2147483648, %v6097_v1  ;;  %v2464_v20 = vand.u32 2147483648, %v6112_v24  ;;  %v6324_v22 = vpop.xlane.xlu1 %2067 }
 0x206   : > { %v6271_v23 = vpop.eup %4612  ;;  %v2515_v55 = vsub.f32 1.0, %v2514_v29  ;;  %v2421_v31 = vsel %vm2418_vm2, %v2420_v47, %v2416_v54  ;;  %vm2458_vm4 = vweird.f32 %v6112_v24  ;;  %v2462_v62 = vand.u32 2147483647, %v6112_v24  ;;  %v6336_v54 = vpop.xlane.xlu2 %2076 }
 0x207   : > { %4616 = vrcp.f32 %v6223_v14  ;;  %4375 = vmatmul.msk.f32.gmra.mxu2 %vm7733_vm1, %v2392_v32  ;;  %v2422_v51 = vmul.f32 %v5407_v37, %v2421_v31  ;;  %vm2443_vm5 = vweird.f32 %v6087_v21  ;;  %vm6293_vm6 = vmor %vm2458_vm4, %vm2459_vm14  ;;  %v6299_v7 = vmul.f32 %v6265_v2, %v6162_v6  ;;  %v447_v32 = vld [vmem:[%s5615_s24 + $0xd0] sm:$0xff] }
 0x208   : > { %v2441_v24 = vmul.f32 %v6207_v0, %v2440_v56  ;;  %v2491_v37 = vsel %vm6281_vm3, %v6159_v9, %v2487_v16  ;;  %v2461_v47 = vsel %vm6293_vm6, %v6167_v45, %v2457_v8  ;;  %v2469_v38 = vmul.f32 %v6271_v23, %v6190_v60  ;;  %3541 = vmatpush.msrb.mxu1 %v447_v32 }
 0x209   : > { %4377 = vmatmul.msk.f32.gmra.mxu3 %vm7733_vm1, %v2422_v51  ;;  %v2450_v12 = vor.u32 1.1754944e-38, %v2449_v26  ;;  %v2495_v15 = vor.u32 1.1754944e-38, %v2494_v5  ;;  %v2465_v43 = vor.u32 1.1754944e-38, %v2464_v20  ;;  %v2516_v46 = vmul.f32 %v6229_v11, %v2515_v55  ;;  %v452_v5 = vld [vmem:[%s5615_s24 + $0xf8] sm:$0xff] }
 0x20a   : > { %vm2493_vm7 = vcmp.eq.f32.partialorder %v2492_v10, 8.507059e+37  ;;  %vm2463_vm8 = vcmp.eq.f32.partialorder %v2462_v62, 8.507059e+37  ;;  %v2509_v9 = vand.u32 2147483648, %v6162_v6  ;;  %v2479_v45 = vand.u32 2147483648, %v6190_v60  ;;  %3598 = vmatpush.msrb.mxu3 %v452_v5 }
 0x20b   : > { %v6316_v19 = vpop.eup %4614  ;;  %v2496_v44 = vsel %vm2493_vm7, %v2495_v15, %v2491_v37  ;;  %v2466_v13 = vsel %vm2463_vm8, %v2465_v43, %v2461_v47  ;;  %v2500_v52 = vsub.f32 1.0, %v6299_v7  ;;  %4618 = vrcp.f32 %v6256_v61 }
 0x20c   : > { %v2470_v26 = vsub.f32 1.0, %v2469_v38  ;;  %v2442_v29 = vadd.f32 %v6207_v0, %v2441_v24  ;;  %vm2444_vm9 = vweird.f32 %v6207_v0  ;;  %v2447_v10 = vand.u32 2147483647, %v6087_v21  ;;  %v445_v21 = vld [vmem:[%s5615_s24 + $0xc0] sm:$0xff]  ;;  %v6369_v57 = vpop.xlane.xlu0 %2088 }
 0x20d   : > { %v6322_v17 = vpop.eup %4616  ;;  %v2517_v58 = vadd.f32 %v6229_v11, %v2516_v46  ;;  %vm2519_vm10 = vweird.f32 %v6229_v11  ;;  %v2522_v4 = vand.u32 2147483647, %v6186_v39  ;;  %v2544_v63 = vmul.f32 %v6316_v19, %v6253_v40  ;;  %vm2445_vm11 = vmor %vm2443_vm5, %vm2444_vm9  ;;  %3512 = vmatpush.msrb.mxu0 %v445_v21  ;;  %v6388_v46 = vpop.xlane.xlu1 %2079 }
 0x20e   : > { %v2446_v3 = vsel %vm2445_vm11, %v6207_v0, %v2442_v29  ;;  %vm2448_vm12 = vcmp.eq.f32.partialorder %v2447_v10, 8.507059e+37  ;;  %v2467_v56 = vmul.f32 %v5451_v27, %v2466_v13  ;;  %v2497_v16 = vmul.f32 %v5431_v42, %v2496_v44 }
 0x20f   : > { %v2524_v25 = vand.u32 2147483648, %v6186_v39  ;;  %v2574_v48 = vmul.f32 %v6322_v17, %v6223_v14  ;;  %4620 = vrcp.f32 %v6311_v30  ;;  %v2451_v8 = vsel %vm2448_vm12, %v2450_v12, %v2446_v3  ;;  %v449_v3 = vld [vmem:[%s5615_s24 + $0xe0] sm:$0xff] }
 0x210   : > { %vm2518_vm13 = vweird.f32 %v6186_v39  ;;  %v2452_v0 = vmul.f32 %v5437_v28, %v2451_v8  ;;  %4380 = vmatmul.msk.f32.vlgmr.msra.gmra.mxu1 %vm7733_vm1, %v2467_v56  ;;  %4382 = vmatmul.msk.f32.vlgmr.msra.gmra.mxu2 %vm7733_vm1, %v2497_v16  ;;  %4622 = vrcp.f32 %v6336_v54  ;;  %vm2503_vm15 = vweird.f32 %v6162_v6  ;;  %v450_v28 = vld [vmem:[%s5615_s24 + $0xe8] sm:$0xff]  ;;  %v451_v56 = vld [vmem:[%s5615_s24 + $0xf0] sm:$0xff] }
 0x211   : > { %v6352_v42 = vpop.eup %4618  ;;  %v2471_v27 = vmul.f32 %v6271_v23, %v2470_v26  ;;  %vm2473_vm14 = vweird.f32 %v6190_v60  ;;  %vm6359_vm2 = vmor %vm2518_vm13, %vm2519_vm10  ;;  %v2510_v20 = vor.u32 1.1754944e-38, %v2509_v9  ;;  %v2480_v55 = vor.u32 1.1754944e-38, %v2479_v45  ;;  %3569 = vmatpush.msrb.mxu2 %v450_v28  ;;  %3599 = vmatpush.msrb.mxu3 %v451_v56 }
 0x212   : > { %v2521_v31 = vsel %vm6359_vm2, %v6229_v11, %v2517_v58  ;;  %v2545_v59 = vsub.f32 1.0, %v2544_v63  ;;  %4379 = vmatmul.msk.f32.gmra.mxu0 %vm7733_vm1, %v2452_v0  ;;  %v2501_v33 = vmul.f32 %v6265_v2, %v2500_v52  ;;  %vm2523_vm3 = vcmp.eq.f32.partialorder %v2522_v4, 8.507059e+37 }
 0x213   : > { %v2525_v62 = vor.u32 1.1754944e-38, %v2524_v25  ;;  %v2575_v51 = vsub.f32 1.0, %v2574_v48  ;;  %v2582_v1 = vand.u32 2147483647, %v6223_v14  ;;  %v2584_v7 = vand.u32 2147483648, %v6223_v14  ;;  %3570 = vmatpush.msrb.mxu2 %v449_v3 }
 0x214   : > { %v2529_v24 = vmul.f32 %v6352_v42, %v6256_v61  ;;  %v2539_v11 = vand.u32 2147483648, %v6256_v61  ;;  %4624 = vrcp.f32 %v6369_v57  ;;  %v2472_v38 = vadd.f32 %v6271_v23, %v2471_v27 }
 0x215   : > { %v6377_v37 = vpop.eup %4620  ;;  %v2526_v47 = vsel %vm2523_vm3, %v2525_v62, %v2521_v31  ;;  %vm2474_vm4 = vweird.f32 %v6271_v23  ;;  %vm2578_vm5 = vweird.f32 %v6223_v14  ;;  %v2546_v15 = vmul.f32 %v6316_v19, %v2545_v59 }
 0x216   : > { %v6382_v12 = vpop.eup %4622  ;;  %v2552_v43 = vand.u32 2147483647, %v6253_v40  ;;  %4626 = vrcp.f32 %v6324_v22  ;;  %vm2475_vm6 = vmor %vm2473_vm14, %vm2474_vm4  ;;  %v2477_v9 = vand.u32 2147483647, %v6190_v60  ;;  %v2576_v45 = vmul.f32 %v6322_v17, %v2575_v51 }
 0x217   : > { %v2604_v44 = vmul.f32 %v6382_v12, %v6336_v54  ;;  %v2476_v13 = vsel %vm2475_vm6, %v6271_v23, %v2472_v38  ;;  %v2502_v52 = vadd.f32 %v6265_v2, %v2501_v33  ;;  %vm2504_vm8 = vweird.f32 %v6265_v2 }
 0x218   : > { %vm2478_vm7 = vcmp.eq.f32.partialorder %v2477_v9, 8.507059e+37  ;;  %v2507_v26 = vand.u32 2147483647, %v6162_v6  ;;  %v2527_v29 = vmul.f32 %v5475_v50, %v2526_v47  ;;  %v2530_v10 = vsub.f32 1.0, %v2529_v24  ;;  %vm2505_vm10 = vmor %vm2503_vm15, %vm2504_vm8  ;;  %v6410_v50 = vpop.xlane.xlu2 %2073 }
 0x219   : > { %vm2549_vm9 = vweird.f32 %v6316_v19  ;;  %v2634_v60 = vmul.f32 %v6377_v37, %v6311_v30  ;;  %v2481_v58 = vsel %vm2478_vm7, %v2480_v55, %v2476_v13  ;;  %v2547_v23 = vadd.f32 %v6316_v19, %v2546_v15  ;;  %v454_v55 = vld [vmem:[%s5615_s24 + $0x108] sm:$0xff]  ;;  %v453_v15 = vld [vmem:[%s5615_s24 + $0x100] sm:$0xff] }
 0x21a   : > { %v2482_v4 = vmul.f32 %v5461_v36, %v2481_v58  ;;  %v2506_v63 = vsel %vm2505_vm10, %v6265_v2, %v2502_v52  ;;  %vm2508_vm11 = vcmp.eq.f32.partialorder %v2507_v26, 8.507059e+37  ;;  %4384 = vmatmul.msk.f32.vlgmr.msra.gmra.mxu3 %vm7733_vm1, %v2527_v29  ;;  %v6414_v16 = vpop.eup %4624  ;;  %vm2579_vm12 = vweird.f32 %v6322_v17  ;;  %3627 = vmatpush.msra.mxu0 %v454_v55  ;;  %v458_v55 = vld [vmem:[%s5615_s24 + $0x128] sm:$0xff] }
 0x21b   : > { %vm2533_vm13 = vweird.f32 %v6256_v61  ;;  %v2554_v6 = vand.u32 2147483648, %v6253_v40  ;;  %v2511_v25 = vsel %vm2508_vm11, %v2510_v20, %v2506_v63  ;;  %v2577_v2 = vadd.f32 %v6322_v17, %v2576_v45  ;;  %v6446_v20 = vpop.xlane.xlu0 %2100  ;;  %vm6453_vm4 = vmor %vm2578_vm5, %vm2579_vm12  ;;  %3685 = vmatpush.msra.mxu2 %v458_v55 }
 0x21c   : > { %v6419_v36 = vpop.eup %4626  ;;  %vm2548_vm15 = vweird.f32 %v6253_v40  ;;  %v2605_v48 = vsub.f32 1.0, %v2604_v44  ;;  %4381 = vmatmul.msk.f32.gmra.mxu1 %vm7733_vm1, %v2482_v4  ;;  %v2512_v8 = vmul.f32 %v5455_v49, %v2511_v25  ;;  %vm6425_vm14 = vcmp.eq.f32.partialorder %v2582_v1, 8.507059e+37  ;;  %3628 = vmatpush.msra.mxu0 %v453_v15 }
 0x21d   : > { %v2585_v32 = vor.u32 1.1754944e-38, %v2584_v7  ;;  %v2531_v0 = vmul.f32 %v6352_v42, %v2530_v10  ;;  %vm6432_vm2 = vmor %vm2548_vm15, %vm2549_vm9  ;;  %v2635_v39 = vsub.f32 1.0, %v2634_v60  ;;  %v2540_v40 = vor.u32 1.1754944e-38, %v2539_v11  ;;  %v6468_v7 = vpop.xlane.xlu1 %2094 }
 0x21e   : > { %v2551_v28 = vsel %vm6432_vm2, %v6316_v19, %v2547_v23  ;;  %vm6439_vm3 = vcmp.eq.f32.partialorder %v2552_v43, 8.507059e+37  ;;  %v2664_v5 = vmul.f32 %v6414_v16, %v6369_v57  ;;  %4383 = vmatmul.msk.f32.gmra.mxu2 %vm7733_vm1, %v2512_v8  ;;  %v2555_v19 = vor.u32 1.1754944e-38, %v2554_v6  ;;  %v457_v23 = vld [vmem:[%s5615_s24 + $0x120] sm:$0xff] }
 0x21f   : > { %v2642_v59 = vand.u32 2147483647, %v6311_v30  ;;  %v2644_v33 = vand.u32 2147483648, %v6311_v30  ;;  %v2559_v62 = vmul.f32 %v6419_v36, %v6324_v22  ;;  %v2581_v51 = vsel %vm6453_vm4, %v6322_v17, %v2577_v2  ;;  %3686 = vmatpush.msra.mxu2 %v457_v23 }
 0x220   : > { %vm2638_vm6 = vweird.f32 %v6311_v30  ;;  %v2569_v14 = vand.u32 2147483648, %v6324_v22  ;;  %v2606_v1 = vmul.f32 %v6382_v12, %v2605_v48  ;;  %4628 = vrcp.f32 %v6388_v46  ;;  %v6489_v26 = vpop.xlane.xlu2 %2085 }
 0x221   : > { %v2556_v24 = vsel %vm6439_vm3, %v2555_v19, %v2551_v28  ;;  %v2636_v11 = vmul.f32 %v6377_v37, %v2635_v39  ;;  %4630 = vrcp.f32 %v6410_v50  ;;  %v2532_v47 = vadd.f32 %v6352_v42, %v2531_v0 }
 0x222   : > { %v2665_v17 = vsub.f32 1.0, %v2664_v5  ;;  %4632 = vrcp.f32 %v6446_v20  ;;  %vm2534_vm5 = vweird.f32 %v6352_v42  ;;  %v2537_v38 = vand.u32 2147483647, %v6256_v61  ;;  %v456_v5 = vld [vmem:[%s5615_s24 + $0x118] sm:$0xff] }
 0x223   : > { %v2586_v43 = vsel %vm6425_vm14, %v2585_v32, %v2581_v51  ;;  %v2560_v9 = vsub.f32 1.0, %v2559_v62  ;;  %v2612_v45 = vand.u32 2147483647, %v6336_v54  ;;  %4634 = vrcp.f32 %v6468_v7  ;;  %vm2535_vm7 = vmor %vm2533_vm13, %vm2534_vm5  ;;  %v6521_v25 = vpop.xlane.xlu0 %2091  ;;  %3656 = vmatpush.msra.mxu1 %v456_v5 }
 0x224   : > { %v2607_v44 = vadd.f32 %v6382_v12, %v2606_v1  ;;  %vm2609_vm8 = vweird.f32 %v6382_v12  ;;  %v2536_v13 = vsel %vm2535_vm7, %v6352_v42, %v2532_v47  ;;  %v2557_v52 = vmul.f32 %v5499_v18, %v2556_v24  ;;  %v7874_v1 = vld [vmem:[#allocation27_spill] sm:$0xff] }
 0x225   : > { %vm2639_vm9 = vweird.f32 %v6377_v37  ;;  %vm2608_vm10 = vweird.f32 %v6336_v54  ;;  %v2614_v29 = vand.u32 2147483648, %v6336_v54  ;;  %vm2538_vm11 = vcmp.eq.f32.partialorder %v2537_v38, 8.507059e+37  ;;  %v6544_v0 = vpop.xlane.xlu1 %2106 }
 0x226   : > { %v6494_v61 = vpop.eup %4628  ;;  %v2637_v10 = vadd.f32 %v6377_v37, %v2636_v11  ;;  %v2666_v60 = vmul.f32 %v6414_v16, %v2665_v17  ;;  %v2541_v58 = vsel %vm2538_vm11, %v2540_v40, %v2536_v13  ;;  %4386 = vmatmul.msk.f32.vlgmr.msrb.gmra.mxu0 %vm7733_vm1, %v2557_v52  ;;  %v2587_v18 = vmul.f32 %v5485_v35, %v2586_v43  ;;  %vm6509_vm13 = vmor %vm2608_vm10, %vm2609_vm8 }
 0x227   : > { %v6500_v42 = vpop.eup %4630  ;;  %vm6502_vm12 = vcmp.eq.f32.partialorder %v2642_v59, 8.507059e+37  ;;  %v2645_v4 = vor.u32 1.1754944e-38, %v2644_v33  ;;  %v2561_v54 = vmul.f32 %v6419_v36, %v2560_v9  ;;  %v2542_v3 = vmul.f32 %v5479_v53, %v2541_v58  ;;  %vm6529_vm2 = vmor %vm2638_vm6, %vm2639_vm9 }
 0x228   : > { %v6514_v56 = vpop.eup %4632  ;;  %vm2563_vm15 = vweird.f32 %v6324_v22  ;;  %v2570_v35 = vor.u32 1.1754944e-38, %v2569_v14  ;;  %v2611_v6 = vsel %vm6509_vm13, %v6382_v12, %v2607_v44  ;;  %vm2613_vm14 = vcmp.eq.f32.partialorder %v2612_v45, 8.507059e+37  ;;  %4388 = vmatmul.msk.f32.vlgmr.msrb.gmra.mxu1 %vm7733_vm1, %v2587_v18  ;;  %v6581_v11 = vpop.xlane.xlu2 %2103  ;;  %v7876_v44 = vld [vmem:[#allocation26_spill] sm:$0xff]  ;;  %v455_v18 = vld [vmem:[%s5615_s24 + $0x110] sm:$0xff] }
 0x229   : > { %v6523_v2 = vpop.eup %4634  ;;  %v2615_v48 = vor.u32 1.1754944e-38, %v2614_v29  ;;  %vm2668_vm3 = vweird.f32 %v6369_v57  ;;  %v2672_v12 = vand.u32 2147483647, %v6369_v57  ;;  %v2674_v8 = vand.u32 2147483648, %v6369_v57  ;;  %4385 = vmatmul.msk.f32.gmra.mxu3 %vm7733_vm1, %v2542_v3  ;;  %3657 = vmatpush.msra.mxu1 %v455_v18  ;;  %v460_v3 = vld [vmem:[%s5615_s24 + $0x138] sm:$0xff] }
 0x22a   : > { %v2641_v21 = vsel %vm6529_vm2, %v6377_v37, %v2637_v10  ;;  %v2667_v30 = vadd.f32 %v6414_v16, %v2666_v60  ;;  %vm2669_vm4 = vweird.f32 %v6414_v16  ;;  %v2619_v32 = vmul.f32 %v6494_v61, %v6388_v46  ;;  %3714 = vmatpush.msra.mxu3 %v460_v3 }
 0x22b   : > { %v2616_v27 = vsel %vm2613_vm14, %v2615_v48, %v2611_v6  ;;  %v2589_v39 = vmul.f32 %v6500_v42, %v6410_v50  ;;  %v2724_v40 = vmul.f32 %v6514_v56, %v6446_v20  ;;  %v2562_v28 = vadd.f32 %v6419_v36, %v2561_v54  ;;  %vm6572_vm7 = vmor %vm2668_vm3, %vm2669_vm4  ;;  %v6599_v58 = vpop.xlane.xlu0 %2109 }
 0x22c   : > { %v2694_v37 = vmul.f32 %v6523_v2, %v6468_v7  ;;  %4636 = vrcp.f32 %v6521_v25  ;;  %vm2564_vm6 = vweird.f32 %v6419_v36  ;;  %v2567_v49 = vand.u32 2147483647, %v6324_v22 }
 0x22d   : > { %v2646_v31 = vsel %vm6502_vm12, %v2645_v4, %v2641_v21  ;;  %v2675_v19 = vor.u32 1.1754944e-38, %v2674_v8  ;;  %v2629_v59 = vand.u32 2147483648, %v6388_v46  ;;  %4638 = vrcp.f32 %v6544_v0  ;;  %vm6564_vm5 = vmor %vm2563_vm15, %vm2564_vm6  ;;  %v6615_v48 = vpop.xlane.xlu1 %2097  ;;  %v7877_v8 = vld [vmem:[#allocation28_spill] sm:$0xff] }
 0x22e   : > { %v2620_v51 = vsub.f32 1.0, %v2619_v32  ;;  %v2599_v14 = vand.u32 2147483648, %v6410_v50  ;;  %v2566_v22 = vsel %vm6564_vm5, %v6419_v36, %v2562_v28  ;;  %v2617_v24 = vmul.f32 %v7874_v1, %v2616_v27  ;;  %v7875_v36 = vld [vmem:[#allocation25_spill] sm:$0xff]  ;;  %v7895_v27 = vld [vmem:[#allocation32_spill] sm:$0xff] }
 0x22f   : > { %v2671_v47 = vsel %vm6572_vm7, %v6414_v16, %v2667_v30  ;;  %v2590_v57 = vsub.f32 1.0, %v2589_v39  ;;  %4640 = vrcp.f32 %v6489_v26  ;;  %vm2568_vm8 = vcmp.eq.f32.partialorder %v2567_v49, 8.507059e+37 }
 0x230   : > { %v2725_v17 = vsub.f32 1.0, %v2724_v40  ;;  %v2695_v38 = vsub.f32 1.0, %v2694_v37  ;;  %v2571_v15 = vsel %vm2568_vm8, %v2570_v35, %v2566_v22  ;;  %4390 = vmatmul.msk.f32.vlgmr.msrb.gmra.mxu2 %vm7733_vm1, %v2617_v24  ;;  %v2647_v43 = vmul.f32 %v7875_v36, %v2646_v31  ;;  %v6650_v33 = vpop.xlane.xlu2 %2118 }
 0x231   : > { %vm2673_vm9 = vcmp.eq.f32.partialorder %v2672_v12, 8.507059e+37  ;;  %v2732_v9 = vand.u32 2147483647, %v6446_v20  ;;  %v2734_v45 = vand.u32 2147483648, %v6446_v20  ;;  %v2572_v16 = vmul.f32 %v7876_v44, %v2571_v15  ;;  %v7888_v44 = vld [vmem:[#allocation30_spill] sm:$0xff] }
 0x232   : > { %v6592_v13 = vpop.eup %4636  ;;  %v2676_v52 = vsel %vm2673_vm9, %v2675_v19, %v2671_v47  ;;  %v6594_v29 = vor.u32 1.1754944e-38, %v2629_v59  ;;  %v2702_v10 = vand.u32 2147483647, %v6468_v7  ;;  %v2704_v60 = vand.u32 2147483648, %v6468_v7  ;;  %4392 = vmatmul.msk.f32.vlgmr.msrb.gmra.mxu3 %vm7733_vm1, %v2647_v43 }
 0x233   : > { %v6603_v4 = vpop.eup %4638  ;;  %vm2623_vm10 = vweird.f32 %v6388_v46  ;;  %v2591_v54 = vmul.f32 %v6500_v42, %v2590_v57  ;;  %vm2593_vm11 = vweird.f32 %v6410_v50  ;;  %v2600_v63 = vor.u32 1.1754944e-38, %v2599_v14  ;;  %4387 = vmatmul.msk.f32.gmra.mxu0 %vm7733_vm1, %v2572_v16  ;;  %v459_v57 = vld [vmem:[%s5615_s24 + $0x130] sm:$0xff]  ;;  %v6692_v43 = vpop.xlane.xlu0 %2130 }
 0x234   : > { %vm2728_vm12 = vweird.f32 %v6446_v20  ;;  %v2621_v35 = vmul.f32 %v6494_v61, %v2620_v51  ;;  %v2726_v6 = vmul.f32 %v6514_v56, %v2725_v17  ;;  %v2696_v53 = vmul.f32 %v6523_v2, %v2695_v38  ;;  %3715 = vmatpush.msra.mxu3 %v459_v57 }
 0x235   : > { %vm2698_vm13 = vweird.f32 %v6468_v7  ;;  %v6617_v12 = vpop.eup %4640  ;;  %v2677_v21 = vmul.f32 %v7877_v8, %v2676_v52  ;;  %vm2729_vm15 = vweird.f32 %v6514_v56  ;;  %v2735_v30 = vor.u32 1.1754944e-38, %v2734_v45  ;;  %v6708_v18 = vpop.xlane.xlu1 %2112 }
 0x236   : > { %v2679_v32 = vmul.f32 %v6592_v13, %v6521_v25  ;;  %vm6623_vm14 = vcmp.eq.f32.partialorder %v2732_v9, 8.507059e+37  ;;  %vm2699_vm2 = vweird.f32 %v6523_v2  ;;  %vm6628_vm3 = vcmp.eq.f32.partialorder %v2702_v10, 8.507059e+37  ;;  %vm6661_vm5 = vmor %vm2728_vm12, %vm2729_vm15 }
 0x237   : > { %v2705_v40 = vor.u32 1.1754944e-38, %v2704_v60  ;;  %v2659_v28 = vand.u32 2147483648, %v6489_v26  ;;  %v2754_v37 = vmul.f32 %v6603_v4, %v6544_v0  ;;  %4642 = vrcp.f32 %v6581_v11  ;;  %vm6674_vm8 = vmor %vm2698_vm13, %vm2699_vm2 }
 0x238   : > { %v2592_v49 = vadd.f32 %v6500_v42, %v2591_v54  ;;  %vm2594_vm4 = vweird.f32 %v6500_v42  ;;  %v2597_v5 = vand.u32 2147483647, %v6410_v50  ;;  %v2727_v55 = vadd.f32 %v6514_v56, %v2726_v6 }
 0x239   : > { %v2697_v31 = vadd.f32 %v6523_v2, %v2696_v53  ;;  %v2649_v19 = vmul.f32 %v6617_v12, %v6489_v26  ;;  %4644 = vrcp.f32 %v6615_v48  ;;  %vm6646_vm6 = vmor %vm2593_vm11, %vm2594_vm4  ;;  %v2680_v62 = vsub.f32 1.0, %v2679_v32 }
 0x23a   : > { %v2687_v51 = vand.u32 2147483647, %v6521_v25  ;;  %v2596_v14 = vsel %vm6646_vm6, %v6500_v42, %v2592_v49  ;;  %v2622_v22 = vadd.f32 %v6494_v61, %v2621_v35  ;;  %v6665_v1 = vor.u32 1.1754944e-38, %v2659_v28 }
 0x23b   : > { %v2689_v24 = vand.u32 2147483648, %v6521_v25  ;;  %v2762_v47 = vand.u32 2147483647, %v6544_v0  ;;  %vm2598_vm7 = vcmp.eq.f32.partialorder %v2597_v5, 8.507059e+37  ;;  %vm2683_vm9 = vweird.f32 %v6521_v25  ;;  %4394 = vmatmul.msk.f32.vlgmr.msra.gmra.mxu0 %vm7733_vm1, %v2677_v21  ;;  %v7910_v25 = vld [vmem:[#allocation3_spill] sm:$0xff] }
 0x23c   : > { %v2755_v20 = vsub.f32 1.0, %v2754_v37  ;;  %v2601_v17 = vsel %vm2598_vm7, %v2600_v63, %v2596_v14  ;;  %vm2624_vm11 = vweird.f32 %v6494_v61  ;;  %v2627_v38 = vand.u32 2147483647, %v6388_v46  ;;  %v7891_v63 = vld [vmem:[#allocation29_spill] sm:$0xff]  ;;  %v6737_v37 = vpop.xlane.xlu2 %2124 }
 0x23d   : > { %v2731_v15 = vsel %vm6661_vm5, %v6514_v56, %v2727_v55  ;;  %v2701_v7 = vsel %vm6674_vm8, %v6523_v2, %v2697_v31  ;;  %v2650_v36 = vsub.f32 1.0, %v2649_v19  ;;  %vm2653_vm12 = vweird.f32 %v6489_v26  ;;  %vm2625_vm13 = vmor %vm2623_vm10, %vm2624_vm11  ;;  %v6694_v9 = vpop.eup %4642 }
 0x23e   : > { %4646 = vrcp.f32 %v6650_v33  ;;  %v2681_v45 = vmul.f32 %v6592_v13, %v2680_v62  ;;  %v2602_v56 = vmul.f32 %v7888_v44, %v2601_v17  ;;  %v2626_v16 = vsel %vm2625_vm13, %v6494_v61, %v2622_v22 }
 0x23f   : > { %vm2628_vm15 = vcmp.eq.f32.partialorder %v2627_v38, 8.507059e+37  ;;  %v6699_v2 = vpop.eup %4644  ;;  %vm6701_vm2 = vcmp.eq.f32.partialorder %v2687_v51, 8.507059e+37  ;;  %v2690_v46 = vor.u32 1.1754944e-38, %v2689_v24  ;;  %v2764_v10 = vand.u32 2147483648, %v6544_v0 }
 0x240   : > { %4648 = vrcp.f32 %v6599_v58  ;;  %v2631_v60 = vsel %vm2628_vm15, %v6594_v29, %v2626_v16  ;;  %v2736_v23 = vsel %vm6623_vm14, %v2735_v30, %v2731_v15  ;;  %v2706_v61 = vsel %vm6628_vm3, %v2705_v40, %v2701_v7  ;;  %4389 = vmatmul.msk.f32.gmra.mxu1 %vm7733_vm1, %v2602_v56  ;;  %v7894_v30 = vld [vmem:[#allocation31_spill] sm:$0xff]  ;;  %v7902_v56 = vld [vmem:[#allocation5_spill] sm:$0xff] }
 0x241   : > { %v2756_v54 = vmul.f32 %v6603_v4, %v2755_v20  ;;  %v2632_v3 = vmul.f32 %v7891_v63, %v2631_v60  ;;  %v2651_v35 = vmul.f32 %v6617_v12, %v2650_v36  ;;  %vm2758_vm10 = vweird.f32 %v6544_v0  ;;  %v6786_v20 = vpop.xlane.xlu0 %2121  ;;  %v462_v63 = vld [vmem:[%s5615_s24 + $0x148] sm:$0xff] }
 0x242   : > { %v2739_v29 = vmul.f32 %v6694_v9, %v6581_v11  ;;  %4650 = vrcp.f32 %v6692_v43  ;;  %v2682_v6 = vadd.f32 %v6592_v13, %v2681_v45  ;;  %vm2684_vm14 = vweird.f32 %v6592_v13  ;;  %3743 = vmatpush.msrb.mxu0 %v462_v63 }
 0x243   : > { %vm6724_vm3 = vcmp.eq.f32.partialorder %v2762_v47, 8.507059e+37  ;;  %v2709_v8 = vmul.f32 %v6699_v2, %v6615_v48  ;;  %4391 = vmatmul.msk.f32.gmra.mxu2 %vm7733_vm1, %v2632_v3  ;;  %4652 = vrcp.f32 %v6708_v18  ;;  %v2737_v32 = vmul.f32 %v7894_v30, %v2736_v23  ;;  %vm6749_vm6 = vmor %vm2683_vm9, %vm2684_vm14  ;;  %v7907_v23 = vld [vmem:[#allocation2_spill] sm:$0xff]  ;;  %v464_v3 = vld [vmem:[%s5615_s24 + $0x158] sm:$0xff] }
 0x244   : > { %v6732_v21 = vpop.eup %4646  ;;  %v2707_v39 = vmul.f32 %v7895_v27, %v2706_v61  ;;  %v2765_v40 = vor.u32 1.1754944e-38, %v2764_v10  ;;  %v2749_v28 = vand.u32 2147483648, %v6581_v11  ;;  %v2757_v49 = vadd.f32 %v6603_v4, %v2756_v54  ;;  %v6821_v54 = vpop.xlane.xlu1 %2133  ;;  %3772 = vmatpush.msrb.mxu1 %v464_v3  ;;  %v468_v30 = vld [vmem:[%s5615_s24 + $0x178] sm:$0xff]  ;;  %v7918_v10 = vld [vmem:[#allocation6_spill] sm:$0xff] }
 0x245   : > { %vm2759_vm4 = vweird.f32 %v6603_v4  ;;  %v2747_v5 = vand.u32 2147483647, %v6581_v11  ;;  %v2777_v55 = vand.u32 2147483647, %v6599_v58  ;;  %v2740_v59 = vsub.f32 1.0, %v2739_v29  ;;  %3830 = vmatpush.msrb.mxu3 %v468_v30 }
 0x246   : > { %v6743_v31 = vpop.eup %4648  ;;  %v2652_v62 = vadd.f32 %v6617_v12, %v2651_v35  ;;  %vm2654_vm5 = vweird.f32 %v6617_v12  ;;  %v2657_v51 = vand.u32 2147483647, %v6489_v26  ;;  %vm2743_vm7 = vweird.f32 %v6581_v11  ;;  %vm6775_vm9 = vmor %vm2758_vm10, %vm2759_vm4  ;;  %v466_v35 = vld [vmem:[%s5615_s24 + $0x168] sm:$0xff] }
 0x247   : > { %v2710_v14 = vsub.f32 1.0, %v2709_v8  ;;  %v2814_v22 = vmul.f32 %v6732_v21, %v6650_v33  ;;  %vm6761_vm8 = vmor %vm2653_vm12, %vm2654_vm5  ;;  %v2686_v50 = vsel %vm6749_vm6, %v6592_v13, %v2682_v6  ;;  %4654 = vrcp.f32 %v6737_v37  ;;  %3801 = vmatpush.msrb.mxu2 %v466_v35 }
 0x248   : > { %v6769_v24 = vpop.eup %4650  ;;  %v6779_v26 = vor.u32 1.1754944e-38, %v2749_v28  ;;  %v2779_v57 = vand.u32 2147483648, %v6599_v58  ;;  %v2717_v42 = vand.u32 2147483647, %v6615_v48  ;;  %v2656_v13 = vsel %vm6761_vm8, %v6617_v12, %v2652_v62  ;;  %4396 = vmatmul.msk.f32.vlgmr.msra.gmra.mxu1 %vm7733_vm1, %v2707_v39  ;;  %v461_v28 = vld [vmem:[%s5615_s24 + $0x140] sm:$0xff] }
 0x249   : > { %v6788_v17 = vpop.eup %4652  ;;  %v2761_v0 = vsel %vm6775_vm9, %v6603_v4, %v2757_v49  ;;  %v2769_v38 = vmul.f32 %v6743_v31, %v6599_v58  ;;  %vm2713_vm11 = vweird.f32 %v6615_v48  ;;  %v2719_v15 = vand.u32 2147483648, %v6615_v48  ;;  %3744 = vmatpush.msrb.mxu0 %v461_v28 }
 0x24a   : > { %v2691_v12 = vsel %vm6701_vm2, %v2690_v46, %v2686_v50  ;;  %v2741_v7 = vmul.f32 %v6694_v9, %v2740_v59  ;;  %vm2744_vm12 = vweird.f32 %v6694_v9  ;;  %v2784_v4 = vmul.f32 %v6788_v17, %v6708_v18 }
 0x24b   : > { %vm2658_vm13 = vcmp.eq.f32.partialorder %v2657_v51, 8.507059e+37  ;;  %v2711_v36 = vmul.f32 %v6699_v2, %v2710_v14  ;;  %v2815_v45 = vsub.f32 1.0, %v2814_v22  ;;  %4398 = vmatmul.msk.f32.vlgmr.msra.gmra.mxu2 %vm7733_vm1, %v2737_v32  ;;  %v2692_v16 = vmul.f32 %v7902_v56, %v2691_v12  ;;  %v463_v32 = vld [vmem:[%s5615_s24 + $0x150] sm:$0xff]  ;;  %v6854_v22 = vpop.xlane.xlu2 %2115 }
 0x24c   : > { %v2661_v44 = vsel %vm2658_vm13, %v6665_v1, %v2656_v13  ;;  %v2766_v52 = vsel %vm6724_vm3, %v2765_v40, %v2761_v0  ;;  %vm6810_vm15 = vcmp.eq.f32.partialorder %v2747_v5, 8.507059e+37  ;;  %vm6814_vm2 = vcmp.eq.f32.partialorder %v2717_v42, 8.507059e+37  ;;  %vm6848_vm3 = vmor %vm2743_vm7, %vm2744_vm12  ;;  %3773 = vmatpush.msrb.mxu1 %v463_v32  ;;  %v6873_v0 = vpop.xlane.xlu0 %2127  ;;  %v467_v56 = vld [vmem:[%s5615_s24 + $0x170] sm:$0xff] }
 0x24d   : > { %v2874_v1 = vmul.f32 %v6769_v24, %v6692_v43  ;;  %v2785_v60 = vsub.f32 1.0, %v2784_v4  ;;  %v2662_v61 = vmul.f32 %v7907_v23, %v2661_v44  ;;  %v6826_v29 = vpop.eup %4654  ;;  %v2770_v6 = vsub.f32 1.0, %v2769_v38  ;;  %4395 = vmatmul.msk.f32.gmra.mxu0 %vm7733_vm1, %v2692_v16  ;;  %v7913_v4 = vld [vmem:[#allocation7_spill] sm:$0xff]  ;;  %v465_v44 = vld [vmem:[%s5615_s24 + $0x160] sm:$0xff]  ;;  %3831 = vmatpush.msrb.mxu3 %v467_v56  ;;  %v6909_v23 = vpop.xlane.xlu1 %2142 }
 0x24e   : > { %v2720_v53 = vor.u32 1.1754944e-38, %v2719_v15  ;;  %v2794_v8 = vand.u32 2147483648, %v6708_v18  ;;  %4656 = vrcp.f32 %v6786_v20  ;;  %vm2789_vm10 = vweird.f32 %v6788_v17  ;;  %3802 = vmatpush.msrb.mxu2 %v465_v44 }
 0x24f   : > { %v2786_v27 = vmul.f32 %v6788_v17, %v2785_v60  ;;  %v2792_v39 = vand.u32 2147483647, %v6708_v18  ;;  %4393 = vmatmul.msk.f32.gmra.mxu3 %vm7733_vm1, %v2662_v61  ;;  %v2844_v40 = vmul.f32 %v6826_v29, %v6737_v37  ;;  %v2742_v49 = vadd.f32 %v6694_v9, %v2741_v7  ;;  %v7919_v61 = vld [vmem:[#allocation4_spill] sm:$0xff] }
 0x250   : > { %v2712_v5 = vadd.f32 %v6699_v2, %v2711_v36  ;;  %vm2714_vm14 = vweird.f32 %v6699_v2  ;;  %v2816_v19 = vmul.f32 %v6732_v21, %v2815_v45  ;;  %v2875_v62 = vsub.f32 1.0, %v2874_v1 }
 0x251   : > { %v2787_v51 = vadd.f32 %v6788_v17, %v2786_v27  ;;  %vm2788_vm4 = vweird.f32 %v6708_v18  ;;  %v2845_v14 = vsub.f32 1.0, %v2844_v40  ;;  %v2767_v50 = vmul.f32 %v7910_v25, %v2766_v52  ;;  %vm6866_vm8 = vmor %vm2713_vm11, %vm2714_vm14  ;;  %v476_v25 = vld [vmem:[%s5615_s24 + $0x1b8] sm:$0xff] }
 0x252   : > { %v2771_v47 = vmul.f32 %v6743_v31, %v2770_v6  ;;  %vm2773_vm6 = vweird.f32 %v6599_v58  ;;  %vm2774_vm5 = vweird.f32 %v6743_v31  ;;  %vm2790_vm7 = vmor %vm2788_vm4, %vm2789_vm10  ;;  %v2795_v11 = vor.u32 1.1754944e-38, %v2794_v8 }
 0x253   : > { %vm2819_vm9 = vweird.f32 %v6732_v21  ;;  %v2791_v42 = vsel %vm2790_vm7, %v6788_v17, %v2787_v51  ;;  %vm2793_vm12 = vcmp.eq.f32.partialorder %v2792_v39, 8.507059e+37  ;;  %v2846_v13 = vmul.f32 %v6826_v29, %v2845_v14  ;;  %vm6944_vm4 = vmor %vm2773_vm6, %vm2774_vm5  ;;  %v472_v51 = vld [vmem:[%s5615_s24 + $0x198] sm:$0xff]  ;;  %v474_v14 = vld [vmem:[%s5615_s24 + $0x1a8] sm:$0xff] }
 0x254   : > { %v6875_v38 = vpop.eup %4656  ;;  %v2817_v15 = vadd.f32 %v6732_v21, %v2816_v19  ;;  %v2796_v48 = vsel %vm2793_vm12, %v2795_v11, %v2791_v42  ;;  %v2746_v12 = vsel %vm6848_vm3, %v6694_v9, %v2742_v49  ;;  %v2716_v7 = vsel %vm6866_vm8, %v6699_v2, %v2712_v5  ;;  %3888 = vmatpush.msra.mxu1 %v472_v51 }
 0x255   : > { %v2876_v17 = vmul.f32 %v6769_v24, %v2875_v62  ;;  %v2797_v36 = vmul.f32 %v7913_v4, %v2796_v48  ;;  %v2847_v45 = vadd.f32 %v6826_v29, %v2846_v13  ;;  %vm2849_vm11 = vweird.f32 %v6826_v29  ;;  %v6974_v62 = vpop.xlane.xlu0 %2136  ;;  %3917 = vmatpush.msra.mxu2 %v474_v14  ;;  %v473_v14 = vld [vmem:[%s5615_s24 + $0x1a0] sm:$0xff] }
 0x256   : > { %vm6892_vm13 = vcmp.eq.f32.partialorder %v2777_v55, 8.507059e+37  ;;  %v2854_v9 = vand.u32 2147483648, %v6737_v37  ;;  %v2829_v2 = vmul.f32 %v6875_v38, %v6786_v20  ;;  %v2751_v52 = vsel %vm6810_vm15, %v6779_v26, %v2746_v12  ;;  %v7928_v12 = vld [vmem:[#allocation9_spill] sm:$0xff] }
 0x257   : > { %v2721_v1 = vsel %vm6814_vm2, %v2720_v53, %v2716_v7  ;;  %v2824_v60 = vand.u32 2147483648, %v6650_v33  ;;  %vm2848_vm10 = vweird.f32 %v6737_v37  ;;  %v2852_v55 = vand.u32 2147483647, %v6737_v37  ;;  %4400 = vmatmul.msk.f32.vlgmr.msra.gmra.mxu3 %vm7733_vm1, %v2767_v50  ;;  %4402 = vmatmul.msk.f32.vlgmr.msrb.gmra.mxu0 %vm7733_vm1, %v2797_v36 }
 0x258   : > { %4658 = vrcp.f32 %v6821_v54  ;;  %vm2818_vm15 = vweird.f32 %v6650_v33  ;;  %v2822_v26 = vand.u32 2147483647, %v6650_v33  ;;  %vm6916_vm2 = vmor %vm2848_vm10, %vm2849_vm11  ;;  %v2752_v37 = vmul.f32 %v7918_v10, %v2751_v52  ;;  %3946 = vmatpush.msra.mxu3 %v476_v25  ;;  %v469_v25 = vld [vmem:[%s5615_s24 + $0x180] sm:$0xff]  ;;  %3918 = vmatpush.msra.mxu2 %v473_v14 }
 0x259   : > { %v2722_v63 = vmul.f32 %v7919_v61, %v2721_v1  ;;  %v2772_v3 = vadd.f32 %v6743_v31, %v2771_v47  ;;  %vm6925_vm14 = vmor %vm2818_vm15, %vm2819_vm9  ;;  %v2877_v33 = vadd.f32 %v6769_v24, %v2876_v17  ;;  %vm2879_vm3 = vweird.f32 %v6769_v24 }
 0x25a   : > { %v2851_v6 = vsel %vm6916_vm2, %v6826_v29, %v2847_v45  ;;  %v2821_v53 = vsel %vm6925_vm14, %v6732_v21, %v2817_v15  ;;  %v2884_v8 = vand.u32 2147483648, %v6692_v43  ;;  %v2855_v30 = vor.u32 1.1754944e-38, %v2854_v9  ;;  %4399 = vmatmul.msk.f32.gmra.mxu2 %vm7733_vm1, %v2752_v37  ;;  %v6950_v21 = vpop.xlane.xlu2 %2154  ;;  %v7927_v15 = vld [vmem:[#allocation10_spill] sm:$0xff]  ;;  %v6999_v45 = vpop.xlane.xlu1 %2148 }
 0x25b   : > { %v2830_v32 = vsub.f32 1.0, %v2829_v2  ;;  %4397 = vmatmul.msk.f32.gmra.mxu1 %vm7733_vm1, %v2722_v63  ;;  %v2825_v29 = vor.u32 1.1754944e-38, %v2824_v60  ;;  %vm2878_vm7 = vweird.f32 %v6692_v43  ;;  %vm2853_vm8 = vcmp.eq.f32.partialorder %v2852_v55, 8.507059e+37  ;;  %v7931_v55 = vld [vmem:[#allocation13_spill] sm:$0xff]  ;;  %v3253_v9 = vpop.f32.mrf.mxu3 }
 0x25c   : > { %4660 = vrcp.f32 %v6854_v22  ;;  %vm2823_vm6 = vcmp.eq.f32.partialorder %v2822_v26, 8.507059e+37  ;;  %vm6960_vm5 = vmor %vm2878_vm7, %vm2879_vm3  ;;  %v2882_v40 = vand.u32 2147483647, %v6692_v43  ;;  %v2856_v28 = vsel %vm2853_vm8, %v2855_v30, %v2851_v6  ;;  %v3195_v43 = vpop.f32.mrf.mxu1  ;;  %4077 = vst.msk [vmem:[%s6956_s27 + $0x30] sm:$0xff] %vm485_vm0, %v3253_v9 }
 0x25d   : > { %4662 = vrcp.f32 %v6909_v23  ;;  %v2780_v5 = vor.u32 1.1754944e-38, %v2779_v57  ;;  %v2826_v19 = vsel %vm2823_vm6, %v2825_v29, %v2821_v53  ;;  %v2881_v59 = vsel %vm6960_vm5, %v6769_v24, %v2877_v33  ;;  %4073 = vst.msk [vmem:[%s6956_s27 + $0x10] sm:$0xff] %vm485_vm0, %v3195_v43  ;;  %v471_v24 = vld [vmem:[%s5615_s24 + $0x190] sm:$0xff]  ;;  %v3166_v33 = vpop.f32.mrf.mxu0  ;;  %v7934_v43 = vld [vmem:[#allocation11_spill] sm:$0xff] }
 0x25e   : > { %v6966_v49 = vpop.eup %4658  ;;  %4664 = vrcp.f32 %v6873_v0  ;;  %v2885_v50 = vor.u32 1.1754944e-38, %v2884_v8  ;;  %v2831_v47 = vmul.f32 %v6875_v38, %v2830_v32  ;;  %v2776_v58 = vsel %vm6944_vm4, %v6743_v31, %v2772_v3  ;;  %v7926_v57 = vld [vmem:[#allocation8_spill] sm:$0xff]  ;;  %3889 = vmatpush.msra.mxu1 %v471_v24  ;;  %4071 = vst.msk [vmem:[%s6956_s27] sm:$0xff] %vm485_vm0, %v3166_v33  ;;  %v470_v32 = vld [vmem:[%s5615_s24 + $0x188] sm:$0xff]  ;;  %v484_v33 = vld [vmem:[%s5615_s24 + $0x1f8] sm:$0xff] }
 0x25f   : > { %4666 = vrcp.f32 %v6950_v21  ;;  %v2857_v11 = vmul.f32 %v7926_v57, %v2856_v28  ;;  %v2837_v18 = vand.u32 2147483647, %v6786_v20  ;;  %v2839_v42 = vand.u32 2147483648, %v6786_v20  ;;  %3859 = vmatpush.msra.mxu0 %v470_v32 }
 0x260   : > { %v2781_v13 = vsel %vm6892_vm13, %v2780_v5, %v2776_v58  ;;  %v2827_v48 = vmul.f32 %v7927_v15, %v2826_v19  ;;  %vm2883_vm9 = vcmp.eq.f32.partialorder %v2882_v40, 8.507059e+37  ;;  %v2889_v31 = vmul.f32 %v6966_v49, %v6821_v54  ;;  %v7058_v40 = vpop.xlane.xlu0 %2157 }
 0x261   : > { %v2782_v7 = vmul.f32 %v7928_v12, %v2781_v13  ;;  %v2886_v4 = vsel %vm2883_vm9, %v2885_v50, %v2881_v59  ;;  %v2899_v36 = vand.u32 2147483648, %v6821_v54  ;;  %v2832_v56 = vadd.f32 %v6875_v38, %v2831_v47  ;;  %3860 = vmatpush.msra.mxu0 %v469_v25 }
 0x262   : > { %v6996_v17 = vpop.eup %4660  ;;  %vm2833_vm12 = vweird.f32 %v6786_v20  ;;  %vm2834_vm11 = vweird.f32 %v6875_v38  ;;  %4668 = vrcp.f32 %v6974_v62  ;;  %vm7011_vm13 = vcmp.eq.f32.partialorder %v2837_v18, 8.507059e+37  ;;  %4406 = vmatmul.msk.f32.vlgmr.msrb.gmra.mxu2 %vm7733_vm1, %v2857_v11  ;;  %v7047_v30 = vpop.xlane.xlu2 %2145 }
 0x263   : > { %v7001_v44 = vpop.eup %4662  ;;  %4401 = vmatmul.msk.f32.gmra.mxu3 %vm7733_vm1, %v2782_v7  ;;  %4404 = vmatmul.msk.f32.vlgmr.msrb.gmra.mxu1 %vm7733_vm1, %v2827_v48  ;;  %v2840_v2 = vor.u32 1.1754944e-38, %v2839_v42  ;;  %v2897_v52 = vand.u32 2147483647, %v6821_v54  ;;  %v2887_v26 = vmul.f32 %v7931_v55, %v2886_v4  ;;  %v2890_v46 = vsub.f32 1.0, %v2889_v31  ;;  %vm7029_vm10 = vmor %vm2833_vm12, %vm2834_vm11  ;;  %v7093_v12 = vpop.xlane.xlu1 %2139  ;;  %v7939_v55 = vld [vmem:[#allocation15_spill] sm:$0xff] }
 0x264   : > { %v7009_v16 = vpop.eup %4664  ;;  %v2934_v1 = vmul.f32 %v7001_v44, %v6909_v23  ;;  %v2799_v10 = vmul.f32 %v6996_v17, %v6854_v22  ;;  %4670 = vrcp.f32 %v6999_v45  ;;  %v7033_v61 = vor.u32 1.1754944e-38, %v2899_v36 }
 0x265   : > { %v7019_v60 = vpop.eup %4666  ;;  %v2807_v63 = vand.u32 2147483647, %v6854_v22  ;;  %v2942_v35 = vand.u32 2147483647, %v6909_v23  ;;  %v2859_v6 = vmul.f32 %v7009_v16, %v6873_v0  ;;  %v2944_v53 = vand.u32 2147483648, %v6909_v23 }
 0x266   : > { %v2935_v3 = vsub.f32 1.0, %v2934_v1  ;;  %v7042_v20 = vmul.f32 %v7019_v60, %v6950_v21  ;;  %v2836_v8 = vsel %vm7029_vm10, %v6875_v38, %v2832_v56  ;;  %vm2894_vm15 = vweird.f32 %v6966_v49  ;;  %v475_v38 = vld [vmem:[%s5615_s24 + $0x1b0] sm:$0xff]  ;;  %v3169_v56 = vpop.f32.mrf.mxu0 }
 0x267   : > { %v2809_v27 = vand.u32 2147483648, %v6854_v22  ;;  %vm2939_vm2 = vweird.f32 %v7001_v44  ;;  %v2841_v39 = vsel %vm7011_vm13, %v2840_v2, %v2836_v8  ;;  %v2891_v5 = vmul.f32 %v6966_v49, %v2890_v46  ;;  %3947 = vmatpush.msra.mxu3 %v475_v38  ;;  %4072 = vst.msk [vmem:[%s6956_s27 + $0x8] sm:$0xff] %vm485_vm0, %v3169_v56  ;;  %v7964_v56 = vld [vmem:[#allocation14_spill] sm:$0xff]  ;;  %v483_v2 = vld [vmem:[%s5615_s24 + $0x1f0] sm:$0xff] }
 0x268   : > { %v2936_v29 = vmul.f32 %v7001_v44, %v2935_v3  ;;  %v7061_v28 = vpop.eup %4668  ;;  %v2800_v19 = vsub.f32 1.0, %v2799_v10  ;;  %v2867_v59 = vand.u32 2147483647, %v6873_v0  ;;  %v2842_v51 = vmul.f32 %v7934_v43, %v2841_v39  ;;  %v3224_v39 = vpop.f32.mrf.mxu2 }
 0x269   : > { %vm2893_vm14 = vweird.f32 %v6821_v54  ;;  %v2869_v50 = vand.u32 2147483648, %v6873_v0  ;;  %vm2938_vm3 = vweird.f32 %v6909_v23  ;;  %v2904_v58 = vmul.f32 %v7061_v28, %v6974_v62  ;;  %4075 = vst.msk [vmem:[%s6956_s27 + $0x20] sm:$0xff] %vm485_vm0, %v3224_v39 }
 0x26a   : > { %v2937_v47 = vadd.f32 %v7001_v44, %v2936_v29  ;;  %v7074_v24 = vpop.eup %4670  ;;  %vm2803_vm4 = vweird.f32 %v6854_v22  ;;  %v2860_v57 = vsub.f32 1.0, %v2859_v6  ;;  %vm2940_vm7 = vmor %vm2938_vm3, %vm2939_vm2  ;;  %vm2943_vm8 = vcmp.eq.f32.partialorder %v2942_v35, 8.507059e+37  ;;  %v482_v35 = vld [vmem:[%s5615_s24 + $0x1e8] sm:$0xff]  ;;  %v7134_v29 = vpop.xlane.xlu0 %2172 }
 0x26b   : > { %v2945_v11 = vor.u32 1.1754944e-38, %v2944_v53  ;;  %v2995_v18 = vsub.f32 1.0, %v7042_v20  ;;  %4408 = vmatmul.msk.f32.vlgmr.msrb.gmra.mxu3 %vm7733_vm1, %v2887_v26  ;;  %4405 = vmatmul.msk.f32.gmra.mxu1 %vm7733_vm1, %v2842_v51  ;;  %v2905_v42 = vsub.f32 1.0, %v2904_v58  ;;  %v2964_v13 = vmul.f32 %v7074_v24, %v6999_v45  ;;  %v7126_v20 = vpop.xlane.xlu2 %2151  ;;  %vm7142_vm3 = vmor %vm2893_vm14, %vm2894_vm15  ;;  %v7969_v51 = vld [vmem:[#allocation20_spill] sm:$0xff] }
 0x26c   : > { %v2941_v23 = vsel %vm2940_vm7, %v7001_v44, %v2937_v47  ;;  %4672 = vrcp.f32 %v7047_v30  ;;  %v2801_v15 = vmul.f32 %v6996_v17, %v2800_v19  ;;  %vm7087_vm6 = vcmp.eq.f32.partialorder %v2807_v63, 8.507059e+37  ;;  %4033 = vmatpush.msrb.mxu2 %v482_v35  ;;  %4062 = vmatpush.msrb.mxu3 %v484_v33  ;;  %v7970_v47 = vld [vmem:[#allocation18_spill] sm:$0xff] }
 0x26d   : > { %v2946_v31 = vsel %vm2943_vm8, %v2945_v11, %v2941_v23  ;;  %4674 = vrcp.f32 %v7058_v40  ;;  %v2810_v7 = vor.u32 1.1754944e-38, %v2809_v27  ;;  %v3002_v4 = vand.u32 2147483647, %v6950_v21 }
 0x26e   : > { %v2906_v36 = vmul.f32 %v7061_v28, %v2905_v42  ;;  %v2965_v44 = vsub.f32 1.0, %v2964_v13  ;;  %vm7099_vm9 = vcmp.eq.f32.partialorder %v2897_v52, 8.507059e+37  ;;  %v2861_v1 = vmul.f32 %v7009_v16, %v2860_v57  ;;  %v3282_v23 = vpop.f32.mrf.mxu0  ;;  %v7957_v13 = vld [vmem:[#allocation12_spill] sm:$0xff]  ;;  %4063 = vmatpush.msrb.mxu3 %v483_v2 }
 0x26f   : > { %v2947_v26 = vmul.f32 %v7939_v55, %v2946_v31  ;;  %v3004_v46 = vand.u32 2147483648, %v6950_v21  ;;  %v2912_v10 = vand.u32 2147483647, %v6974_v62  ;;  %v2892_v37 = vadd.f32 %v6966_v49, %v2891_v5  ;;  %4079 = vst.msk [vmem:[%s6956_s27 + $0x40] sm:$0xff] %vm485_vm0, %v3282_v23  ;;  %v478_v5 = vld [vmem:[%s5615_s24 + $0x1c8] sm:$0xff] }
 0x270   : > { %vm2804_vm12 = vweird.f32 %v6996_v17  ;;  %vm7111_vm11 = vcmp.eq.f32.partialorder %v2867_v59, 8.507059e+37  ;;  %v7115_v52 = vor.u32 1.1754944e-38, %v2869_v50  ;;  %v2996_v3 = vmul.f32 %v7019_v60, %v2995_v18  ;;  %v3198_v18 = vpop.f32.mrf.mxu1  ;;  %v3227_v33 = vpop.f32.mrf.mxu2  ;;  %3975 = vmatpush.msrb.mxu0 %v478_v5 }
 0x271   : > { %v2802_v6 = vadd.f32 %v6996_v17, %v2801_v15  ;;  %v2914_v53 = vand.u32 2147483648, %v6974_v62  ;;  %4676 = vrcp.f32 %v7093_v12  ;;  %v2907_v32 = vadd.f32 %v7061_v28, %v2906_v36  ;;  %vm2805_vm15 = vmor %vm2803_vm4, %vm2804_vm12  ;;  %4074 = vst.msk [vmem:[%s6956_s27 + $0x18] sm:$0xff] %vm485_vm0, %v3198_v18  ;;  %v7225_v36 = vpop.xlane.xlu1 %2178 }
 0x272   : > { %v7128_v8 = vpop.eup %4672  ;;  %vm2909_vm2 = vweird.f32 %v7061_v28  ;;  %v2966_v27 = vmul.f32 %v7074_v24, %v2965_v44  ;;  %v2862_v19 = vadd.f32 %v7009_v16, %v2861_v1  ;;  %vm7147_vm7 = vcmp.eq.f32.partialorder %v3002_v4, 8.507059e+37  ;;  %v7261_v35 = vpop.xlane.xlu0 %2166  ;;  %4076 = vst.msk [vmem:[%s6956_s27 + $0x28] sm:$0xff] %vm485_vm0, %v3227_v33 }
 0x273   : > { %v7136_v38 = vpop.eup %4674  ;;  %v3005_v43 = vor.u32 1.1754944e-38, %v3004_v46  ;;  %vm2908_vm8 = vweird.f32 %v6974_v62  ;;  %vm7152_vm13 = vcmp.eq.f32.partialorder %v2912_v10, 8.507059e+37  ;;  %4412 = vmatmul.msk.f32.vlgmr.msra.gmra.mxu1 %vm7733_vm1, %v2947_v26  ;;  %v2997_v54 = vadd.f32 %v7019_v60, %v2996_v3  ;;  %v7254_v63 = vpop.xlane.xlu2 %2160 }
 0x274   : > { %vm2999_vm14 = vweird.f32 %v7019_v60  ;;  %v2972_v62 = vand.u32 2147483647, %v6999_v45  ;;  %vm7169_vm10 = vmor %vm2908_vm8, %vm2909_vm2  ;;  %v2915_v25 = vor.u32 1.1754944e-38, %v2914_v53  ;;  %vm2969_vm1 = vweird.f32 %v7074_v24 }
 0x275   : > { %v2949_v22 = vmul.f32 %v7128_v8, %v7047_v30  ;;  %v2806_v50 = vsel %vm2805_vm15, %v6996_v17, %v2802_v6  ;;  %vm7950_vm4 = vweird.f32 %v7009_v16  ;;  %vm7951_vm12 = vweird.f32 %v6873_v0  ;;  %v7968_v6 = vld [vmem:[#allocation16_spill] sm:$0xff] }
 0x276   : > { %vm7181_vm5 = vmor %vm7951_vm12, %vm7950_vm4  ;;  %v2911_v58 = vsel %vm7169_vm10, %v7061_v28, %v2907_v32  ;;  %v2967_v57 = vadd.f32 %v7074_v24, %v2966_v27  ;;  %v3009_v11 = vmul.f32 %v7136_v38, %v7058_v40  ;;  %v2811_v17 = vsel %vm7087_vm6, %v2810_v7, %v2806_v50 }
 0x277   : > { %v7193_v0 = vpop.eup %4676  ;;  %vm7954_vm2 = vweird.f32 %v6950_v21  ;;  %v2974_v28 = vand.u32 2147483648, %v6999_v45  ;;  %v2812_v15 = vmul.f32 %v7957_v13, %v2811_v17  ;;  %v2896_v48 = vsel %vm7142_vm3, %v6966_v49, %v2892_v37  ;;  %v477_v17 = vld [vmem:[%s5615_s24 + $0x1c0] sm:$0xff]  ;;  %v479_v13 = vld [vmem:[%s5615_s24 + $0x1d0] sm:$0xff] }
 0x278   : > { %vm7199_vm8 = vmor %vm7954_vm2, %vm2999_vm14  ;;  %v2866_v31 = vsel %vm7181_vm5, %v7009_v16, %v2862_v19  ;;  %vm7216_vm6 = vcmp.eq.f32.partialorder %v2972_v62, 8.507059e+37  ;;  %v2919_v4 = vmul.f32 %v7193_v0, %v7093_v12  ;;  %v2901_v49 = vsel %vm7099_vm9, %v7033_v61, %v2896_v48  ;;  %v3285_v48 = vpop.f32.mrf.mxu0  ;;  %3976 = vmatpush.msrb.mxu0 %v477_v17 }
 0x279   : > { %v3001_v21 = vsel %vm7199_vm8, %v7019_v60, %v2997_v54  ;;  %v2916_v16 = vsel %vm7152_vm13, %v2915_v25, %v2911_v58  ;;  %vm7960_vm5 = vweird.f32 %v6999_v45  ;;  %v2950_v44 = vsub.f32 1.0, %v2949_v22  ;;  %v7965_v45 = vld [vmem:[#allocation17_spill] sm:$0xff]  ;;  %v481_v22 = vld [vmem:[%s5615_s24 + $0x1e0] sm:$0xff]  ;;  %4080 = vst.msk [vmem:[%s6956_s27 + $0x48] sm:$0xff] %vm485_vm0, %v3285_v48 }
 0x27a   : > { %vm7235_vm10 = vmor %vm7960_vm5, %vm2969_vm1  ;;  %vm7963_vm3 = vcmask 130048   ;;  %v2902_v61 = vmul.f32 %v7964_v56, %v2901_v49  ;;  %v2871_v9 = vsel %vm7111_vm11, %v7115_v52, %v2866_v31  ;;  %v3010_v55 = vsub.f32 1.0, %v3009_v11  ;;  %v480_v25 = vld [vmem:[%s5615_s24 + $0x1d8] sm:$0xff]  ;;  %4034 = vmatpush.msrb.mxu2 %v481_v22  ;;  %v7317_v49 = vpop.xlane.xlu1 %2175 }
 0x27b   : > { %4403 = vmatmul.msk.f32.gmra.mxu0 %vm7963_vm3, %v2812_v15  ;;  %v2971_v1 = vsel %vm7235_vm10, %v7074_v24, %v2967_v57  ;;  %v2872_v26 = vmul.f32 %v7965_v45, %v2871_v9  ;;  %4678 = vrcp.f32 %v7126_v20  ;;  %v2975_v46 = vor.u32 1.1754944e-38, %v2974_v28  ;;  %vm7966_vm1 = vmmov %vm7963_vm3  ;;  %4004 = vmatpush.msrb.mxu1 %v480_v25  ;;  %v3256_v15 = vpop.f32.mrf.mxu3  ;;  %v3340_v45 = vpop.f32.mrf.mxu2 }
 0x27c   : > { %v2957_v10 = vand.u32 2147483647, %v7047_v30  ;;  %v2959_v37 = vand.u32 2147483648, %v7047_v30  ;;  %4409 = vmatmul.msk.f32.gmra.mxu3 %vm7966_vm1, %v2902_v61  ;;  %4680 = vrcp.f32 %v7134_v29  ;;  %v3006_v24 = vsel %vm7147_vm7, %v3005_v43, %v3001_v21  ;;  %vm7967_vm9 = vmmov %vm7966_vm1  ;;  %v3311_v43 = vpop.f32.mrf.mxu1  ;;  %4078 = vst.msk [vmem:[%s6956_s27 + $0x38] sm:$0xff] %vm485_vm0, %v3256_v15 }
 0x27d   : > { %v3019_v52 = vand.u32 2147483648, %v7058_v40  ;;  %v2920_v3 = vsub.f32 1.0, %v2919_v4  ;;  %4407 = vmatmul.msk.f32.gmra.mxu2 %vm7967_vm9, %v2872_v26  ;;  %4682 = vrcp.f32 %v7225_v36  ;;  %v2917_v53 = vmul.f32 %v7968_v6, %v2916_v16  ;;  %4081 = vst.msk [vmem:[%s6956_s27 + $0x50] sm:$0xff] %vm485_vm0, %v3311_v43  ;;  %vm7975_vm12 = vmmov %vm7966_vm1  ;;  %4005 = vmatpush.msrb.mxu1 %v479_v13 }
 0x27e   : > { %v2976_v32 = vsel %vm7216_vm6, %v2975_v46, %v2971_v1  ;;  %v2951_v27 = vmul.f32 %v7128_v8, %v2950_v44  ;;  %v2927_v39 = vand.u32 2147483647, %v7093_v12  ;;  %vm2953_vm11 = vweird.f32 %v7047_v30  ;;  %vm7976_vm6 = vmmov %vm7966_vm1  ;;  %4083 = vst.msk [vmem:[%s6956_s27 + $0x60] sm:$0xff] %vm485_vm0, %v3340_v45 }
 0x27f   : > { %v3011_v19 = vmul.f32 %v7136_v38, %v3010_v55  ;;  %v2929_v59 = vand.u32 2147483648, %v7093_v12  ;;  %4684 = vrcp.f32 %v7254_v63  ;;  %v3007_v54 = vmul.f32 %v7969_v51, %v3006_v24  ;;  %vm7977_vm5 = vmmov %vm7966_vm1 }
 0x280   : > { %v7276_v62 = vor.u32 1.1754944e-38, %v2959_v37  ;;  %v3017_v14 = vand.u32 2147483647, %v7058_v40  ;;  %4686 = vrcp.f32 %v7261_v35  ;;  %v2977_v58 = vmul.f32 %v7970_v47, %v2976_v32 }
 0x281   : > { %v7282_v50 = vpop.eup %4678  ;;  %vm2954_vm13 = vweird.f32 %v7128_v8  ;;  %v7286_v57 = vor.u32 1.1754944e-38, %v3019_v52  ;;  %v2921_v11 = vmul.f32 %v7193_v0, %v2920_v3  ;;  %v7295_v23 = vadd.f32 %v7128_v8, %v2951_v27 }
 0x282   : > { %v7292_v18 = vpop.eup %4680  ;;  %vm7297_vm7 = vcmp.eq.f32.partialorder %v2957_v10, 8.507059e+37  ;;  %vm3014_vm15 = vweird.f32 %v7136_v38  ;;  %vm2923_vm14 = vweird.f32 %v7093_v12  ;;  %vm7303_vm4 = vcmp.eq.f32.partialorder %v2927_v39, 8.507059e+37  ;;  %vm7350_vm10 = vmor %vm2953_vm11, %vm2954_vm13  ;;  %v3398_v25 = vpop.f32.mrf.mxu0 }
 0x283   : > { %4410 = vmatmul.msk.f32.vlgmr.msra.gmra.mxu0 %vm7975_vm12, %v2917_v53  ;;  %v7309_v31 = vpop.eup %4682  ;;  %v7312_v21 = vadd.f32 %v7136_v38, %v3011_v19  ;;  %vm3013_vm2 = vweird.f32 %v7058_v40  ;;  %vm2924_vm8 = vweird.f32 %v7193_v0  ;;  %v2930_v7 = vor.u32 1.1754944e-38, %v2929_v59  ;;  %4087 = vst.msk [vmem:[%s6956_s27 + $0x80] sm:$0xff] %vm485_vm0, %v3398_v25  ;;  %v7996_v53 = vld [vmem:[#allocation33_spill] sm:$0xff] }
 0x284   : > { %v2987_v4 = vand.u32 2147483647, %v7126_v20  ;;  %v2979_v16 = vmul.f32 %v7282_v50, %v7126_v20  ;;  %v2989_v60 = vand.u32 2147483648, %v7126_v20  ;;  %v3092_v44 = vand.u32 2147483647, %v7134_v29  ;;  %4416 = vmatmul.msk.f32.vlgmr.msra.gmra.mxu3 %vm7976_vm6, %v3007_v54  ;;  %v3314_v30 = vpop.f32.mrf.mxu1  ;;  %vm7368_vm11 = vmor %vm2923_vm14, %vm2924_vm8 }
 0x285   : > { %v3114_v56 = vmul.f32 %v7309_v31, %v7225_v36  ;;  %v7330_v61 = vpop.eup %4684  ;;  %v2922_v9 = vadd.f32 %v7193_v0, %v2921_v11  ;;  %v3094_v2 = vand.u32 2147483648, %v7134_v29  ;;  %v3122_v1 = vand.u32 2147483647, %v7225_v36  ;;  %4414 = vmatmul.msk.f32.vlgmr.msra.gmra.mxu2 %vm7977_vm5, %v2977_v58  ;;  %4082 = vst.msk [vmem:[%s6956_s27 + $0x58] sm:$0xff] %vm485_vm0, %v3314_v30  ;;  %vm7403_vm6 = vmor %vm3013_vm2, %vm3014_vm15 }
 0x286   : > { %v3124_v55 = vand.u32 2147483648, %v7225_v36  ;;  %v7337_v26 = vpop.eup %4686  ;;  %v3084_v46 = vmul.f32 %v7292_v18, %v7134_v29  ;;  %v3024_v37 = vmul.f32 %v7330_v61, %v7254_v63  ;;  %4688 = vrcp.f32 %v7317_v49 }
 0x287   : > { %v3115_v10 = vsub.f32 1.0, %v3114_v56  ;;  %vm7354_vm3 = vcmp.eq.f32.partialorder %v3017_v14, 8.507059e+37  ;;  %vm3118_vm1 = vweird.f32 %v7225_v36  ;;  %vm3028_vm9 = vweird.f32 %v7254_v63  ;;  %v3369_v14 = vpop.f32.mrf.mxu3 }
 0x288   : > { %v3032_v3 = vand.u32 2147483647, %v7254_v63  ;;  %v3034_v33 = vand.u32 2147483648, %v7254_v63  ;;  %v3054_v6 = vmul.f32 %v7337_v26, %v7261_v35  ;;  %v2980_v32 = vsub.f32 1.0, %v2979_v16  ;;  %4085 = vst.msk [vmem:[%s6956_s27 + $0x70] sm:$0xff] %vm485_vm0, %v3369_v14  ;;  %v7990_v16 = vld [vmem:[#allocation19_spill] sm:$0xff] }
 0x289   : > { %v3025_v27 = vsub.f32 1.0, %v3024_v37  ;;  %vm3058_vm13 = vweird.f32 %v7261_v35  ;;  %v3062_v39 = vand.u32 2147483647, %v7261_v35  ;;  %v3116_v5 = vmul.f32 %v7309_v31, %v3115_v10 }
 0x28a   : > { %v3055_v19 = vsub.f32 1.0, %v3054_v6  ;;  %v2956_v12 = vsel %vm7350_vm10, %v7128_v8, %v7295_v23  ;;  %v2926_v59 = vsel %vm7368_vm11, %v7193_v0, %v2922_v9  ;;  %v3085_v43 = vsub.f32 1.0, %v3084_v46  ;;  %v7413_v23 = vpop.xlane.xlu2 %2181  ;;  %v3343_v9 = vpop.f32.mrf.mxu2 }
 0x28b   : > { %v3026_v51 = vmul.f32 %v7330_v61, %v3025_v27  ;;  %vm3029_vm14 = vweird.f32 %v7330_v61  ;;  %v3064_v54 = vand.u32 2147483648, %v7261_v35  ;;  %vm2983_vm12 = vweird.f32 %v7126_v20  ;;  %v7447_v35 = vpop.xlane.xlu0 %2163  ;;  %4084 = vst.msk [vmem:[%s6956_s27 + $0x68] sm:$0xff] %vm485_vm0, %v3343_v9  ;;  %v7466_v46 = vpop.xlane.xlu1 %2169 }
 0x28c   : > { %v3056_v22 = vmul.f32 %v7337_v26, %v3055_v19  ;;  %vm3059_vm8 = vweird.f32 %v7337_v26  ;;  %v2961_v8 = vsel %vm7297_vm7, %v7276_v62, %v2956_v12  ;;  %v2931_v0 = vsel %vm7303_vm4, %v2930_v7, %v2926_v59  ;;  %v7397_v47 = vpop.eup %4688  ;;  %vm7423_vm15 = vmor %vm3028_vm9, %vm3029_vm14 }
 0x28d   : > { %vm3119_vm5 = vweird.f32 %v7309_v31  ;;  %v3027_v11 = vadd.f32 %v7330_v61, %v3026_v51  ;;  %v3035_v62 = vor.u32 1.1754944e-38, %v3034_v33  ;;  %vm7409_vm7 = vcmp.eq.f32.partialorder %v3062_v39, 8.507059e+37  ;;  %vm3060_vm4 = vmor %vm3058_vm13, %vm3059_vm8  ;;  %v3427_v6 = vpop.f32.mrf.mxu1 }
 0x28e   : > { %v2981_v42 = vmul.f32 %v7282_v50, %v2980_v32  ;;  %v3117_v40 = vadd.f32 %v7309_v31, %v3116_v5  ;;  %v3057_v13 = vadd.f32 %v7337_v26, %v3056_v22  ;;  %v2962_v15 = vmul.f32 %v5771_v34, %v2961_v8  ;;  %vm7456_vm9 = vmor %vm3118_vm1, %vm3119_vm5  ;;  %4089 = vst.msk [vmem:[%s6956_s27 + $0x90] sm:$0xff] %vm485_vm0, %v3427_v6  ;;  %v8007_v22 = vld [vmem:[#allocation21_spill] sm:$0xff] }
 0x28f   : > { %v3086_v48 = vmul.f32 %v7292_v18, %v3085_v43  ;;  %v3031_v7 = vsel %vm7423_vm15, %v7330_v61, %v3027_v11  ;;  %v3065_v63 = vor.u32 1.1754944e-38, %v3064_v54  ;;  %v2932_v56 = vmul.f32 %v7990_v16, %v2931_v0  ;;  %v3372_v52 = vpop.f32.mrf.mxu3  ;;  %v3401_v39 = vpop.f32.mrf.mxu0  ;;  %v8005_v43 = vld [vmem:[#allocation35_spill] sm:$0xff] }
 0x290   : > { %v3061_v45 = vsel %vm3060_vm4, %v7337_v26, %v3057_v13  ;;  %v3099_v34 = vmul.f32 %v7397_v47, %v7317_v49  ;;  %vm7991_vm2 = vcmask 130048   ;;  %v3016_v61 = vsel %vm7403_vm6, %v7136_v38, %v7312_v21  ;;  %4086 = vst.msk [vmem:[%s6956_s27 + $0x78] sm:$0xff] %vm485_vm0, %v3372_v52 }
 0x291   : > { %4413 = vmatmul.msk.f32.gmra.mxu1 %vm7991_vm2, %v2962_v15  ;;  %4690 = vrcp.f32 %v7413_v23  ;;  %vm2984_vm10 = vweird.f32 %v7282_v50  ;;  %vm3033_vm11 = vcmp.eq.f32.partialorder %v3032_v3, 8.507059e+37  ;;  %v3066_v38 = vsel %vm7409_vm7, %v3065_v63, %v3061_v45  ;;  %vm7994_vm13 = vmmov %vm7991_vm2  ;;  %v7995_v3 = vld [vmem:[#allocation24_spill] sm:$0xff]  ;;  %4088 = vst.msk [vmem:[%s6956_s27 + $0x88] sm:$0xff] %vm485_vm0, %v3401_v39 }
 0x292   : > { %4411 = vmatmul.msk.f32.gmra.mxu0 %vm7994_vm13, %v2932_v56  ;;  %v3021_v21 = vsel %vm7354_vm3, %v7286_v57, %v3016_v61  ;;  %v2982_v10 = vadd.f32 %v7282_v50, %v2981_v42  ;;  %v3121_v37 = vsel %vm7456_vm9, %v7309_v31, %v3117_v40  ;;  %v3036_v24 = vsel %vm3033_vm11, %v3035_v62, %v3031_v7  ;;  %vm7997_vm3 = vmmov %vm7991_vm2 }
 0x293   : > { %v3022_v33 = vmul.f32 %v7995_v3, %v3021_v21  ;;  %vm3089_vm1 = vweird.f32 %v7292_v18  ;;  %vm3123_vm14 = vcmp.eq.f32.partialorder %v3122_v1, 8.507059e+37  ;;  %v3125_v57 = vor.u32 1.1754944e-38, %v3124_v55  ;;  %vm7489_vm8 = vmor %vm2983_vm12, %vm2984_vm10  ;;  %v8000_v55 = vld [vmem:[#allocation23_spill] sm:$0xff]  ;;  %v3456_v0 = vpop.f32.mrf.mxu2 }
 0x294   : > { %4692 = vrcp.f32 %v7447_v35  ;;  %v3087_v30 = vadd.f32 %v7292_v18, %v3086_v48  ;;  %v3067_v31 = vmul.f32 %v7996_v53, %v3066_v38  ;;  %v3100_v32 = vsub.f32 1.0, %v3099_v34  ;;  %vm8006_vm4 = vmmov %vm7991_vm2  ;;  %4091 = vst.msk [vmem:[%s6956_s27 + $0xa0] sm:$0xff] %vm485_vm0, %v3456_v0  ;;  %v8012_v38 = vld [vmem:[#allocation22_spill] sm:$0xff] }
 0x295   : > { %4417 = vmatmul.msk.f32.gmra.mxu3 %vm7997_vm3, %v3022_v33  ;;  %4694 = vrcp.f32 %v7466_v46  ;;  %v3126_v1 = vsel %vm3123_vm14, %v3125_v57, %v3121_v37  ;;  %v3037_v27 = vmul.f32 %v8000_v55, %v3036_v24  ;;  %vm2988_vm6 = vcmp.eq.f32.partialorder %v2987_v4, 8.507059e+37  ;;  %vm8008_vm11 = vmmov %vm7991_vm2  ;;  %v8015_v57 = vld [vmem:[#allocation37_spill] sm:$0xff]  ;;  %v8019_v55 = vld [vmem:[#allocation34_spill] sm:$0xff] }
 0x296   : > { %v2990_v19 = vor.u32 1.1754944e-38, %v2989_v60  ;;  %vm3088_vm5 = vweird.f32 %v7134_v29  ;;  %v2986_v12 = vsel %vm7489_vm8, %v7282_v50, %v2982_v10  ;;  %vm7514_vm7 = vcmp.eq.f32.partialorder %v3092_v44, 8.507059e+37 }
 0x297   : > { %v4691_v5 = vpop.eup %4690  ;;  %vm7508_vm12 = vmor %vm3088_vm5, %vm3089_vm1  ;;  %v3095_v20 = vor.u32 1.1754944e-38, %v3094_v2  ;;  %vm3103_vm15 = vweird.f32 %v7317_v49  ;;  %v3127_v51 = vmul.f32 %v8005_v43, %v3126_v1  ;;  %v3101_v54 = vmul.f32 %v7397_v47, %v3100_v32  ;;  %v8018_v32 = vld [vmem:[#allocation36_spill] sm:$0xff] }
 0x298   : > { %v3129_v50 = vmul.f32 %v4691_v5, %v7413_v23  ;;  %v3091_v60 = vsel %vm7508_vm12, %v7292_v18, %v3087_v30  ;;  %v2991_v44 = vsel %vm2988_vm6, %v2990_v19, %v2986_v12  ;;  %v3107_v29 = vand.u32 2147483647, %v7317_v49  ;;  %vm8009_vm1 = vmmov %vm7991_vm2 }
 0x299   : > { %4420 = vmatmul.msk.f32.vlgmr.msrb.gmra.mxu1 %vm8006_vm4, %v3067_v31  ;;  %v3137_v25 = vand.u32 2147483647, %v7413_v23  ;;  %v2992_v8 = vmul.f32 %v8007_v22, %v2991_v44  ;;  %vm3104_vm10 = vweird.f32 %v7397_v47  ;;  %v3109_v58 = vand.u32 2147483648, %v7317_v49  ;;  %v3430_v26 = vpop.f32.mrf.mxu1 }
 0x29a   : > { %v4693_v14 = vpop.eup %4692  ;;  %v3130_v2 = vsub.f32 1.0, %v3129_v50  ;;  %4418 = vmatmul.msk.f32.vlgmr.msrb.gmra.mxu0 %vm7991_vm2, %v3037_v27  ;;  %v3139_v11 = vand.u32 2147483648, %v7413_v23  ;;  %v3096_v17 = vsel %vm7514_vm7, %v3095_v20, %v3091_v60  ;;  %vm3134_vm9 = vweird.f32 %v4691_v5  ;;  %vm7558_vm5 = vmor %vm3103_vm15, %vm3104_vm10  ;;  %4090 = vst.msk [vmem:[%s6956_s27 + $0x98] sm:$0xff] %vm485_vm0, %v3430_v26 }
 0x29b   : > { %v4695_v18 = vpop.eup %4694  ;;  %v3039_v62 = vmul.f32 %v4693_v14, %v7447_v35  ;;  %4415 = vmatmul.msk.f32.gmra.mxu2 %vm8008_vm11, %v2992_v8  ;;  %v3102_v28 = vadd.f32 %v7397_v47, %v3101_v54  ;;  %vm3133_vm13 = vweird.f32 %v7413_v23  ;;  %v3047_v15 = vand.u32 2147483647, %v7447_v35  ;;  %vm8017_vm11 = vmmov %vm8009_vm1 }
 0x29c   : > { %v3131_v42 = vmul.f32 %v4691_v5, %v3130_v2  ;;  %v3069_v40 = vmul.f32 %v4695_v18, %v7466_v46  ;;  %vm7546_vm14 = vcmp.eq.f32.partialorder %v3137_v25, 8.507059e+37  ;;  %v3049_v63 = vand.u32 2147483648, %v7447_v35  ;;  %vm3135_vm3 = vmor %vm3133_vm13, %vm3134_vm9 }
 0x29d   : > { %v3040_v13 = vsub.f32 1.0, %v3039_v62  ;;  %4424 = vmatmul.msk.f32.vlgmr.msrb.gmra.mxu3 %vm8009_vm1, %v3127_v51  ;;  %v3140_v56 = vor.u32 1.1754944e-38, %v3139_v11  ;;  %vm3044_vm8 = vweird.f32 %v4693_v14  ;;  %v3079_v23 = vand.u32 2147483648, %v7466_v46  ;;  %vm8016_vm9 = vmmov %vm8009_vm1 }
 0x29e   : > { %v3132_v48 = vadd.f32 %v4691_v5, %v3131_v42  ;;  %v3070_v16 = vsub.f32 1.0, %v3069_v40  ;;  %vm3074_vm6 = vweird.f32 %v4695_v18  ;;  %v3077_v61 = vand.u32 2147483647, %v7466_v46 }
 0x29f   : > { %v3041_v9 = vmul.f32 %v4693_v14, %v3040_v13  ;;  %v3097_v21 = vmul.f32 %v8012_v38, %v3096_v17  ;;  %vm3043_vm12 = vweird.f32 %v7447_v35  ;;  %v3050_v3 = vor.u32 1.1754944e-38, %v3049_v63 }
 0x2a0   : > { %v3136_v45 = vsel %vm3135_vm3, %v4691_v5, %v3132_v48  ;;  %v3071_v34 = vmul.f32 %v4695_v18, %v3070_v16  ;;  %vm3045_vm7 = vmor %vm3043_vm12, %vm3044_vm8  ;;  %vm3073_vm4 = vweird.f32 %v7466_v46  ;;  %vm3048_vm15 = vcmp.eq.f32.partialorder %v3047_v15, 8.507059e+37  ;;  %v3485_v46 = vpop.f32.mrf.mxu3 }
 0x2a1   : > { %v3042_v37 = vadd.f32 %v4693_v14, %v3041_v9  ;;  %v3141_v24 = vsel %vm7546_vm14, %v3140_v56, %v3136_v45  ;;  %vm3075_vm2 = vmor %vm3073_vm4, %vm3074_vm6  ;;  %v3080_v6 = vor.u32 1.1754944e-38, %v3079_v23  ;;  %vm3078_vm10 = vcmp.eq.f32.partialorder %v3077_v61, 8.507059e+37  ;;  %4093 = vst.msk [vmem:[%s6956_s27 + $0xb0] sm:$0xff] %vm485_vm0, %v3485_v46 }
 0x2a2   : > { %v3072_v33 = vadd.f32 %v4695_v18, %v3071_v34  ;;  %v3142_v49 = vmul.f32 %v8015_v57, %v3141_v24  ;;  %v3106_v35 = vsel %vm7558_vm5, %v7397_v47, %v3102_v28  ;;  %v3110_v31 = vor.u32 1.1754944e-38, %v3109_v58  ;;  %vm8020_vm14 = vmmov %vm8009_vm1  ;;  %v3459_v47 = vpop.f32.mrf.mxu2 }
 0x2a3   : > { %v3046_v52 = vsel %vm3045_vm7, %v4693_v14, %v3042_v37  ;;  %4422 = vmatmul.msk.f32.vlgmr.msrb.gmra.mxu2 %vm8016_vm9, %v3097_v21  ;;  %vm3108_vm13 = vcmp.eq.f32.partialorder %v3107_v29, 8.507059e+37  ;;  %4092 = vst.msk [vmem:[%s6956_s27 + $0xa8] sm:$0xff] %vm485_vm0, %v3459_v47  ;;  %v3514_v19 = vpop.f32.mrf.mxu0  ;;  %vm8021_vm3 = vmmov %vm8009_vm1 }
 0x2a4   : > { %v3076_v30 = vsel %vm3075_vm2, %v4695_v18, %v3072_v33  ;;  %v3051_v53 = vsel %vm3048_vm15, %v3050_v3, %v3046_v52  ;;  %v3111_v39 = vsel %vm3108_vm13, %v3110_v31, %v3106_v35  ;;  %4095 = vst.msk [vmem:[%s6956_s27 + $0xc0] sm:$0xff] %vm485_vm0, %v3514_v19 }
 0x2a5   : > { %4425 = vmatmul.msk.f32.gmra.mxu3 %vm8017_vm11, %v3142_v49  ;;  %v3052_v36 = vmul.f32 %v8018_v32, %v3051_v53  ;;  %v3081_v1 = vsel %vm3078_vm10, %v3080_v6, %v3076_v30  ;;  %v3112_v5 = vmul.f32 %v5936_v41, %v3111_v39  ;;  %v3543_v12 = vpop.f32.mrf.mxu1 }
 0x2a6   : > { %v3082_v27 = vmul.f32 %v8019_v55, %v3081_v1  ;;  %4097 = vst.msk [vmem:[%s6956_s27 + $0xd0] sm:$0xff] %vm485_vm0, %v3543_v12 }
 0x2a7   : > { %4419 = vmatmul.msk.f32.gmra.mxu0 %vm8009_vm1, %v3052_v36 }
 0x2a8   : > { %4421 = vmatmul.msk.f32.gmra.mxu1 %vm8020_vm14, %v3082_v27 }
 0x2ab   : > { %4423 = vmatmul.msk.f32.gmra.mxu2 %vm8021_vm3, %v3112_v5 }
 0x2ac   : > { %v3488_v59 = vpop.f32.mrf.mxu3 }
 0x2ad   : > { %4094 = vst.msk [vmem:[%s6956_s27 + $0xb8] sm:$0xff] %vm485_vm0, %v3488_v59 }
 0x2b0   : > { %v3517_v4 = vpop.f32.mrf.mxu0 }
 0x2b1   : > { %4096 = vst.msk [vmem:[%s6956_s27 + $0xc8] sm:$0xff] %vm485_vm0, %v3517_v4 }
 0x2b3   : > { %v3572_v41 = vpop.f32.mrf.mxu2 }
 0x2b4   : > { %4099 = vst.msk [vmem:[%s6956_s27 + $0xe0] sm:$0xff] %vm485_vm0, %v3572_v41 }
 0x2b5   : > { %v3601_v20 = vpop.f32.mrf.mxu3 }
 0x2b6   : > { %4101 = vst.msk [vmem:[%s6956_s27 + $0xf0] sm:$0xff] %vm485_vm0, %v3601_v20 }
 0x2b8   : > { %v3630_v50 = vpop.f32.mrf.mxu0 }
 0x2b9   : > { %4103 = vst.msk [vmem:[%s6956_s27 + $0x100] sm:$0xff] %vm485_vm0, %v3630_v50 }
 0x2bd   : > { %v3546_v60 = vpop.f32.mrf.mxu1 }
 0x2be   : > { %4098 = vst.msk [vmem:[%s6956_s27 + $0xd8] sm:$0xff] %vm485_vm0, %v3546_v60 }
 0x2c5   : > { %v3659_v51 = vpop.f32.mrf.mxu1 }
 0x2c6   : > { %v3575_v43 = vpop.f32.mrf.mxu2  ;;  %4105 = vst.msk [vmem:[%s6956_s27 + $0x110] sm:$0xff] %vm485_vm0, %v3659_v51 }
 0x2c7   : > { %4100 = vst.msk [vmem:[%s6956_s27 + $0xe8] sm:$0xff] %vm485_vm0, %v3575_v43 }
 0x2ca   : > { %v3633_v54 = vpop.f32.mrf.mxu0 }
 0x2cb   : > { %4104 = vst.msk [vmem:[%s6956_s27 + $0x108] sm:$0xff] %vm485_vm0, %v3633_v54 }
 0x2ce   : > { %v3688_v44 = vpop.f32.mrf.mxu2 }
 0x2cf   : > { %4107 = vst.msk [vmem:[%s6956_s27 + $0x120] sm:$0xff] %vm485_vm0, %v3688_v44 }
 0x2d2   : > { %v3604_v14 = vpop.f32.mrf.mxu3 }
 0x2d3   : > { %4102 = vst.msk [vmem:[%s6956_s27 + $0xf8] sm:$0xff] %vm485_vm0, %v3604_v14 }
 0x2d4   : > { %v3746_v29 = vpop.f32.mrf.mxu0 }
 0x2d5   : > { %4111 = vst.msk [vmem:[%s6956_s27 + $0x140] sm:$0xff] %vm485_vm0, %v3746_v29 }
 0x2d8   : > { %v3662_v2 = vpop.f32.mrf.mxu1 }
 0x2d9   : > { %4106 = vst.msk [vmem:[%s6956_s27 + $0x118] sm:$0xff] %vm485_vm0, %v3662_v2 }
 0x2da   : > { %v3717_v25 = vpop.f32.mrf.mxu3 }
 0x2db   : > { %4109 = vst.msk [vmem:[%s6956_s27 + $0x130] sm:$0xff] %vm485_vm0, %v3717_v25 }
 0x2dd   : > { %v3691_v22 = vpop.f32.mrf.mxu2 }
 0x2de   : > { %4108 = vst.msk [vmem:[%s6956_s27 + $0x128] sm:$0xff] %vm485_vm0, %v3691_v22 }
 0x2e0   : > { %v3775_v8 = vpop.f32.mrf.mxu1 }
 0x2e1   : > { %4113 = vst.msk [vmem:[%s6956_s27 + $0x150] sm:$0xff] %vm485_vm0, %v3775_v8 }
 0x2e5   : > { %v3804_v18 = vpop.f32.mrf.mxu2 }
 0x2e6   : > { %v3720_v0 = vpop.f32.mrf.mxu3  ;;  %4115 = vst.msk [vmem:[%s6956_s27 + $0x160] sm:$0xff] %vm485_vm0, %v3804_v18 }
 0x2e7   : > { %4110 = vst.msk [vmem:[%s6956_s27 + $0x138] sm:$0xff] %vm485_vm0, %v3720_v0 }
 0x2e8   : > { %v3778_v58 = vpop.f32.mrf.mxu1 }
 0x2e9   : > { %4114 = vst.msk [vmem:[%s6956_s27 + $0x158] sm:$0xff] %vm485_vm0, %v3778_v58 }
 0x2ee   : > { %v3833_v11 = vpop.f32.mrf.mxu3 }
 0x2ef   : > { %4117 = vst.msk [vmem:[%s6956_s27 + $0x170] sm:$0xff] %vm485_vm0, %v3833_v11 }
 0x2f0   : > { %v3891_v62 = vpop.f32.mrf.mxu1 }
 0x2f1   : > { %4121 = vst.msk [vmem:[%s6956_s27 + $0x190] sm:$0xff] %vm485_vm0, %v3891_v62 }
 0x2f8   : > { %v3749_v17 = vpop.f32.mrf.mxu0 }
 0x2f9   : > { %4112 = vst.msk [vmem:[%s6956_s27 + $0x148] sm:$0xff] %vm485_vm0, %v3749_v17 }
 0x2ff   : > { %v3836_v42 = vpop.f32.mrf.mxu3 }
 0x300   : > { %v3862_v40 = vpop.f32.mrf.mxu0  ;;  %4118 = vst.msk [vmem:[%s6956_s27 + $0x178] sm:$0xff] %vm485_vm0, %v3836_v42  ;;  %v3807_v28 = vpop.f32.mrf.mxu2 }
 0x301   : > { %4116 = vst.msk [vmem:[%s6956_s27 + $0x168] sm:$0xff] %vm485_vm0, %v3807_v28 }
 0x302   : > { %4119 = vst.msk [vmem:[%s6956_s27 + $0x180] sm:$0xff] %vm485_vm0, %v3862_v40 }
 0x307   : > { %v3949_v13 = vpop.f32.mrf.mxu3 }
 0x308   : > { %4125 = vst.msk [vmem:[%s6956_s27 + $0x1b0] sm:$0xff] %vm485_vm0, %v3949_v13  ;;  %v3920_v15 = vpop.f32.mrf.mxu2 }
 0x309   : > { %4123 = vst.msk [vmem:[%s6956_s27 + $0x1a0] sm:$0xff] %vm485_vm0, %v3920_v15 }
 0x30e   : > { %v3894_v48 = vpop.f32.mrf.mxu1 }
 0x30f   : > { %4122 = vst.msk [vmem:[%s6956_s27 + $0x198] sm:$0xff] %vm485_vm0, %v3894_v48  ;;  %v3865_v7 = vpop.f32.mrf.mxu0 }
 0x310   : > { %4120 = vst.msk [vmem:[%s6956_s27 + $0x188] sm:$0xff] %vm485_vm0, %v3865_v7 }
 0x316   : > { %v4007_v63 = vpop.f32.mrf.mxu1 }
 0x317   : > { %v3978_v16 = vpop.f32.mrf.mxu0  ;;  %4129 = vst.msk [vmem:[%s6956_s27 + $0x1d0] sm:$0xff] %vm485_vm0, %v4007_v63 }
 0x318   : > { %v3952_v56 = vpop.f32.mrf.mxu3  ;;  %4127 = vst.msk [vmem:[%s6956_s27 + $0x1c0] sm:$0xff] %vm485_vm0, %v3978_v16 }
 0x319   : > { %4126 = vst.msk [vmem:[%s6956_s27 + $0x1b8] sm:$0xff] %vm485_vm0, %v3952_v56 }
 0x31e   : > { %v3923_v9 = vpop.f32.mrf.mxu2 }
 0x31f   : > { %4124 = vst.msk [vmem:[%s6956_s27 + $0x1a8] sm:$0xff] %vm485_vm0, %v3923_v9 }
 0x320   : > { %v4065_v23 = vpop.f32.mrf.mxu3 }
 0x321   : > { %4133 = vst.msk [vmem:[%s6956_s27 + $0x1f0] sm:$0xff] %vm485_vm0, %v4065_v23 }
 0x324   : > { %v3981_v45 = vpop.f32.mrf.mxu0 }
 0x325   : > { %4128 = vst.msk [vmem:[%s6956_s27 + $0x1c8] sm:$0xff] %vm485_vm0, %v3981_v45  ;;  %v4010_v34 = vpop.f32.mrf.mxu1 }
 0x326   : > { %4130 = vst.msk [vmem:[%s6956_s27 + $0x1d8] sm:$0xff] %vm485_vm0, %v4010_v34  ;;  %v4036_v61 = vpop.f32.mrf.mxu2 }
 0x327   : > { %4131 = vst.msk [vmem:[%s6956_s27 + $0x1e0] sm:$0xff] %vm485_vm0, %v4036_v61 }
 0x328   : > { %v4068_v26 = vpop.f32.mrf.mxu3 }
 0x329   : > { %4134 = vst.msk [vmem:[%s6956_s27 + $0x1f8] sm:$0xff] %vm485_vm0, %v4068_v26 }
 0x32e   : > { %v4039_v38 = vpop.f32.mrf.mxu2 }
 0x32f   : > { %4132 = vst.msk [vmem:[%s6956_s27 + $0x1e8] sm:$0xff] %vm485_vm0, %v4039_v38 }
 0x330 PF: > { %s13_s12 = sadd.s32 1, %s4702_s12  }
 0x331   : > { %p10_p4 = scmp.ge.s32.totalorder %s13_s12, 4  }
 0x333   :  { %12 = sbr.rel (!%p10_p4) target bundleno = 1 (0x1), region = 68 }

</bundles_post_ra>
